<compile_context>
chip_gen: v5e
topology: v5e:2x2
jax: 0.10.0
libtpu: 0.0.40
codegen_flags: <defaults>
</compile_context>

<pallas_src>
import functools

import numpy as np
import jax
import jax.numpy as jnp
from jax.experimental import pallas as pl
from jax.experimental.pallas import tpu as pltpu


def _round_up(x, m):
    return ((x + m - 1) // m) * m


def _tpu_vmem_capacity_bytes():
    try:
        return int(pltpu.get_tpu_info().vmem_capacity_bytes)
    except Exception:
        return 64 << 20          # conservative fallback (v7x per-TensorCore VMEM)


# --------------------------------------------------------------------------
# Parameter plumbing (glue): grouped conv weights -> block-diagonal dense
# weights (numerically identical: off-group entries are exactly zero).
# --------------------------------------------------------------------------
def dense_kxk_from_grouped(w, num_groups):
    # w: (Cout, Cin_per_group, K, K)  ->  (K, K, Cin, Cout)
    cout, cin_pg, K, _ = w.shape
    cout_pg = cout // num_groups
    cin = cin_pg * num_groups
    dense = jnp.zeros((K, K, cin, cout), w.dtype)
    for gi in range(num_groups):
        blk = jnp.transpose(w[gi * cout_pg:(gi + 1) * cout_pg], (2, 3, 1, 0))
        dense = dense.at[:, :, gi * cin_pg:(gi + 1) * cin_pg,
                         gi * cout_pg:(gi + 1) * cout_pg].set(blk)
    return dense


def dense_1x1_from_grouped(w, num_groups):
    # w: (Cout, Cin_per_group, 1, 1)  ->  (Cin, Cout)
    cout, cin_pg = w.shape[0], w.shape[1]
    cout_pg = cout // num_groups
    cin = cin_pg * num_groups
    dense = jnp.zeros((cin, cout), w.dtype)
    for gi in range(num_groups):
        blk = jnp.transpose(w[gi * cout_pg:(gi + 1) * cout_pg, :, 0, 0], (1, 0))
        dense = dense.at[gi * cin_pg:(gi + 1) * cin_pg,
                         gi * cout_pg:(gi + 1) * cout_pg].set(blk)
    return dense


# --------------------------------------------------------------------------
# Kernel 1 (tiny, single grid step over ALL batches): conv+BN+ReLU at only the
# needed spatial rows, radix-sum "gap", then 1x1 -> BN -> ReLU -> 1x1 (logits).
# Uses the same bf16 conv weights as the main kernel so both paths see the same y.
# --------------------------------------------------------------------------
def _attention_rows_kernel(pat_ref, wflat_ref, scale_ref, shift_ref, w1_ref, s1_ref,
                           sh1_ref, w2_ref, b2_ref, o_ref, *, radix, C):
    y = jnp.dot(pat_ref[...], wflat_ref[...], preferred_element_type=jnp.float32)
    y = jnp.maximum(y * scale_ref[...] + shift_ref[...], 0.0)        # (R, rC_pad)
    gap = y[:, 0:C]
    for r in range(1, radix):
        gap = gap + y[:, r * C:(r + 1) * C]
    h = jnp.dot(gap, w1_ref[...], preferred_element_type=jnp.float32)
    h = jnp.maximum(h * s1_ref[...] + sh1_ref[...], 0.0)
    o_ref[...] = jnp.dot(h, w2_ref[...], preferred_element_type=jnp.float32) + b2_ref[...]


def attention_rows(pat, w_flat, scale, shift, w1, s1, sh1, w2, b2, *, radix, C, rC):
    R, kkcin = pat.shape
    rC_pad = w_flat.shape[1]
    inter = w1.shape[1]
    kern = functools.partial(_attention_rows_kernel, radix=radix, C=C)
    return pl.pallas_call(
        kern,
        out_shape=jax.ShapeDtypeStruct((R, rC), jnp.float32),
        grid_spec=pltpu.PrefetchScalarGridSpec(
            num_scalar_prefetch=0,
            grid=(1,),                                    # one step: no per-batch launch churn
            in_specs=[
                pl.BlockSpec((R, kkcin), lambda i: (0, 0)),
                pl.BlockSpec((kkcin, rC_pad), lambda i: (0, 0)),
                pl.BlockSpec((1, rC_pad), lambda i: (0, 0)),
                pl.BlockSpec((1, rC_pad), lambda i: (0, 0)),
                pl.BlockSpec((C, inter), lambda i: (0, 0)),
                pl.BlockSpec((1, inter), lambda i: (0, 0)),
                pl.BlockSpec((1, inter), lambda i: (0, 0)),
                pl.BlockSpec((inter, rC), lambda i: (0, 0)),
                pl.BlockSpec((1, rC), lambda i: (0, 0)),
            ],
            out_specs=pl.BlockSpec((R, rC), lambda i: (0, 0)),
        ),
        compiler_params=pltpu.CompilerParams(dimension_semantics=("arbitrary",)),
    )(pat, w_flat, scale, shift, w1, s1, sh1, w2, b2)


# --------------------------------------------------------------------------
# Kernel 2 (main, fused): grouped KxK conv (bf16 im2col, one MXU matmul) + folded
# BN + ReLU + attention-weighted radix sum (VPU), tiled over (batch, row tiles).
# Output is written lane-dense as (B, C, H*W).
# --------------------------------------------------------------------------
def _fused_main_kernel(x_ref, wflat_ref, scale_ref, shift_ref, attw_ref, o_ref, pat_ref,
                       *, K, TH, Wout, stride, dilation, Cin, radix, C):
    rows = TH * Wout
    t = pl.program_id(1)
    h_base = pl.multiple_of(t * (TH * stride), TH * stride)          # aligned window start
    hread = (TH - 1) * stride + (K - 1) * dilation + 1
    x_blk = x_ref[0, pl.ds(h_base, hread), :, :]                     # (hread, Wp, Cin) bf16

    # im2col: pack the K*K taps of this row tile into a (rows, K*K*Cin) bf16 scratch so
    # the conv is a single big-contraction MXU matmul (no per-step f32->bf16 cast pass).
    for kh in range(K):
        for kw in range(K):
            h0 = kh * dilation
            w0 = kw * dilation
            tap = x_blk[h0:h0 + (TH - 1) * stride + 1:stride,
                        w0:w0 + (Wout - 1) * stride + 1:stride, :]   # (TH, Wout, Cin) bf16
            kk = kh * K + kw
            pat_ref[:, kk * Cin:(kk + 1) * Cin] = tap.reshape(rows, Cin)

    # conv (bf16 MXU operands, f32 accumulation) + folded BN + ReLU; the radix*C axis is
    # padded to a 128-lane multiple so the result / per-channel vectors are lane-dense.
    acc = jnp.dot(pat_ref[...], wflat_ref[...], preferred_element_type=jnp.float32)
    y = jnp.maximum(acc * scale_ref[...] + shift_ref[...], 0.0)      # (rows, rC_pad) f32

    # attention-weighted radix sum on the VPU: radix FMAs per output element (replaces
    # the old asel matmul whose MACs/traffic were dominated by structural zeros).
    aw = attw_ref[0]                                                 # (1, rC)
    out = aw[:, 0:C] * y[:, 0:C]
    for r in range(1, radix):
        out = out + aw[:, r * C:(r + 1) * C] * y[:, r * C:(r + 1) * C]

    # Lane-dense store: (C, rows) with rows (multiple of 128 when tiled) on lanes.
    # The XLU transpose is off the binding slot here (conv matmul dominates) -> keep it.
    o_ref[0] = jnp.transpose(out, (1, 0))


def _choose_tile_h(Hout, Wout, target_rows):
    # Row tiles must keep the output lane dim a multiple of 128 (or the full extent).
    valid = [th for th in range(1, Hout + 1)
             if Hout % th == 0 and (th == Hout or (th * Wout) % 128 == 0)]
    fit = [th for th in valid if th * Wout <= target_rows]
    return max(fit) if fit else min(valid)


def fused_conv_attend(xp, w_flat_bf16, scale_rc, shift_rc, attw, *, K, TH, Hout, Wout,
                      stride, dilation, Cin, rC, C, radix, vmem_cap):
    B, Hp, Wp, _ = xp.shape
    HW = Hout * Wout
    TR = TH * Wout
    NT = Hout // TH
    kkcin = K * K * Cin
    rC_pad = w_flat_bf16.shape[1]
    kern = functools.partial(_fused_main_kernel, K=K, TH=TH, Wout=Wout, stride=stride,
                             dilation=dilation, Cin=Cin, radix=radix, C=C)
    # Per-step VMEM estimate: bf16 input (double-buffered), bf16 weight, bf16 scratch,
    # f32 output tile (double-buffered) and live f32 intermediates.
    est = (2 * Hp * Wp * Cin * 2            # resident padded image (bf16, 2 buffers)
           + 2 * kkcin * rC_pad * 2         # conv weight (bf16)
           + 4 * rC_pad * 4 + 2 * rC * 4    # scale / shift / attw blocks
           + 2 * C * TR * 4                 # output tile (f32, 2 buffers)
           + TR * kkcin * 2                 # bf16 im2col scratch
           + 6 * TR * rC_pad * 4            # live f32 intermediates (acc, y, out)
           + (2 << 20))
    vmem_limit = int(min(max(2 * est, 16 << 20), vmem_cap))
    return pl.pallas_call(
        kern,
        out_shape=jax.ShapeDtypeStruct((B, C, HW), jnp.float32),
        grid_spec=pltpu.PrefetchScalarGridSpec(
            num_scalar_prefetch=0,
            grid=(B, NT),
            in_specs=[
                # TODO(synk): halo-window the H axis (hread rows per tile) via manual DMA
                # so only ~hread*Wp*Cin bytes are resident per step (v7x 64 MiB VMEM).
                pl.BlockSpec((1, Hp, Wp, Cin), lambda b, t: (b, 0, 0, 0)),   # resident/b
                pl.BlockSpec((kkcin, rC_pad), lambda b, t: (0, 0)),
                pl.BlockSpec((1, rC_pad), lambda b, t: (0, 0)),
                pl.BlockSpec((1, rC_pad), lambda b, t: (0, 0)),
                pl.BlockSpec((1, 1, rC), lambda b, t: (b, 0, 0)),
            ],
            out_specs=pl.BlockSpec((1, C, TR), lambda b, t: (b, 0, t)),
            scratch_shapes=[pltpu.VMEM((TR, kkcin), jnp.bfloat16)],
        ),
        compiler_params=pltpu.CompilerParams(
            # Megacore splits on the batch axis only (one resident image per TensorCore);
            # row tiles run serially per core so the input block is reused, not re-DMA'd.
            dimension_semantics=("parallel", "arbitrary"),
            vmem_limit_bytes=vmem_limit),
    )(xp, w_flat_bf16, scale_rc, shift_rc, attw)


# --------------------------------------------------------------------------
# SplitAttention forward (glue + kernel calls)
# --------------------------------------------------------------------------
def split_attention_forward(x_nchw, p, *, in_channels, channels, kernel_size,
                            stride, padding, dilation, groups, radix,
                            row_tile_target=None):
    B, Cin, H, W = x_nchw.shape
    assert Cin == in_channels
    C = channels
    rC = C * radix
    rC_pad = _round_up(rC, 128)
    K = kernel_size
    kkcin = K * K * Cin
    eps = 1e-5

    Hout = (H + 2 * padding - dilation * (K - 1) - 1) // stride + 1
    Wout = (W + 2 * padding - dilation * (K - 1) - 1) // stride + 1
    HW = Hout * Wout
    Hp, Wp = H + 2 * padding, W + 2 * padding

    # Generation-aware VMEM budget / tile target (v5e/v6e: 128 MiB, v7x: 64 MiB per TC).
    phys_vmem = _tpu_vmem_capacity_bytes()
    vmem_cap = max(min(int(0.75 * phys_vmem), 96 << 20), 24 << 20)
    if row_tile_target is None:
        row_tile_target = 1024 if phys_vmem >= (100 << 20) else 512

    # NCHW -> NHWC + spatial zero-pad, in bf16 (halves the dominant HBM read and the
    # resident VMEM image; the conv already accumulates in f32 on the MXU).
    x = jnp.transpose(x_nchw, (0, 2, 3, 1)).astype(jnp.bfloat16)
    xp = jnp.pad(x, ((0, 0), (padding, padding), (padding, padding), (0, 0)))

    # ---- radix_conv params: fold conv bias + BN1 (eval mode) into scale/shift; pad the
    #      radix*C axis to a 128-lane multiple (padded columns are never read). ----
    w_rc_dense = dense_kxk_from_grouped(p["w_rc"], groups * radix)      # (K,K,Cin,rC)
    w_rc_flat = w_rc_dense.reshape(kkcin, rC)
    w_flat = jnp.zeros((kkcin, rC_pad), jnp.float32).at[:, :rC].set(w_rc_flat)
    w_flat_bf16 = w_flat.astype(jnp.bfloat16)
    s1 = p["bn1_gamma"] / jnp.sqrt(p["bn1_var"] + eps)
    scale_rc = jnp.zeros((1, rC_pad), jnp.float32).at[0, :rC].set(s1)
    shift_rc = jnp.zeros((1, rC_pad), jnp.float32).at[0, :rC].set(
        (p["b_rc"] - p["bn1_mean"]) * s1 + p["bn1_beta"])

    # ---- attention 1x1 convs (fold BN2 + biases; tiny, kept f32) ----
    inter = p["w_a1"].shape[0]
    w1 = dense_1x1_from_grouped(p["w_a1"], groups)                      # (C, inter)
    s2 = p["bn2_gamma"] / jnp.sqrt(p["bn2_var"] + eps)
    scale_a1 = s2.reshape(1, inter)
    shift_a1 = ((p["b_a1"] - p["bn2_mean"]) * s2 + p["bn2_beta"]).reshape(1, inter)
    w2 = dense_1x1_from_grouped(p["w_a2"], groups)                      # (inter, rC)
    b2 = p["b_a2"].reshape(1, rC)

    # ---- static rSoftMax index plumbing: exactly reproduces the torch
    #      view(B,g,r,-1).transpose(1,2) -> softmax(dim=1) -> view(B,-1,1,1) -> split(C)
    #      (only the first radix*C flattened entries survive the zip truncation). ----
    rest = (rC * HW) // (groups * radix)
    j = np.arange(rC)
    rad_u = j // (groups * rest)
    rem = j % (groups * rest)
    grp_u = rem // rest
    rest_u = rem % rest
    gather_idx = (grp_u[None, :] * (radix * rest)
                  + np.arange(radix)[:, None] * rest
                  + rest_u[None, :])                                    # (radix, rC)
    ch_idx = gather_idx // HW
    sp_idx = gather_idx % HW
    # For radix == 1 this degenerates to all-ones weights (the module always softmaxes
    # over the radix axis; there is no sigmoid special case).
    sel = (np.arange(radix)[:, None] == rad_u[None, :]).astype(np.float32)

    S = np.unique(sp_idx)                       # distinct needed output spatial positions
    n_s = int(S.shape[0])
    n_s_pad = ((n_s + 7) // 8) * 8
    sp_local = np.searchsorted(S, sp_idx)       # (radix, rC)

    # Gather the K*K input taps for just those positions (tiny tensor, static indices).
    ho, wo = S // Wout, S % Wout
    kh_g, kw_g = np.meshgrid(np.arange(K), np.arange(K), indexing="ij")
    h_g = ho[:, None] * stride + (kh_g.reshape(-1) * dilation)[None, :]   # (n_s, K*K)
    w_g = wo[:, None] * stride + (kw_g.reshape(-1) * dilation)[None, :]
    patches = xp[:, h_g, w_g, :].reshape(B, n_s, kkcin)                   # bf16
    patches = jnp.pad(patches, ((0, 0), (0, n_s_pad - n_s), (0, 0)))
    pat_rows = patches.reshape(B * n_s_pad, kkcin)

    # ---- Pallas kernel 1 (one step, all batches): attention logits at needed rows ----
    att = attention_rows(pat_rows, w_flat_bf16, scale_rc, shift_rc, w1, scale_a1,
                         shift_a1, w2, b2, radix=radix, C=C, rC=rC)     # (B*n_s_pad, rC)
    att_s = att.reshape(B, n_s_pad, rC)

    # ---- tiny glue (radix*rC scalars per batch): gather logits, softmax over radix,
    #      select -> per-batch attention weights attw (B, rC). ----
    logits = att_s[:, sp_local, ch_idx]                                 # (B, radix, rC)
    probs = jax.nn.softmax(logits, axis=1)
    attw = jnp.sum(jnp.asarray(sel)[None] * probs, axis=1)              # (B, rC)
    attw = attw.reshape(B, 1, rC)

    # ---- Pallas kernel 2: fused conv + BN + ReLU + attention-weighted radix sum ----
    TH = _choose_tile_h(Hout, Wout, row_tile_target)
    out = fused_conv_attend(xp, w_flat_bf16, scale_rc, shift_rc, attw,
                            K=K, TH=TH, Hout=Hout, Wout=Wout, stride=stride,
                            dilation=dilation, Cin=Cin, rC=rC, C=C, radix=radix,
                            vmem_cap=vmem_cap)                          # (B, C, HW)
    return out.reshape(B, C, Hout, Wout)


# --------------------------------------------------------------------------
# Pure-JAX reference (mirrors the torch module op-by-op) for validation.
# --------------------------------------------------------------------------
def reference_forward(x, p, *, in_channels, channels, kernel_size, stride, padding,
                      dilation, groups, radix):
    del in_channels, kernel_size
    eps = 1e-5
    B = x.shape[0]
    C = channels
    rC = C * radix
    dn = ("NCHW", "OIHW", "NCHW")

    def bn(t, gamma, beta, mean, var):
        s = gamma / jnp.sqrt(var + eps)
        return t * s[None, :, None, None] + (beta - mean * s)[None, :, None, None]

    y = jax.lax.conv_general_dilated(
        x, p["w_rc"], window_strides=(stride, stride),
        padding=[(padding, padding), (padding, padding)],
        rhs_dilation=(dilation, dilation), dimension_numbers=dn,
        feature_group_count=groups * radix)
    y = y + p["b_rc"][None, :, None, None]
    y = jnp.maximum(bn(y, p["bn1_gamma"], p["bn1_beta"], p["bn1_mean"], p["bn1_var"]), 0.0)

    gap = sum(y[:, r * C:(r + 1) * C] for r in range(radix))
    a = jax.lax.conv_general_dilated(gap, p["w_a1"], (1, 1), [(0, 0), (0, 0)],
                                     dimension_numbers=dn, feature_group_count=groups)
    a = a + p["b_a1"][None, :, None, None]
    a = jnp.maximum(bn(a, p["bn2_gamma"], p["bn2_beta"], p["bn2_mean"], p["bn2_var"]), 0.0)
    a = jax.lax.conv_general_dilated(a, p["w_a2"], (1, 1), [(0, 0), (0, 0)],
                                     dimension_numbers=dn, feature_group_count=groups)
    a = a + p["b_a2"][None, :, None, None]

    # rSoftMax exactly as in the torch module, followed by the zip-truncated split/sum.
    a = a.reshape(B, groups, radix, -1)
    a = jnp.transpose(a, (0, 2, 1, 3))
    a = jax.nn.softmax(a, axis=1)
    a = a.reshape(B, -1)
    attw = a[:, :rC]
    out = sum(attw[:, r * C:(r + 1) * C, None, None] * y[:, r * C:(r + 1) * C]
              for r in range(radix))
    return out


# --------------------------------------------------------------------------
# Deterministic parameter initialization (synthetic; shapes match __init__)
# --------------------------------------------------------------------------
def init_params(key, in_channels, channels, kernel_size, groups, radix, reduction_factor):
    G1 = groups * radix
    rC = channels * radix
    inter = max(32, in_channels * radix // reduction_factor)
    ks = jax.random.split(key, 14)

    def nrm(k, shape, s=0.1):
        return s * jax.random.normal(k, shape, jnp.float32)

    return dict(
        w_rc=nrm(ks[0], (rC, in_channels // G1, kernel_size, kernel_size)),
        b_rc=nrm(ks[1], (rC,)),
        bn1_gamma=1.0 + nrm(ks[2], (rC,)),
        bn1_beta=nrm(ks[3], (rC,)),
        bn1_mean=nrm(ks[4], (rC,)),
        bn1_var=1.0 + jnp.abs(nrm(ks[5], (rC,))),
        w_a1=nrm(ks[6], (inter, channels // groups, 1, 1)),
        b_a1=nrm(ks[7], (inter,)),
        bn2_gamma=1.0 + nrm(ks[8], (inter,)),
        bn2_beta=nrm(ks[9], (inter,)),
        bn2_mean=nrm(ks[10], (inter,)),
        bn2_var=1.0 + jnp.abs(nrm(ks[11], (inter,))),
        w_a2=nrm(ks[12], (rC, inter // groups, 1, 1)),
        b_a2=nrm(ks[13], (rC,)),
    )


if __name__ == "__main__":
    B, in_channels, H, W = 2, 4, 16, 16
    channels, kernel_size = 4, 3
    stride, padding, dilation, groups, radix, reduction_factor = 1, 1, 1, 1, 2, 4

    key = jax.random.PRNGKey(0)
    kx, kp = jax.random.split(key)
    x = jax.random.normal(kx, (B, in_channels, H, W), jnp.float32)
    params = init_params(kp, in_channels, channels, kernel_size, groups, radix,
                         reduction_factor)

    cfg = dict(in_channels=in_channels, channels=channels, kernel_size=kernel_size,
               stride=stride, padding=padding, dilation=dilation, groups=groups,
               radix=radix)

    fwd = jax.jit(split_attention_forward,
                  static_argnames=("in_channels", "channels", "kernel_size", "stride",
                                   "padding", "dilation", "groups", "radix",
                                   "row_tile_target"))

    ref = jax.block_until_ready(reference_forward(x, params, **cfg))

    # Exercise both the single-tile path (TH == Hout) and the multi-row-tile path.
    out1 = jax.block_until_ready(fwd(x, params, **cfg))
    out2 = jax.block_until_ready(fwd(x, params, row_tile_target=128, **cfg))

    assert out1.shape == (B, channels, H, W), out1.shape
    assert out2.shape == (B, channels, H, W), out2.shape
    for o in (out1, out2):
        assert bool(jnp.all(jnp.isfinite(o)))
        err = float(jnp.max(jnp.abs(o - ref)))
        assert err < 5e-2, f"max abs error vs reference: {err}"
    print("KERNEL_OK")
</pallas_src>

<mosaic_0001>
module attributes {stable_mosaic.version = 11 : i64} {
  func.func @_attention_rows_kernel(%arg0: i32, %arg1: memref<16x36xbf16, #tpu.memory_space<vmem>>, %arg2: memref<36x128xbf16, #tpu.memory_space<vmem>>, %arg3: memref<1x128xf32, #tpu.memory_space<vmem>>, %arg4: memref<1x128xf32, #tpu.memory_space<vmem>>, %arg5: memref<4x32xf32, #tpu.memory_space<vmem>>, %arg6: memref<1x32xf32, #tpu.memory_space<vmem>>, %arg7: memref<1x32xf32, #tpu.memory_space<vmem>>, %arg8: memref<32x8xf32, #tpu.memory_space<vmem>>, %arg9: memref<1x8xf32, #tpu.memory_space<vmem>>, %arg10: memref<16x8xf32, #tpu.memory_space<vmem>>) attributes {dimension_semantics = [#tpu.dimension_semantics<arbitrary>], iteration_bounds = array<i64: 1>, scalar_prefetch = 0 : i64, scratch_operands = 0 : i64, tpu.core_type = #tpu.core_type<tc>, window_params = [{pipeline_mode = #tpu.pipeline_mode<synchronous>, transform_indices = @transform_0, window_bounds = array<i64: 16, 36>}, {pipeline_mode = #tpu.pipeline_mode<synchronous>, transform_indices = @transform_1, window_bounds = array<i64: 36, 128>}, {pipeline_mode = #tpu.pipeline_mode<synchronous>, transform_indices = @transform_2, window_bounds = array<i64: 1, 128>}, {pipeline_mode = #tpu.pipeline_mode<synchronous>, transform_indices = @transform_3, window_bounds = array<i64: 1, 128>}, {pipeline_mode = #tpu.pipeline_mode<synchronous>, transform_indices = @transform_4, window_bounds = array<i64: 4, 32>}, {pipeline_mode = #tpu.pipeline_mode<synchronous>, transform_indices = @transform_5, window_bounds = array<i64: 1, 32>}, {pipeline_mode = #tpu.pipeline_mode<synchronous>, transform_indices = @transform_6, window_bounds = array<i64: 1, 32>}, {pipeline_mode = #tpu.pipeline_mode<synchronous>, transform_indices = @transform_7, window_bounds = array<i64: 32, 8>}, {pipeline_mode = #tpu.pipeline_mode<synchronous>, transform_indices = @transform_8, window_bounds = array<i64: 1, 8>}, {pipeline_mode = #tpu.pipeline_mode<synchronous>, transform_indices = @transform_9, window_bounds = array<i64: 16, 8>}]} {
    %c0 = arith.constant 0 : index
    %c0_0 = arith.constant 0 : index
    %0 = vector.load %arg1[%c0, %c0_0] : memref<16x36xbf16, #tpu.memory_space<vmem>>, vector<16x36xbf16>
    %c0_1 = arith.constant 0 : index
    %c0_2 = arith.constant 0 : index
    %1 = vector.load %arg2[%c0_1, %c0_2] : memref<36x128xbf16, #tpu.memory_space<vmem>>, vector<36x128xbf16>
    %cst = arith.constant dense<0.000000e+00> : vector<16x128xf32>
    %2 = tpu.matmul %0, %1, %cst {dimension_numbers = #tpu.dot_dimension_numbers<[1], [0], [0], [1], [0, 0, 1, 1], [], []>} : vector<16x36xbf16>, vector<36x128xbf16>, vector<16x128xf32> -> vector<16x128xf32>
    %c0_3 = arith.constant 0 : index
    %c0_4 = arith.constant 0 : index
    %3 = vector.load %arg3[%c0_3, %c0_4] : memref<1x128xf32, #tpu.memory_space<vmem>>, vector<1x128xf32>
    %4 = vector.broadcast %3 : vector<1x128xf32> to vector<16x128xf32>
    %5 = arith.mulf %2, %4 : vector<16x128xf32>
    %c0_5 = arith.constant 0 : index
    %c0_6 = arith.constant 0 : index
    %6 = vector.load %arg4[%c0_5, %c0_6] : memref<1x128xf32, #tpu.memory_space<vmem>>, vector<1x128xf32>
    %7 = vector.broadcast %6 : vector<1x128xf32> to vector<16x128xf32>
    %8 = arith.addf %5, %7 : vector<16x128xf32>
    %cst_7 = arith.constant 0.000000e+00 : f32
    %9 = vector.broadcast %cst_7 : f32 to vector<16x128xf32>
    %10 = arith.maximumf %8, %9 : vector<16x128xf32>
    %11 = vector.extract_strided_slice %10 {offsets = [0, 0], sizes = [16, 4], strides = [1, 1]} : vector<16x128xf32> to vector<16x4xf32>
    %12 = vector.extract_strided_slice %10 {offsets = [0, 4], sizes = [16, 4], strides = [1, 1]} : vector<16x128xf32> to vector<16x4xf32>
    %13 = arith.addf %11, %12 : vector<16x4xf32>
    %c0_8 = arith.constant 0 : index
    %c0_9 = arith.constant 0 : index
    %14 = vector.load %arg5[%c0_8, %c0_9] : memref<4x32xf32, #tpu.memory_space<vmem>>, vector<4x32xf32>
    %cst_10 = arith.constant dense<0.000000e+00> : vector<16x32xf32>
    %15 = tpu.matmul %13, %14, %cst_10 {dimension_numbers = #tpu.dot_dimension_numbers<[1], [0], [0], [1], [0, 0, 1, 1], [], []>} : vector<16x4xf32>, vector<4x32xf32>, vector<16x32xf32> -> vector<16x32xf32>
    %c0_11 = arith.constant 0 : index
    %c0_12 = arith.constant 0 : index
    %16 = vector.load %arg6[%c0_11, %c0_12] : memref<1x32xf32, #tpu.memory_space<vmem>>, vector<1x32xf32>
    %17 = vector.broadcast %16 : vector<1x32xf32> to vector<16x32xf32>
    %18 = arith.mulf %15, %17 : vector<16x32xf32>
    %c0_13 = arith.constant 0 : index
    %c0_14 = arith.constant 0 : index
    %19 = vector.load %arg7[%c0_13, %c0_14] : memref<1x32xf32, #tpu.memory_space<vmem>>, vector<1x32xf32>
    %20 = vector.broadcast %19 : vector<1x32xf32> to vector<16x32xf32>
    %21 = arith.addf %18, %20 : vector<16x32xf32>
    %cst_15 = arith.constant 0.000000e+00 : f32
    %22 = vector.broadcast %cst_15 : f32 to vector<16x32xf32>
    %23 = arith.maximumf %21, %22 : vector<16x32xf32>
    %c0_16 = arith.constant 0 : index
    %c0_17 = arith.constant 0 : index
    %24 = vector.load %arg8[%c0_16, %c0_17] : memref<32x8xf32, #tpu.memory_space<vmem>>, vector<32x8xf32>
    %cst_18 = arith.constant dense<0.000000e+00> : vector<16x8xf32>
    %25 = tpu.matmul %23, %24, %cst_18 {dimension_numbers = #tpu.dot_dimension_numbers<[1], [0], [0], [1], [0, 0, 1, 1], [], []>} : vector<16x32xf32>, vector<32x8xf32>, vector<16x8xf32> -> vector<16x8xf32>
    %c0_19 = arith.constant 0 : index
    %c0_20 = arith.constant 0 : index
    %26 = vector.load %arg9[%c0_19, %c0_20] : memref<1x8xf32, #tpu.memory_space<vmem>>, vector<1x8xf32>
    %27 = vector.broadcast %26 : vector<1x8xf32> to vector<16x8xf32>
    %28 = arith.addf %25, %27 : vector<16x8xf32>
    %c0_21 = arith.constant 0 : index
    %c0_22 = arith.constant 0 : index
    %29 = vector.load %arg10[%c0_21, %c0_22] : memref<16x8xf32, #tpu.memory_space<vmem>>, vector<16x8xf32>
    tpu.vector_store %arg10[%c0_21, %c0_22], %28 {strides = array<i32>} : memref<16x8xf32, #tpu.memory_space<vmem>>, vector<16x8xf32>,
    return
  }
  func.func @transform_0(%arg0: i32) -> (i32, i32) {
    %c0_i32 = arith.constant 0 : i32
    %c0_i32_0 = arith.constant 0 : i32
    %c0_i32_1 = arith.constant 0 : i32
    return %c0_i32, %c0_i32_0 : i32, i32
  }
  func.func @transform_1(%arg0: i32) -> (i32, i32) {
    %c0_i32 = arith.constant 0 : i32
    %c0_i32_0 = arith.constant 0 : i32
    %c0_i32_1 = arith.constant 0 : i32
    return %c0_i32, %c0_i32_0 : i32, i32
  }
  func.func @transform_2(%arg0: i32) -> (i32, i32) {
    %c0_i32 = arith.constant 0 : i32
    %c0_i32_0 = arith.constant 0 : i32
    %c0_i32_1 = arith.constant 0 : i32
    return %c0_i32, %c0_i32_0 : i32, i32
  }
  func.func @transform_3(%arg0: i32) -> (i32, i32) {
    %c0_i32 = arith.constant 0 : i32
    %c0_i32_0 = arith.constant 0 : i32
    %c0_i32_1 = arith.constant 0 : i32
    return %c0_i32, %c0_i32_0 : i32, i32
  }
  func.func @transform_4(%arg0: i32) -> (i32, i32) {
    %c0_i32 = arith.constant 0 : i32
    %c0_i32_0 = arith.constant 0 : i32
    %c0_i32_1 = arith.constant 0 : i32
    return %c0_i32, %c0_i32_0 : i32, i32
  }
  func.func @transform_5(%arg0: i32) -> (i32, i32) {
    %c0_i32 = arith.constant 0 : i32
    %c0_i32_0 = arith.constant 0 : i32
    %c0_i32_1 = arith.constant 0 : i32
    return %c0_i32, %c0_i32_0 : i32, i32
  }
  func.func @transform_6(%arg0: i32) -> (i32, i32) {
    %c0_i32 = arith.constant 0 : i32
    %c0_i32_0 = arith.constant 0 : i32
    %c0_i32_1 = arith.constant 0 : i32
    return %c0_i32, %c0_i32_0 : i32, i32
  }
  func.func @transform_7(%arg0: i32) -> (i32, i32) {
    %c0_i32 = arith.constant 0 : i32
    %c0_i32_0 = arith.constant 0 : i32
    %c0_i32_1 = arith.constant 0 : i32
    return %c0_i32, %c0_i32_0 : i32, i32
  }
  func.func @transform_8(%arg0: i32) -> (i32, i32) {
    %c0_i32 = arith.constant 0 : i32
    %c0_i32_0 = arith.constant 0 : i32
    %c0_i32_1 = arith.constant 0 : i32
    return %c0_i32, %c0_i32_0 : i32, i32
  }
  func.func @transform_9(%arg0: i32) -> (i32, i32) {
    %c0_i32 = arith.constant 0 : i32
    %c0_i32_0 = arith.constant 0 : i32
    %c0_i32_1 = arith.constant 0 : i32
    return %c0_i32, %c0_i32_0 : i32, i32
  }
}

module attributes {stable_mosaic.version = 11 : i64} {
  func.func @_fused_main_kernel(%arg0: i32, %arg1: i32, %arg2: memref<1x18x18x4xbf16, #tpu.memory_space<vmem>>, %arg3: memref<36x128xbf16, #tpu.memory_space<vmem>>, %arg4: memref<1x128xf32, #tpu.memory_space<vmem>>, %arg5: memref<1x128xf32, #tpu.memory_space<vmem>>, %arg6: memref<1x1x8xf32, #tpu.memory_space<vmem>>, %arg7: memref<1x4x256xf32, #tpu.memory_space<vmem>>, %arg8: memref<256x36xbf16, #tpu.memory_space<vmem>>) attributes {dimension_semantics = [#tpu.dimension_semantics<parallel>, #tpu.dimension_semantics<arbitrary>], iteration_bounds = array<i64: 2, 1>, scalar_prefetch = 0 : i64, scratch_operands = 1 : i64, tpu.core_type = #tpu.core_type<tc>, window_params = [{transform_indices = @transform_0, window_bounds = array<i64: 1, 18, 18, 4>}, {pipeline_mode = #tpu.pipeline_mode<synchronous>, transform_indices = @transform_1, window_bounds = array<i64: 36, 128>}, {pipeline_mode = #tpu.pipeline_mode<synchronous>, transform_indices = @transform_2, window_bounds = array<i64: 1, 128>}, {pipeline_mode = #tpu.pipeline_mode<synchronous>, transform_indices = @transform_3, window_bounds = array<i64: 1, 128>}, {transform_indices = @transform_4, window_bounds = array<i64: 1, 1, 8>}, {transform_indices = @transform_5, window_bounds = array<i64: 1, 4, 256>}]} {
    %c16_i32 = arith.constant 16 : i32
    %0 = arith.muli %arg1, %c16_i32 : i32
    %1 = tpu.assume_multiple %0, 16 : i32
    %c0 = arith.constant 0 : index
    %2 = arith.index_cast %1 : i32 to index
    %c0_0 = arith.constant 0 : index
    %c0_1 = arith.constant 0 : index
    %3 = vector.load %arg2[%c0, %2, %c0_0, %c0_1] : memref<1x18x18x4xbf16, #tpu.memory_space<vmem>>, vector<1x18x18x4xbf16>
    %4 = vector.shape_cast %3 : vector<1x18x18x4xbf16> to vector<18x18x4xbf16>
    %5 = vector.extract_strided_slice %4 {offsets = [0, 0, 0], sizes = [16, 16, 4], strides = [1, 1, 1]} : vector<18x18x4xbf16> to vector<16x16x4xbf16>
    %6 = vector.shape_cast %5 : vector<16x16x4xbf16> to vector<256x4xbf16>
    %c0_2 = arith.constant 0 : index
    %c0_3 = arith.constant 0 : index
    %7 = vector.load %arg8[%c0_2, %c0_3] : memref<256x36xbf16, #tpu.memory_space<vmem>>, vector<256x4xbf16>
    tpu.vector_store %arg8[%c0_2, %c0_3], %6 {strides = array<i32>} : memref<256x36xbf16, #tpu.memory_space<vmem>>, vector<256x4xbf16>,
    %8 = vector.extract_strided_slice %4 {offsets = [0, 1, 0], sizes = [16, 16, 4], strides = [1, 1, 1]} : vector<18x18x4xbf16> to vector<16x16x4xbf16>
    %9 = vector.shape_cast %8 : vector<16x16x4xbf16> to vector<256x4xbf16>
    %c0_4 = arith.constant 0 : index
    %c4 = arith.constant 4 : index
    %10 = vector.load %arg8[%c0_4, %c4] : memref<256x36xbf16, #tpu.memory_space<vmem>>, vector<256x4xbf16>
    tpu.vector_store %arg8[%c0_4, %c4], %9 {strides = array<i32>} : memref<256x36xbf16, #tpu.memory_space<vmem>>, vector<256x4xbf16>,
    %11 = vector.extract_strided_slice %4 {offsets = [0, 2, 0], sizes = [16, 16, 4], strides = [1, 1, 1]} : vector<18x18x4xbf16> to vector<16x16x4xbf16>
    %12 = vector.shape_cast %11 : vector<16x16x4xbf16> to vector<256x4xbf16>
    %c0_5 = arith.constant 0 : index
    %c8 = arith.constant 8 : index
    %13 = vector.load %arg8[%c0_5, %c8] : memref<256x36xbf16, #tpu.memory_space<vmem>>, vector<256x4xbf16>
    tpu.vector_store %arg8[%c0_5, %c8], %12 {strides = array<i32>} : memref<256x36xbf16, #tpu.memory_space<vmem>>, vector<256x4xbf16>,
    %14 = vector.extract_strided_slice %4 {offsets = [1, 0, 0], sizes = [16, 16, 4], strides = [1, 1, 1]} : vector<18x18x4xbf16> to vector<16x16x4xbf16>
    %15 = vector.shape_cast %14 : vector<16x16x4xbf16> to vector<256x4xbf16>
    %c0_6 = arith.constant 0 : index
    %c12 = arith.constant 12 : index
    %16 = vector.load %arg8[%c0_6, %c12] : memref<256x36xbf16, #tpu.memory_space<vmem>>, vector<256x4xbf16>
    tpu.vector_store %arg8[%c0_6, %c12], %15 {strides = array<i32>} : memref<256x36xbf16, #tpu.memory_space<vmem>>, vector<256x4xbf16>,
    %17 = vector.extract_strided_slice %4 {offsets = [1, 1, 0], sizes = [16, 16, 4], strides = [1, 1, 1]} : vector<18x18x4xbf16> to vector<16x16x4xbf16>
    %18 = vector.shape_cast %17 : vector<16x16x4xbf16> to vector<256x4xbf16>
    %c0_7 = arith.constant 0 : index
    %c16 = arith.constant 16 : index
    %19 = vector.load %arg8[%c0_7, %c16] : memref<256x36xbf16, #tpu.memory_space<vmem>>, vector<256x4xbf16>
    tpu.vector_store %arg8[%c0_7, %c16], %18 {strides = array<i32>} : memref<256x36xbf16, #tpu.memory_space<vmem>>, vector<256x4xbf16>,
    %20 = vector.extract_strided_slice %4 {offsets = [1, 2, 0], sizes = [16, 16, 4], strides = [1, 1, 1]} : vector<18x18x4xbf16> to vector<16x16x4xbf16>
    %21 = vector.shape_cast %20 : vector<16x16x4xbf16> to vector<256x4xbf16>
    %c0_8 = arith.constant 0 : index
    %c20 = arith.constant 20 : index
    %22 = vector.load %arg8[%c0_8, %c20] : memref<256x36xbf16, #tpu.memory_space<vmem>>, vector<256x4xbf16>
    tpu.vector_store %arg8[%c0_8, %c20], %21 {strides = array<i32>} : memref<256x36xbf16, #tpu.memory_space<vmem>>, vector<256x4xbf16>,
    %23 = vector.extract_strided_slice %4 {offsets = [2, 0, 0], sizes = [16, 16, 4], strides = [1, 1, 1]} : vector<18x18x4xbf16> to vector<16x16x4xbf16>
    %24 = vector.shape_cast %23 : vector<16x16x4xbf16> to vector<256x4xbf16>
    %c0_9 = arith.constant 0 : index
    %c24 = arith.constant 24 : index
    %25 = vector.load %arg8[%c0_9, %c24] : memref<256x36xbf16, #tpu.memory_space<vmem>>, vector<256x4xbf16>
    tpu.vector_store %arg8[%c0_9, %c24], %24 {strides = array<i32>} : memref<256x36xbf16, #tpu.memory_space<vmem>>, vector<256x4xbf16>,
    %26 = vector.extract_strided_slice %4 {offsets = [2, 1, 0], sizes = [16, 16, 4], strides = [1, 1, 1]} : vector<18x18x4xbf16> to vector<16x16x4xbf16>
    %27 = vector.shape_cast %26 : vector<16x16x4xbf16> to vector<256x4xbf16>
    %c0_10 = arith.constant 0 : index
    %c28 = arith.constant 28 : index
    %28 = vector.load %arg8[%c0_10, %c28] : memref<256x36xbf16, #tpu.memory_space<vmem>>, vector<256x4xbf16>
    tpu.vector_store %arg8[%c0_10, %c28], %27 {strides = array<i32>} : memref<256x36xbf16, #tpu.memory_space<vmem>>, vector<256x4xbf16>,
    %29 = vector.extract_strided_slice %4 {offsets = [2, 2, 0], sizes = [16, 16, 4], strides = [1, 1, 1]} : vector<18x18x4xbf16> to vector<16x16x4xbf16>
    %30 = vector.shape_cast %29 : vector<16x16x4xbf16> to vector<256x4xbf16>
    %c0_11 = arith.constant 0 : index
    %c32 = arith.constant 32 : index
    %31 = vector.load %arg8[%c0_11, %c32] : memref<256x36xbf16, #tpu.memory_space<vmem>>, vector<256x4xbf16>
    tpu.vector_store %arg8[%c0_11, %c32], %30 {strides = array<i32>} : memref<256x36xbf16, #tpu.memory_space<vmem>>, vector<256x4xbf16>,
    %c0_12 = arith.constant 0 : index
    %c0_13 = arith.constant 0 : index
    %32 = vector.load %arg8[%c0_12, %c0_13] : memref<256x36xbf16, #tpu.memory_space<vmem>>, vector<256x36xbf16>
    %c0_14 = arith.constant 0 : index
    %c0_15 = arith.constant 0 : index
    %33 = vector.load %arg3[%c0_14, %c0_15] : memref<36x128xbf16, #tpu.memory_space<vmem>>, vector<36x128xbf16>
    %cst = arith.constant dense<0.000000e+00> : vector<256x128xf32>
    %34 = tpu.matmul %32, %33, %cst {dimension_numbers = #tpu.dot_dimension_numbers<[1], [0], [0], [1], [0, 0, 1, 1], [], []>} : vector<256x36xbf16>, vector<36x128xbf16>, vector<256x128xf32> -> vector<256x128xf32>
    %c0_16 = arith.constant 0 : index
    %c0_17 = arith.constant 0 : index
    %35 = vector.load %arg4[%c0_16, %c0_17] : memref<1x128xf32, #tpu.memory_space<vmem>>, vector<1x128xf32>
    %36 = vector.broadcast %35 : vector<1x128xf32> to vector<256x128xf32>
    %37 = arith.mulf %34, %36 : vector<256x128xf32>
    %c0_18 = arith.constant 0 : index
    %c0_19 = arith.constant 0 : index
    %38 = vector.load %arg5[%c0_18, %c0_19] : memref<1x128xf32, #tpu.memory_space<vmem>>, vector<1x128xf32>
    %39 = vector.broadcast %38 : vector<1x128xf32> to vector<256x128xf32>
    %40 = arith.addf %37, %39 : vector<256x128xf32>
    %cst_20 = arith.constant 0.000000e+00 : f32
    %41 = vector.broadcast %cst_20 : f32 to vector<256x128xf32>
    %42 = arith.maximumf %40, %41 : vector<256x128xf32>
    %c0_21 = arith.constant 0 : index
    %c0_22 = arith.constant 0 : index
    %c0_23 = arith.constant 0 : index
    %43 = vector.load %arg6[%c0_21, %c0_22, %c0_23] : memref<1x1x8xf32, #tpu.memory_space<vmem>>, vector<1x1x8xf32>
    %44 = vector.shape_cast %43 : vector<1x1x8xf32> to vector<1x8xf32>
    %45 = vector.extract_strided_slice %44 {offsets = [0, 0], sizes = [1, 4], strides = [1, 1]} : vector<1x8xf32> to vector<1x4xf32>
    %46 = vector.extract_strided_slice %42 {offsets = [0, 0], sizes = [256, 4], strides = [1, 1]} : vector<256x128xf32> to vector<256x4xf32>
    %47 = vector.broadcast %45 : vector<1x4xf32> to vector<256x4xf32>
    %48 = arith.mulf %47, %46 : vector<256x4xf32>
    %49 = vector.extract_strided_slice %44 {offsets = [0, 4], sizes = [1, 4], strides = [1, 1]} : vector<1x8xf32> to vector<1x4xf32>
    %50 = vector.extract_strided_slice %42 {offsets = [0, 4], sizes = [256, 4], strides = [1, 1]} : vector<256x128xf32> to vector<256x4xf32>
    %51 = vector.broadcast %49 : vector<1x4xf32> to vector<256x4xf32>
    %52 = arith.mulf %51, %50 : vector<256x4xf32>
    %53 = arith.addf %48, %52 : vector<256x4xf32>
    %54 = tpu.transpose %53, [1, 0] : vector<256x4xf32> -> vector<4x256xf32>
    %c0_24 = arith.constant 0 : index
    %c0_25 = arith.constant 0 : index
    %c0_26 = arith.constant 0 : index
    %55 = vector.load %arg7[%c0_24, %c0_25, %c0_26] : memref<1x4x256xf32, #tpu.memory_space<vmem>>, vector<1x4x256xf32>
    %56 = vector.shape_cast %55 : vector<1x4x256xf32> to vector<4x256xf32>
    %57 = vector.shape_cast %54 : vector<4x256xf32> to vector<1x4x256xf32>
    tpu.vector_store %arg7[%c0_24, %c0_25, %c0_26], %57 {strides = array<i32>} : memref<1x4x256xf32, #tpu.memory_space<vmem>>, vector<1x4x256xf32>,
    return
  }
  func.func @transform_0(%arg0: i32, %arg1: i32) -> (i32, i32, i32, i32) {
    %c0_i32 = arith.constant 0 : i32
    %c0_i32_0 = arith.constant 0 : i32
    %c0_i32_1 = arith.constant 0 : i32
    %c0_i32_2 = arith.constant 0 : i32
    return %arg0, %c0_i32, %c0_i32_0, %c0_i32_1 : i32, i32, i32, i32
  }
  func.func @transform_1(%arg0: i32, %arg1: i32) -> (i32, i32) {
    %c0_i32 = arith.constant 0 : i32
    %c0_i32_0 = arith.constant 0 : i32
    %c0_i32_1 = arith.constant 0 : i32
    return %c0_i32, %c0_i32_0 : i32, i32
  }
  func.func @transform_2(%arg0: i32, %arg1: i32) -> (i32, i32) {
    %c0_i32 = arith.constant 0 : i32
    %c0_i32_0 = arith.constant 0 : i32
    %c0_i32_1 = arith.constant 0 : i32
    return %c0_i32, %c0_i32_0 : i32, i32
  }
  func.func @transform_3(%arg0: i32, %arg1: i32) -> (i32, i32) {
    %c0_i32 = arith.constant 0 : i32
    %c0_i32_0 = arith.constant 0 : i32
    %c0_i32_1 = arith.constant 0 : i32
    return %c0_i32, %c0_i32_0 : i32, i32
  }
  func.func @transform_4(%arg0: i32, %arg1: i32) -> (i32, i32, i32) {
    %c0_i32 = arith.constant 0 : i32
    %c0_i32_0 = arith.constant 0 : i32
    %c0_i32_1 = arith.constant 0 : i32
    return %arg0, %c0_i32, %c0_i32_0 : i32, i32, i32
  }
  func.func @transform_5(%arg0: i32, %arg1: i32) -> (i32, i32, i32) {
    %c0_i32 = arith.constant 0 : i32
    %c0_i32_0 = arith.constant 0 : i32
    return %arg0, %c0_i32, %arg1 : i32, i32, i32
  }
}

</mosaic_0001>

<bundles_post_ra>
// kernel: split_attention_forward.2
= control target key start
LH: loop header
LB: loop body
LE: loop exit
PB: predicated region body
PF: predicated region fallthrough
CT: control target
= control target key end

     0   :  { %vm64_vm0 = vcmask 1041408   ;;  %vm60_vm1 = vcmask 293888   ;;  %vm114_vm2 = vcmask 1043456   ;;  %vm107_vm3 = vcmask 31744   ;;  %s326_s1 = inlined_call_operand.vmem [shape: bf16[36,128], index: 1, kind: input, shape index: {}]   ;;  %s327_s2 = inlined_call_operand.vmem [shape: f32[1,128], index: 2, kind: input, shape index: {}]   ;;  %s328_s0 = inlined_call_operand.vmem [shape: bf16[16,36], index: 0, kind: input, shape index: {}]   ;;  %s329_s3 = inlined_call_operand.vmem [shape: f32[1,128], index: 3, kind: input, shape index: {}]   ;;  %s330_s5 = inlined_call_operand.vmem [shape: f32[1,32], index: 5, kind: input, shape index: {}]   ;;  %s331_s6 = inlined_call_operand.vmem [shape: f32[1,32], index: 6, kind: input, shape index: {}]   ;;  %s332_s4 = inlined_call_operand.vmem [shape: f32[4,32], index: 4, kind: input, shape index: {}]   ;;  %s333_s8 = inlined_call_operand.vmem [shape: f32[1,8], index: 8, kind: input, shape index: {}]   ;;  %s334_s7 = inlined_call_operand.vmem [shape: f32[32,8], index: 7, kind: input, shape index: {}]   ;;  %s335_s9 = inlined_call_operand.vmem [shape: f32[16,8], index: 9, kind: output, shape index: {}]  }
   0x1   :  { %v39_v0 = vld [vmem:[%s326_s1 + $0x10] sm:$0x3]  ;;  %v220_v4 = vld [vmem:[%s326_s1 + $0x8] sm:$0xff]  ;;  %v219_v5 = vld [vmem:[%s326_s1] sm:$0xff]  ;;  %s227_s1 = smov 124   ;;  %vm163_vm4 = vcmask 261120  }
   0x2   :  { %v54_v1 = vunpack.c.l.b16 %v39_v0  ;;  %v218_v6 = vld [vmem:[%s328_s0] sm:$0xff]  ;;  %v158_v22 = vld [vmem:[%s334_s7 + $0x18] sm:$0xff]  ;;  %v157_v23 = vld [vmem:[%s334_s7 + $0x10] sm:$0xff]  ;;  %vm193_vm5 = vcmask 64512  }
   0x3   :  { %v222_v7 = vld [vmem:[%s327_s2] ss:$0 sm:$0xff]  ;;  %182 = vmatpush.msra.mxu2 %v158_v22  ;;  %v156_v24 = vld [vmem:[%s334_s7 + $0x8] sm:$0xff] }
   0x4   :  { %v57_v2 = vpack.c.b16 %v54_v1, %v54_v1  ;;  %v223_v8 = vld [vmem:[%s329_s3] ss:$0 sm:$0xff] }
   0x5   :  { %v106_v17 = vld [vmem:[%s332_s4] sm:$0xf]  ;;  %183 = vmatpush.msra.mxu2 %v157_v23 }
   0x6   :  { %v66_v3 = vsel %vm64_vm0, %v57_v2, 0  ;;  %213 = vmatpush.msk.msra.mxu1 %vm114_vm2, %v106_v17  ;;  %v155_v25 = vld [vmem:[%s334_s7] sm:$0xff] }
   0x7   :  { %73 = vmatpush.bf16.msra.mxu0 %v66_v3  ;;  %184 = vmatpush.msra.mxu2 %v156_v24  ;;  %v224_v26 = vld [vmem:[%s330_s5] ss:$0 sm:$0xff] }
   0x8   :  { %v225_v27 = vld [vmem:[%s331_s6] ss:$0 sm:$0xff] }
   0x9   :  { %185 = vmatpush.msra.mxu2 %v155_v25  ;;  %v226_v36 = vld [vmem:[%s333_s8] ss:$0 sm:$0xff] }
   0xb   :  { %74 = vmatpush.bf16.msra.mxu0 %v220_v4 }
   0xf   :  { %75 = vmatpush.bf16.msra.mxu0 %v219_v5 }
  0x12   :  { %212 = vmatmul.msk.bf16.vlgmr.msra.gmra.mxu0 %vm60_vm1, %v218_v6 }
  0x8f   :  { %v77_v9 = vpop.f32.mrf.mxu0 }
  0x90   :  { %v86_v10 = vmul.f32 %v222_v7, %v77_v9 }
  0x92   :  { %v92_v11 = vadd.f32 %v223_v8, %v86_v10 }
  0x94   :  { %v94_v12 = vmax.f32 %v92_v11, 0.0 }
  0x96   :  { %98 = vrot.lane.b32.xlu0 %v94_v12, %s227_s1 }
  0x97   :  { %v79_v13 = vpop.f32.mrf.mxu0 }
  0x98   :  { %v87_v14 = vmul.f32 %v222_v7, %v79_v13 }
  0x9a   :  { %v93_v15 = vadd.f32 %v223_v8, %v87_v14 }
  0x9c   :  { %v95_v16 = vmax.f32 %v93_v15, 0.0 }
  0x9e   :  { %100 = vrot.lane.b32.xlu0 %v95_v16, %s227_s1 }
 0x108   :  { %v99_v18 = vpop.permute.xlu0 %98 }
 0x109   :  { %v104_v19 = vadd.f32 %v99_v18, %v94_v12 }
 0x10b   :  { %214 = vmatmul.msk.f32.vlgmr.msra.gmra.mxu1 %vm107_vm3, %v104_v19 }
 0x110   :  { %v101_v20 = vpop.permute.xlu0 %100 }
 0x111   :  { %v105_v21 = vadd.f32 %v101_v20, %v95_v16 }
 0x113   :  { %215 = vmatmul.msk.f32.gmra.mxu1 %vm107_vm3, %v105_v21 }
 0x188   :  { %v135_v28 = vpop.f32.mrf.mxu1 }
 0x189   :  { %v145_v29 = vmul.f32 %v224_v26, %v135_v28 }
 0x18b   :  { %v151_v30 = vadd.f32 %v225_v27, %v145_v29 }
 0x18d   :  { %v153_v31 = vmax.f32 %v151_v30, 0.0 }
 0x18f   :  { %216 = vmatmul.msk.f32.vlgmr.msra.gmra.mxu2 %vm163_vm4, %v153_v31 }
 0x190   :  { %v138_v32 = vpop.f32.mrf.mxu1 }
 0x191   :  { %v146_v33 = vmul.f32 %v224_v26, %v138_v32 }
 0x193   :  { %v152_v34 = vadd.f32 %v225_v27, %v146_v33 }
 0x195   :  { %v154_v35 = vmax.f32 %v152_v34, 0.0 }
 0x197   :  { %217 = vmatmul.msk.f32.gmra.mxu2 %vm163_vm4, %v154_v35 }
 0x212   :  { %v187_v37 = vpop.f32.mrf.mxu2 }
 0x213   :  { %v188_v38 = vadd.f32 %v226_v36, %v187_v37 }
 0x215   :  { %194 = vst.msk [vmem:[%s335_s9] sm:$0xff] %vm193_vm5, %v188_v38 }
 0x21a   :  { %v190_v39 = vpop.f32.mrf.mxu2 }
 0x21b   :  { %v191_v40 = vadd.f32 %v226_v36, %v190_v39 }
 0x21d   :  { %195 = vst.msk [vmem:[%s335_s9 + $0x8] sm:$0xff] %vm193_vm5, %v191_v40 }

// kernel: split_attention_forward.3
= control target key start
LH: loop header
LB: loop body
LE: loop exit
PB: predicated region body
PF: predicated region fallthrough
CT: control target
= control target key end

     0   :  { %s2985_s18 = smov 0   ;;  %s2987_s19 = smov 0   ;;  %s4760_s0 = inlined_call_operand.vmem [shape: bf16[2,18,18,4], index: 0, kind: input, shape index: {}]   ;;  %s4761_s1 = inlined_call_operand.vmem [shape: bf16[36,128], index: 1, kind: input, shape index: {}]   ;;  %s4762_s2 = inlined_call_operand.vmem [shape: f32[1,128], index: 2, kind: input, shape index: {}]   ;;  %s4763_s3 = inlined_call_operand.vmem [shape: f32[1,128], index: 3, kind: input, shape index: {}]   ;;  %s4764_s4 = inlined_call_operand.vmem [shape: f32[2,1,8], index: 4, kind: input, shape index: {}]   ;;  %s4765_s5 = inlined_call_operand.vmem [shape: f32[2,4,256], index: 5, kind: output, shape index: {}]  }
   0x1   :  { %s2989_s20 = smov 0  }
   0x2 LB: > { %s27_s21 = sadd.s32 1, %s2940_s19  ;;  %p2745_p0 = scmp.ge.s32.totalorder %s2944_s20, 1  ;;  %s2944_s20 = sphi %s2989_s20, %s15_s20   ;;  %s2940_s19 = sphi %s2987_s19, %s5001_s19   ;;  %s2936_s18 = sphi %s2985_s18, %s5000_s18  }
   0x3   : > { %p29_p1 = scmp.ge.s32.totalorder %s27_s21, 2  ;;  %p209_p2 = scmp.lt.s32.totalorder %s2944_s20, 3 }
   0x5   : > { %s5003_s21 = smov (%p29_p1, %s27_s21), 0  ;;  %p210_p3 = pnand %p2745_p0, %p209_p2 }
   0x7   : > { %213 = sbr.rel (%p210_p3) target bundleno = 1252 (0x4e4), region = 40 }
   0xc   : > { %p244_p4 = scmp.lt.s32.totalorder %s2936_s18, 1  ;;  %vm354_vm0 = vsmask.f32 3328  ;;  %vm355_vm1 = vsmask.f32 7440  ;;  %s2946_s26 = smov 4  }
   0xd   : > { %vm3045_vm2 = vmor %vm354_vm0, %vm355_vm1  ;;  %vm918_vm3 = vcmask 1042432   ;;  %vm919_vm4 = vcmask 1046532   ;;  %vm321_vm5 = vcmask 27648   ;;  %s2947_s27 = smov 8   ;;  %vm837_vm7 = vcmask 60448   ;;  %s2948_s28 = smov 12  }
   0xe   : > { %s5005_s18 = smov (!%p244_p4, %s2936_s18), 1  ;;  %vm3432_vm6 = vmor %vm918_vm3, %vm919_vm4  ;;  %vm1129_vm8 = vcmask 93248   ;;  %s2949_s29 = smov 16   ;;  %vm1260_vm9 = vcmask 126048   ;;  %vm1413_vm10 = vcmask 158848   ;;  %vm1550_vm11 = vcmask 191648  }
   0xf   : > { %s2885_s22 = smul.u32 216, %s5005_s18  ;;  %s2950_s30 = smov 20   ;;  %vm1681_vm12 = vcmask 224448   ;;  %vm1834_vm13 = vcmask 257248   ;;  %vm2185_vm14 = vcmask 1041408   ;;  %vm1971_vm15 = vcmask 290048  }
  0x10   : > { %s2951_s6 = smov 24   ;;  %s2952_s7 = smov 28   ;;  %vm2136_vm0 = vcmask 293888   ;;  %vm2645_vm1 = vcmask 1043456  }
  0x11   : > { %s3009_s25 = scalar_lea.vmem %s4760_s0, %s2885_s22  ;;  %s2953_s8 = smov 32  }
  0x12   : > { %v3012_v0 = vld [vmem:[%s3009_s25 + $0xc] sm:$0xf]  ;;  %v3015_v1 = vld [vmem:[%s3009_s25 + $0x10] sm:$0xf]  ;;  %v3018_v2 = vld [vmem:[%s3009_s25] sm:$0xf]  ;;  %s251_s17 = scalar_lea.vmem %s4764_s4, %s5005_s18 }
  0x13   : > { %v382_v3 = vshrl.u32 %v3012_v0, 16  ;;  %v385_v4 = vshll.u32 %v3012_v0, 16  ;;  %v391_v5 = vshll.u32 %v3015_v1, 16  ;;  %v3024_v6 = vld [vmem:[%s3009_s25 + $0x4] sm:$0xf]  ;;  %v358_v7 = vshrl.u32 %v3018_v2, 16 }
  0x14   : > { %v361_v8 = vshll.u32 %v3018_v2, 16  ;;  %v367_v9 = vshll.u32 %v3024_v6, 16  ;;  %v3030_v10 = vld [vmem:[%s3009_s25 + $0x14] sm:$0x1]  ;;  %v395_v11 = vshrl.u32 %v3015_v1, 16  ;;  %v371_v12 = vshrl.u32 %v3024_v6, 16 }
  0x15   : > { %v384_v13 = vrot.slane %v382_v3, 4  ;;  %v387_v14 = vrot.slane %v385_v4, 5  ;;  %v393_v15 = vrot.slane %v391_v5, 5  ;;  %v360_v16 = vrot.slane %v358_v7, 4  ;;  %v3035_v17 = vld [vmem:[%s3009_s25 + $0x8] sm:$0x1] }
  0x16   : > { %v363_v18 = vrot.slane %v361_v8, 5  ;;  %v369_v19 = vrot.slane %v367_v9, 5  ;;  %v397_v20 = vrot.slane %v395_v11, 4  ;;  %v401_v21 = vshll.u32 %v3030_v10, 16  ;;  %v3039_v22 = vld [vmem:[%s3009_s25 + $0x28] sm:$0xf] }
  0x17   : > { %v388_v23 = vor.u32 %v387_v14, %v384_v13  ;;  %v373_v24 = vrot.slane %v371_v12, 4  ;;  %v377_v25 = vshll.u32 %v3035_v17, 16  ;;  %v439_v26 = vshll.u32 %v3039_v22, 16  ;;  %v3051_v31 = vld [vmem:[%s3009_s25 + $0x24] sm:$0xf] }
  0x18   : > { %v364_v28 = vor.u32 %v363_v18, %v360_v16  ;;  %v398_v29 = vor.u32 %v397_v20, %v393_v15  ;;  %v443_v30 = vshrl.u32 %v3039_v22, 16  ;;  %v403_v35 = vrot.slane %v401_v21, 5  ;;  %v3054_v37 = vld [vmem:[%s3009_s25 + $0x18] sm:$0xf]  ;;  %v3065_v42 = vld [vmem:[%s3009_s25 + $0x1c] sm:$0xf] }
  0x19   : > { %v389_v32 = vrot.slane %v388_v23, 4  ;;  %v374_v33 = vor.u32 %v373_v24, %v369_v19  ;;  %v379_v36 = vrot.slane %v377_v25, 5  ;;  %v3060_v39 = vrot.slane %v439_v26, 5  ;;  %v3072_v46 = vld [vmem:[%s3009_s25 + $0x2c] sm:$0x1] }
  0x1a   : > { %v365_v34 = vrot.slane %v364_v28, 4  ;;  %v430_v40 = vshrl.u32 %v3051_v31, 16  ;;  %v433_v41 = vshll.u32 %v3051_v31, 16  ;;  %v399_v44 = vrot.slane %v398_v29, 4  ;;  %v3079_v53 = vld [vmem:[%s3009_s25 + $0x3c] sm:$0xf] }
  0x1b   : > { %v3058_v38 = vsel %vm3045_vm2, %v389_v32, %v393_v15  ;;  %v375_v45 = vrot.slane %v374_v33, 4  ;;  %v445_v47 = vrot.slane %v443_v30, 4  ;;  %v406_v50 = vshrl.u32 %v3054_v37, 16  ;;  %v3083_v56 = vld [vmem:[%s3009_s25 + $0x34] sm:$0xf] }
  0x1c   : > { %4861 = vst [vmem:[#allocation3_spill] sm:$0xff] %v3058_v38  ;;  %745 = vrot.lane.b32.xlu1 %v3058_v38, %s2946_s26  ;;  %v370_v43 = vsel %vm3045_vm2, %v365_v34, %v369_v19  ;;  %v432_v48 = vrot.slane %v430_v40, 4  ;;  %v435_v49 = vrot.slane %v433_v41, 5  ;;  %v409_v51 = vshll.u32 %v3054_v37, 16  ;;  %v3095_v4 = vld [vmem:[%s3009_s25 + $0x20] sm:$0x1] }
  0x1d   : > { %741 = vrot.lane.b32.xlu0 %v370_v43, %s2946_s26  ;;  %v415_v52 = vshll.u32 %v3065_v42, 16  ;;  %v449_v54 = vshll.u32 %v3072_v46, 16  ;;  %v408_v55 = vrot.slane %v406_v50, 4  ;;  %v3087_v57 = vsel %vm3045_vm2, %v399_v44, %v403_v35  ;;  %v3104_v16 = vld [vmem:[%s3009_s25 + $0x4c] sm:$0xf] }
  0x1e   : > { %4862 = vst [vmem:[#allocation4_spill] sm:$0xff] %v3087_v57  ;;  %v380_v58 = vsel %vm3045_vm2, %v375_v45, %v379_v36  ;;  %v446_v59 = vor.u32 %v445_v47, %v3060_v39  ;;  %v411_v60 = vrot.slane %v409_v51, 5  ;;  %v436_v61 = vor.u32 %v435_v49, %v432_v48  ;;  %v3108_v19 = vld [vmem:[%s3009_s25 + $0x40] sm:$0xf]  ;;  %v3115_v24 = vld [vmem:[%s3009_s25 + $0x38] sm:$0x1] }
  0x1f   : > { %v417_v62 = vrot.slane %v415_v52, 5  ;;  %v478_v63 = vshrl.u32 %v3079_v53, 16  ;;  %v481_v3 = vshll.u32 %v3079_v53, 16  ;;  %v463_v7 = vshll.u32 %v3083_v56, 16  ;;  %v3118_v29 = vld [vmem:[%s3009_s25 + $0x30] sm:$0xf] }
  0x20   : > { %v412_v5 = vor.u32 %v411_v60, %v408_v55  ;;  %v467_v8 = vshrl.u32 %v3083_v56, 16  ;;  %v419_v9 = vshrl.u32 %v3065_v42, 16  ;;  %v451_v11 = vrot.slane %v449_v54, 5  ;;  %v3125_v33 = vld [vmem:[%s3009_s25 + $0x48] sm:$0xf] }
  0x21   : > { %v447_v12 = vrot.slane %v446_v59, 4  ;;  %v425_v15 = vshll.u32 %v3095_v4, 16  ;;  %v437_v18 = vrot.slane %v436_v61, 4  ;;  %v480_v20 = vrot.slane %v478_v63, 4  ;;  %v3311_v38 = vld [vmem:[%s3009_s25 + $0xa8] sm:$0xf] }
  0x22   : > { %v413_v13 = vrot.slane %v412_v5, 4  ;;  %v421_v14 = vrot.slane %v419_v9, 4  ;;  %v483_v21 = vrot.slane %v481_v3, 5  ;;  %v465_v25 = vrot.slane %v463_v7, 5  ;;  %v3154_v7 = vld [vmem:[%s3009_s25 + $0x60] sm:$0xf] }
  0x23   : > { %v469_v26 = vrot.slane %v467_v8, 4  ;;  %v511_v30 = vshll.u32 %v3104_v16, 16  ;;  %v515_v32 = vshrl.u32 %v3104_v16, 16  ;;  %v3129_v34 = vsel %vm3045_vm2, %v447_v12, %v451_v11  ;;  %v3160_v11 = vld [vmem:[%s3009_s25 + $0x58] sm:$0xf] }
  0x24   : > { %747 = vrot.lane.b32.xlu1 %v3087_v57, %s2946_s26  ;;  %v3112_v23 = vsel %vm3045_vm2, %v413_v13, %v417_v62  ;;  %v422_v28 = vor.u32 %v421_v14, %v417_v62  ;;  %4864 = vst [vmem:[#allocation6_spill] sm:$0xff] %v3129_v34  ;;  %v487_v35 = vshll.u32 %v3108_v19, 16  ;;  %v427_v40 = vrot.slane %v425_v15, 5  ;;  %v3164_v14 = vld [vmem:[%s3009_s25 + $0x44] sm:$0x1] }
  0x25   : > { %743 = vrot.lane.b32.xlu0 %v380_v58, %s2946_s26  ;;  %4863 = vst [vmem:[#allocation5_spill] sm:$0xff] %v3112_v23  ;;  %749 = vrot.lane.b32.xlu2 %v3112_v23, %s2946_s26  ;;  %v484_v41 = vor.u32 %v483_v21, %v480_v20  ;;  %v473_v43 = vshll.u32 %v3115_v24, 16  ;;  %v454_v44 = vshrl.u32 %v3118_v29, 16  ;;  %v457_v45 = vshll.u32 %v3118_v29, 16 }
  0x26   : > { %v423_v36 = vrot.slane %v422_v28, 4  ;;  %v3138_v47 = vsel %vm3045_vm2, %v437_v18, %v3060_v39  ;;  %v470_v48 = vor.u32 %v469_v26, %v465_v25  ;;  %v502_v49 = vshrl.u32 %v3125_v33, 16  ;;  %v3149_v39 = vld [vmem:[%s3009_s25 + $0x50] sm:$0x1]  ;;  %v3173_v26 = vld [vmem:[%s3009_s25 + $0x54] sm:$0xf] }
  0x27   : > { %4865 = vst [vmem:[#allocation7_spill] sm:$0xff] %v3138_v47  ;;  %v505_v50 = vshll.u32 %v3125_v33, 16  ;;  %v513_v51 = vrot.slane %v511_v30, 5  ;;  %v517_v52 = vrot.slane %v515_v32, 4  ;;  %v456_v54 = vrot.slane %v454_v44, 4 }
  0x28   : > { %v459_v55 = vrot.slane %v457_v45, 5  ;;  %v3146_v58 = vsel %vm3045_vm2, %v423_v36, %v427_v40  ;;  %4867 = vst [vmem:[#allocation9_spill] sm:$0xff] %v3149_v39  ;;  %v485_v59 = vrot.slane %v484_v41, 4  ;;  %v489_v60 = vrot.slane %v487_v35, 5 }
  0x29   : > { %4866 = vst [vmem:[#allocation8_spill] sm:$0xff] %v3146_v58  ;;  %v471_v62 = vrot.slane %v470_v48, 4  ;;  %v475_v63 = vrot.slane %v473_v43, 5  ;;  %v504_v3 = vrot.slane %v502_v49, 4  ;;  %v507_v5 = vrot.slane %v505_v50, 5 }
  0x2a   : > { %v460_v61 = vor.u32 %v459_v55, %v456_v54  ;;  %v518_v8 = vor.u32 %v517_v52, %v513_v51  ;;  %v521_v9 = vshll.u32 %v3149_v39, 16  ;;  %v491_v12 = vshrl.u32 %v3108_v19, 16  ;;  %v3188_v43 = vld [vmem:[%s3009_s25 + $0x64] sm:$0xf]  ;;  %v3195_v52 = vld [vmem:[%s3009_s25 + $0x5c] sm:$0x1] }
  0x2b   : > { %v3168_v15 = vsel %vm3045_vm2, %v485_v59, %v489_v60  ;;  %v550_v18 = vshrl.u32 %v3154_v7, 16  ;;  %v553_v20 = vshll.u32 %v3154_v7, 16  ;;  %v3177_v28 = vsel %vm3045_vm2, %v471_v62, %v475_v63  ;;  %4871 = vst [vmem:[#allocation13_spill] sm:$0xff] %v3195_v52  ;;  %v3209_v63 = vld [vmem:[%s3009_s25 + $0x6c] sm:$0xf] }
  0x2c   : > { %755 = vrot.lane.b32.xlu1 %v3129_v34, %s2946_s26  ;;  %v461_v13 = vrot.slane %v460_v61, 4  ;;  %4868 = vst [vmem:[#allocation10_spill] sm:$0xff] %v3168_v15  ;;  %v493_v21 = vrot.slane %v491_v12, 4  ;;  %v508_v30 = vor.u32 %v507_v5, %v504_v3  ;;  %v535_v32 = vshll.u32 %v3160_v11, 16  ;;  %v3199_v61 = vld [vmem:[%s3009_s25 + $0x70] sm:$0xf] }
  0x2d   : > { %753 = vrot.lane.b32.xlu0 %v3138_v47, %s2946_s26  ;;  %751 = vrot.lane.b32.xlu2 %v3146_v58, %s2946_s26  ;;  %4869 = vst [vmem:[#allocation11_spill] sm:$0xff] %v3177_v28  ;;  %v539_v35 = vshrl.u32 %v3160_v11, 16  ;;  %v519_v36 = vrot.slane %v518_v8, 4  ;;  %v523_v40 = vrot.slane %v521_v9, 5  ;;  %v497_v45 = vshll.u32 %v3164_v14, 16 }
  0x2e   : > { %v3185_v41 = vsel %vm3045_vm2, %v461_v13, %v465_v25  ;;  %v494_v44 = vor.u32 %v493_v21, %v489_v60  ;;  %v526_v48 = vshrl.u32 %v3173_v26, 16  ;;  %v552_v49 = vrot.slane %v550_v18, 4  ;;  %v3274_v34 = vld [vmem:[%s3009_s25 + $0x88] sm:$0xf]  ;;  %v3284_v58 = vld [vmem:[%s3009_s25 + $0x90] sm:$0xf] }
  0x2f   : > { %4870 = vst [vmem:[#allocation12_spill] sm:$0xff] %v3185_v41  ;;  %v555_v50 = vrot.slane %v553_v20, 5  ;;  %v529_v54 = vshll.u32 %v3173_v26, 16  ;;  %v509_v55 = vrot.slane %v508_v30, 4  ;;  %v537_v25 = vrot.slane %v535_v32, 5 }
  0x30   : > { %v541_v59 = vrot.slane %v539_v35, 4  ;;  %v3203_v60 = vsel %vm3045_vm2, %v519_v36, %v523_v40  ;;  %v559_v62 = vshll.u32 %v3188_v43, 16  ;;  %v495_v3 = vrot.slane %v494_v44, 4  ;;  %v3386_v39 = vld [vmem:[%s3009_s25 + $0xbc] sm:$0x1] }
  0x31   : > { %4872 = vst [vmem:[#allocation14_spill] sm:$0xff] %v3203_v60  ;;  %v499_v5 = vrot.slane %v497_v45, 5  ;;  %v528_v8 = vrot.slane %v526_v48, 4  ;;  %v531_v9 = vrot.slane %v529_v54, 5  ;;  %v556_v12 = vor.u32 %v555_v50, %v552_v49  ;;  %v3230_v48 = vld [vmem:[%s3009_s25 + $0x74] sm:$0x1] }
  0x32   : > { %v545_v13 = vshll.u32 %v3195_v52, 16  ;;  %v583_v18 = vshll.u32 %v3199_v61, 16  ;;  %v587_v20 = vshrl.u32 %v3199_v61, 16  ;;  %v3216_v21 = vsel %vm3045_vm2, %v509_v55, %v513_v51  ;;  %4875 = vst [vmem:[#allocation17_spill] sm:$0xff] %v3230_v48 }
  0x33   : > { %4873 = vst [vmem:[#allocation15_spill] sm:$0xff] %v3216_v21  ;;  %v542_v30 = vor.u32 %v541_v59, %v537_v25  ;;  %v574_v32 = vshrl.u32 %v3209_v63, 16  ;;  %v577_v35 = vshll.u32 %v3209_v63, 16  ;;  %v3224_v36 = vsel %vm3045_vm2, %v495_v3, %v499_v5  ;;  %v3233_v3 = vld [vmem:[%s3009_s25 + $0x84] sm:$0xf] }
  0x34   : > { %761 = vrot.lane.b32.xlu1 %v3168_v15, %s2946_s26  ;;  %4874 = vst [vmem:[#allocation16_spill] sm:$0xff] %v3224_v36  ;;  %v532_v40 = vor.u32 %v531_v9, %v528_v8  ;;  %v563_v44 = vshrl.u32 %v3188_v43, 16  ;;  %v557_v51 = vrot.slane %v556_v12, 4  ;;  %v561_v45 = vrot.slane %v559_v62, 5  ;;  %v3238_v5 = vld [vmem:[%s3009_s25 + $0x7c] sm:$0xf] }
  0x35   : > { %759 = vrot.lane.b32.xlu0 %v3177_v28, %s2946_s26  ;;  %757 = vrot.lane.b32.xlu2 %v3185_v41, %s2946_s26  ;;  %v585_v49 = vrot.slane %v583_v18, 5  ;;  %v589_v50 = vrot.slane %v587_v20, 4  ;;  %v543_v54 = vrot.slane %v542_v30, 4  ;;  %v547_v55 = vrot.slane %v545_v13, 5  ;;  %v3242_v62 = vld [vmem:[%s3009_s25 + $0x68] sm:$0x1] }
  0x36   : > { %v576_v59 = vrot.slane %v574_v32, 4  ;;  %v593_v8 = vshll.u32 %v3230_v48, 16  ;;  %v533_v9 = vrot.slane %v532_v40, 4  ;;  %4876 = vst [vmem:[#allocation18_spill] sm:$0xff] %v3242_v62  ;;  %v565_v12 = vrot.slane %v563_v44, 4 }
  0x37   : > { %v3246_v18 = vsel %vm3045_vm2, %v557_v51, %v561_v45  ;;  %v590_v13 = vor.u32 %v589_v50, %v585_v49  ;;  %v622_v20 = vshrl.u32 %v3233_v3, 16  ;;  %v625_v30 = vshll.u32 %v3233_v3, 16  ;;  %v3251_v32 = vld [vmem:[%s3009_s25 + $0x78] sm:$0xf]  ;;  %326 = vst.msk [vmem:[#allocation2 + $0x10] sm:$0xf] %vm321_vm5, %v3054_v37 }
  0x38   : > { %4877 = vst [vmem:[#allocation19_spill] sm:$0xff] %v3246_v18  ;;  %v607_v15 = vshll.u32 %v3238_v5, 16  ;;  %v611_v44 = vshrl.u32 %v3238_v5, 16  ;;  %v569_v51 = vshll.u32 %v3242_v62, 16  ;;  %v3264_v50 = vsel %vm3045_vm2, %v533_v9, %v537_v25  ;;  %v3277_v25 = vld [vmem:[%s3009_s25 + $0x80] sm:$0x1] }
  0x39   : > { %4879 = vst [vmem:[#allocation21_spill] sm:$0xff] %v3264_v50  ;;  %v627_v41 = vrot.slane %v625_v30, 5 }
  0x3a   : > { %4880 = vst [vmem:[#allocation22_spill] sm:$0xff] %v3277_v25  ;;  %v613_v9 = vrot.slane %v611_v44, 4  ;;  %v617_v44 = vshll.u32 %v3277_v25, 16  ;;  %v3352_v25 = vld [vmem:[%s3009_s25 + $0xa4] sm:$0x1] }
  0x3b   : > { %4890 = vst [vmem:[#allocation32_spill] sm:$0xff] %v3352_v25 }
  0x3c   : > { %767 = vrot.lane.b32.xlu1 %v3203_v60, %s2946_s26  ;;  %v579_v60 = vrot.slane %v577_v35, 5  ;;  %v3255_v35 = vsel %vm3045_vm2, %v543_v54, %v547_v55  ;;  %v601_v54 = vshll.u32 %v3251_v32, 16  ;;  %v591_v55 = vrot.slane %v590_v13, 4  ;;  %322 = vst.msk [vmem:[#allocation2] sm:$0xf] %vm321_vm5, %v3018_v2 }
  0x3d   : > { %765 = vrot.lane.b32.xlu0 %v3216_v21, %s2946_s26  ;;  %763 = vrot.lane.b32.xlu2 %v3224_v36, %s2946_s26  ;;  %4878 = vst [vmem:[#allocation20_spill] sm:$0xff] %v3255_v35  ;;  %v566_v36 = vor.u32 %v565_v12, %v561_v45  ;;  %v3267_v21 = vld [vmem:[%s3009_s25 + $0x94] sm:$0xf]  ;;  %v609_v45 = vrot.slane %v607_v15, 5 }
  0x3e   : > { %v580_v40 = vor.u32 %v579_v60, %v576_v59  ;;  %v598_v60 = vshrl.u32 %v3251_v32, 16  ;;  %v595_v59 = vrot.slane %v593_v8, 5  ;;  %v655_v12 = vshll.u32 %v3267_v21, 16  ;;  %323 = vst.msk [vmem:[#allocation2 + $0x4] sm:$0xf] %vm321_vm5, %v3024_v6 }
  0x3f   : > { %v659_v23 = vshrl.u32 %v3267_v21, 16  ;;  %v567_v13 = vrot.slane %v566_v36, 4  ;;  %v571_v8 = vrot.slane %v569_v51, 5  ;;  %v614_v47 = vor.u32 %v613_v9, %v609_v45  ;;  %324 = vst.msk [vmem:[#allocation2 + $0x8] sm:$0xf] %vm321_vm5, %v3012_v0 }
  0x40   : > { %v581_v28 = vrot.slane %v580_v40, 4  ;;  %v3288_v30 = vsel %vm3045_vm2, %v591_v55, %v595_v59  ;;  %v631_v40 = vshll.u32 %v3274_v34, 16  ;;  %v646_v36 = vshrl.u32 %v3284_v58, 16  ;;  %325 = vst.msk [vmem:[#allocation2 + $0xc] sm:$0xf] %vm321_vm5, %v3015_v1 }
  0x41   : > { %4881 = vst [vmem:[#allocation23_spill] sm:$0xff] %v3288_v30  ;;  %v649_v51 = vshll.u32 %v3284_v58, 16  ;;  %v619_v9 = vrot.slane %v617_v44, 5  ;;  %v697_v44 = vshll.u32 %v3311_v38, 16 }
  0x42   : > { %v633_v59 = vrot.slane %v631_v40, 5  ;;  %v694_v40 = vshrl.u32 %v3311_v38, 16  ;;  %327 = vst.msk [vmem:[#allocation2 + $0x14] sm:$0xf] %vm321_vm5, %v3065_v42 }
  0x43   : > { %328 = vst.msk [vmem:[#allocation2 + $0x18] sm:$0xf] %vm321_vm5, %v3051_v31 }
  0x44   : > { %773 = vrot.lane.b32.xlu1 %v3246_v18, %s2946_s26  ;;  %v624_v18 = vrot.slane %v622_v20, 4  ;;  %v603_v20 = vrot.slane %v601_v54, 5  ;;  %v661_v54 = vrot.slane %v659_v23, 4  ;;  %v615_v23 = vrot.slane %v614_v47, 4  ;;  %329 = vst.msk [vmem:[#allocation2 + $0x1c] sm:$0xf] %vm321_vm5, %v3039_v22 }
  0x45   : > { %771 = vrot.lane.b32.xlu0 %v3255_v35, %s2946_s26  ;;  %769 = vrot.lane.b32.xlu2 %v3264_v50, %s2946_s26  ;;  %v600_v35 = vrot.slane %v598_v60, 4  ;;  %v3294_v50 = vsel %vm3045_vm2, %v581_v28, %v585_v49  ;;  %v657_v60 = vrot.slane %v655_v12, 5  ;;  %v635_v49 = vshrl.u32 %v3274_v34, 16  ;;  %330 = vst.msk [vmem:[#allocation2 + $0x20] sm:$0xf] %vm321_vm5, %v3118_v29 }
  0x46   : > { %v628_v15 = vor.u32 %v627_v41, %v624_v18  ;;  %4882 = vst [vmem:[#allocation24_spill] sm:$0xff] %v3294_v50  ;;  %v3302_v41 = vsel %vm3045_vm2, %v567_v13, %v571_v8  ;;  %v3305_v18 = vld [vmem:[%s3009_s25 + $0x98] sm:$0x1]  ;;  %v648_v12 = vrot.slane %v646_v36, 4  ;;  %v3317_v8 = vld [vmem:[%s3009_s25 + $0xa0] sm:$0xf] }
  0x47   : > { %4883 = vst [vmem:[#allocation25_spill] sm:$0xff] %v3302_v41  ;;  %v604_v28 = vor.u32 %v603_v20, %v600_v35  ;;  %v662_v13 = vor.u32 %v661_v54, %v657_v60  ;;  %v665_v35 = vshll.u32 %v3305_v18, 16  ;;  %v3329_v36 = vld [vmem:[%s3009_s25 + $0x9c] sm:$0xf] }
  0x48   : > { %4884 = vst [vmem:[#allocation26_spill] sm:$0xff] %v3305_v18  ;;  %v629_v55 = vrot.slane %v628_v15, 4  ;;  %v637_v15 = vrot.slane %v635_v49, 4  ;;  %v683_v49 = vshrl.u32 %v3317_v8, 16 }
  0x49   : > { %v605_v20 = vrot.slane %v604_v28, 4  ;;  %v679_v28 = vshll.u32 %v3317_v8, 16  ;;  %331 = vst.msk [vmem:[#allocation2 + $0x24] sm:$0xf] %vm321_vm5, %v3083_v56 }
  0x4a   : > { %v3324_v47 = vsel %vm3045_vm2, %v629_v55, %v633_v59  ;;  %v667_v55 = vrot.slane %v665_v35, 5  ;;  %v699_v35 = vrot.slane %v697_v44, 5  ;;  %v685_v48 = vrot.slane %v683_v49, 4  ;;  %332 = vst.msk [vmem:[#allocation2 + $0x28] sm:$0xf] %vm321_vm5, %v3079_v53 }
  0x4b   : > { %4886 = vst [vmem:[#allocation28_spill] sm:$0xff] %v3324_v47  ;;  %v3342_v18 = vsel %vm3045_vm2, %v605_v20, %v609_v45  ;;  %v3355_v45 = vld [vmem:[%s3009_s25 + $0xb8] sm:$0xf] }
  0x4c   : > { %779 = vrot.lane.b32.xlu1 %v3288_v30, %s2946_s26  ;;  %v651_v30 = vrot.slane %v649_v51, 5  ;;  %v3333_v51 = vsel %vm3045_vm2, %v615_v23, %v619_v9  ;;  %4888 = vst [vmem:[#allocation30_spill] sm:$0xff] %v3342_v18  ;;  %v3345_v23 = vld [vmem:[%s3009_s25 + $0xac] sm:$0xf]  ;;  %v670_v9 = vshrl.u32 %v3329_v36, 16  ;;  %v727_v49 = vshll.u32 %v3355_v45, 16 }
  0x4d   : > { %777 = vrot.lane.b32.xlu0 %v3294_v50, %s2946_s26  ;;  %775 = vrot.lane.b32.xlu2 %v3302_v41, %s2946_s26  ;;  %v3320_v50 = vld [vmem:[%s3009_s25 + $0x8c] sm:$0x1]  ;;  %4887 = vst [vmem:[#allocation29_spill] sm:$0xff] %v3333_v51  ;;  %v663_v41 = vrot.slane %v662_v13, 4  ;;  %v696_v13 = vrot.slane %v694_v40, 4  ;;  %v731_v62 = vshrl.u32 %v3355_v45, 16 }
  0x4e   : > { %4885 = vst [vmem:[#allocation27_spill] sm:$0xff] %v3320_v50  ;;  %v652_v54 = vor.u32 %v651_v30, %v648_v12  ;;  %v641_v57 = vshll.u32 %v3320_v50, 16  ;;  %v638_v30 = vor.u32 %v637_v15, %v633_v59  ;;  %v673_v12 = vshll.u32 %v3329_v36, 16  ;;  %v3365_v15 = vld [vmem:[%s3009_s25 + $0xb4] sm:$0xf] }
  0x4f   : > { %4889 = vst [vmem:[#allocation31_spill] sm:$0xff] %v3345_v23  ;;  %v681_v50 = vrot.slane %v679_v28, 5  ;;  %v3359_v20 = vsel %vm3045_vm2, %v663_v41, %v667_v55  ;;  %v703_v59 = vshll.u32 %v3345_v23, 16  ;;  %v689_v28 = vshll.u32 %v3352_v25, 16 }
  0x50   : > { %4891 = vst [vmem:[#allocation33_spill] sm:$0xff] %v3355_v45  ;;  %v639_v40 = vrot.slane %v638_v30, 4  ;;  %v643_v44 = vrot.slane %v641_v57, 5  ;;  %v675_v52 = vrot.slane %v673_v12, 5  ;;  %v721_v30 = vshll.u32 %v3365_v15, 16 }
  0x51   : > { %4892 = vst [vmem:[#allocation34_spill] sm:$0xff] %v3359_v20  ;;  %v686_v55 = vor.u32 %v685_v48, %v681_v50  ;;  %v707_v12 = vshrl.u32 %v3345_v23, 16  ;;  %v705_v48 = vrot.slane %v703_v59, 5  ;;  %v691_v25 = vrot.slane %v689_v28, 5 }
  0x52   : > { %4893 = vst [vmem:[#allocation35_spill] sm:$0xff] %v3365_v15  ;;  %v3380_v57 = vsel %vm3045_vm2, %v639_v40, %v643_v44  ;;  %v723_v45 = vrot.slane %v721_v30, 5  ;;  %v737_v59 = vshll.u32 %v3386_v39, 16 }
  0x53   : > { %4895 = vst [vmem:[#allocation37_spill] sm:$0xff] %v3380_v57 }
  0x54   : > { %785 = vrot.lane.b32.xlu1 %v3324_v47, %s2946_s26  ;;  %v653_v47 = vrot.slane %v652_v54, 4  ;;  %v700_v54 = vor.u32 %v699_v35, %v696_v13  ;;  %v733_v13 = vrot.slane %v731_v62, 4  ;;  %v687_v35 = vrot.slane %v686_v55, 4  ;;  %333 = vst.msk [vmem:[#allocation2 + $0x2c] sm:$0xf] %vm321_vm5, %v3108_v19 }
  0x55   : > { %783 = vrot.lane.b32.xlu0 %v3333_v51, %s2946_s26  ;;  %781 = vrot.lane.b32.xlu2 %v3342_v18, %s2946_s26  ;;  %v672_v51 = vrot.slane %v670_v9, 4  ;;  %v718_v18 = vshrl.u32 %v3365_v15, 16  ;;  %334 = vst.msk [vmem:[#allocation2 + $0x30] sm:$0xf] %vm321_vm5, %v3125_v33 }
  0x56   : > { %v3372_v41 = vsel %vm3045_vm2, %v653_v47, %v657_v60  ;;  %v701_v60 = vrot.slane %v700_v54, 4  ;;  %v729_v47 = vrot.slane %v727_v49, 5  ;;  %v3396_v54 = vld [vmem:[%s3009_s25 + $0xb0] sm:$0x1]  ;;  %v3400_v62 = vsel %vm3045_vm2, %v687_v35, %v691_v25  ;;  %335 = vst.msk [vmem:[#allocation2 + $0x34] sm:$0xf] %vm321_vm5, %v3104_v16 }
  0x57   : > { %4894 = vst [vmem:[#allocation36_spill] sm:$0xff] %v3372_v41  ;;  %v676_v9 = vor.u32 %v675_v52, %v672_v51  ;;  %v709_v51 = vrot.slane %v707_v12, 4  ;;  %v713_v55 = vshll.u32 %v3396_v54, 16  ;;  %v930_v35 = vrot.slane %v3015_v1, 5 }
  0x58   : > { %v3392_v40 = vsel %vm3045_vm2, %v701_v60, %v705_v48  ;;  %v734_v44 = vor.u32 %v733_v13, %v729_v47  ;;  %4896 = vst [vmem:[#allocation38_spill] sm:$0xff] %v3400_v62  ;;  %v923_v60 = vrot.slane %v3024_v6, 5  ;;  %v2750_v13 = vrot.slane %v3012_v0, 9 }
  0x59   : > { %v677_v52 = vrot.slane %v676_v9, 4  ;;  %v710_v49 = vor.u32 %v709_v51, %v705_v48  ;;  %v739_v9 = vrot.slane %v737_v59, 5  ;;  %v926_v51 = vrot.slane %v3035_v17, 5  ;;  %336 = vst.msk [vmem:[#allocation2 + $0x38] sm:$0xf] %vm321_vm5, %v3173_v26 }
  0x5a   : > { %v735_v30 = vrot.slane %v734_v44, 4  ;;  %v2749_v44 = vrot.slane %v3018_v2, 9  ;;  %v3448_v59 = vsel %vm3432_vm6, %v2750_v13, %v930_v35  ;;  %v937_v17 = vrot.slane %v3065_v42, 5  ;;  %337 = vst.msk [vmem:[#allocation2 + $0x3c] sm:$0xf] %vm321_vm5, %v3160_v11 }
  0x5b   : > { %v3406_v28 = vsel %vm3045_vm2, %v677_v52, %v681_v50  ;;  %v711_v25 = vrot.slane %v710_v49, 4  ;;  %v925_v52 = vrot.slane %v923_v60, 4  ;;  %v940_v49 = vrot.slane %v3095_v4, 5  ;;  %338 = vst.msk [vmem:[#allocation2 + $0x40] sm:$0xf] %vm321_vm5, %v3154_v7 }
  0x5c   : > { %791 = vrot.lane.b32.xlu1 %v3359_v20, %s2946_s26  ;;  %v720_v20 = vrot.slane %v718_v18, 4  ;;  %4897 = vst [vmem:[#allocation39_spill] sm:$0xff] %v3406_v28  ;;  %v924_v2 = vsel %vm3432_vm6, %v2749_v44, %v923_v60  ;;  %v939_v6 = vrot.slane %v937_v17, 4  ;;  %v951_v60 = vrot.slane %v3083_v56, 5 }
  0x5d   : > { %789 = vrot.lane.b32.xlu0 %v3372_v41, %s2946_s26  ;;  %787 = vrot.lane.b32.xlu2 %v3380_v57, %s2946_s26  ;;  %339 = vst.msk [vmem:[#allocation2 + $0x44] sm:$0xf] %vm321_vm5, %v3188_v43 }
  0x5e   : > { %v724_v18 = vor.u32 %v723_v45, %v720_v20  ;;  %v715_v45 = vrot.slane %v713_v55, 5  ;;  %v3415_v20 = vsel %vm3045_vm2, %v735_v30, %v739_v9  ;;  %v2751_v55 = vrot.slane %v3054_v37, 9  ;;  %340 = vst.msk [vmem:[#allocation2 + $0x48] sm:$0xf] %vm321_vm5, %v3209_v63 }
  0x5f   : > { %v932_v30 = vrot.slane %v930_v35, 4  ;;  %v933_v9 = vrot.slane %v3030_v10, 5  ;;  %v3480_v4 = vsel %vm3432_vm6, %v939_v6, %v940_v49  ;;  %v947_v35 = vrot.slane %v3072_v46, 5  ;;  %341 = vst.msk [vmem:[#allocation2 + $0x4c] sm:$0xf] %vm321_vm5, %v3199_v61 }
  0x60   : > { %v725_v12 = vrot.slane %v724_v18, 4  ;;  %v3426_v48 = vsel %vm3045_vm2, %v711_v25, %v715_v45  ;;  %v927_v18 = vsel %vm3432_vm6, %v925_v52, %v926_v51  ;;  %v944_v25 = vrot.slane %v3039_v22, 5  ;;  %342 = vst.msk [vmem:[#allocation2 + $0x50] sm:$0xf] %vm321_vm5, %v3251_v32 }
  0x61   : > { %v3497_v10 = vsel %vm3432_vm6, %v932_v30, %v933_v9  ;;  %v2753_v45 = vrot.slane %v3118_v29, 9  ;;  %v2752_v52 = vrot.slane %v3051_v31, 9  ;;  %v958_v46 = vrot.slane %v3108_v19, 5  ;;  %343 = vst.msk [vmem:[#allocation2 + $0x54] sm:$0xf] %vm321_vm5, %v3238_v5 }
  0x62   : > { %v3419_v50 = vsel %vm3045_vm2, %v725_v12, %v729_v47  ;;  %v3486_v12 = vsel %vm3432_vm6, %v2751_v55, %v937_v17  ;;  %v946_v13 = vrot.slane %v944_v25, 4  ;;  %v961_v6 = vrot.slane %v3164_v14, 5  ;;  %344 = vst.msk [vmem:[#allocation2 + $0x58] sm:$0xf] %vm321_vm5, %v3233_v3 }
  0x63   : > { %v3519_v51 = vsel %vm3432_vm6, %v2753_v45, %v951_v60  ;;  %v2754_v49 = vrot.slane %v3079_v53, 9  ;;  %345 = vst.msk [vmem:[#allocation2 + $0x5c] sm:$0xf] %vm321_vm5, %v3274_v34  ;;  %v953_v55 = vrot.slane %v951_v60, 4  ;;  %v954_v14 = vrot.slane %v3115_v24, 5 }
  0x64   : > { %797 = vrot.lane.b32.xlu1 %v3392_v40, %s2946_s26  ;;  %4900 = vst [vmem:[#allocation40_spill] sm:$0xff] %v3519_v51  ;;  %v3526_v17 = vsel %vm3432_vm6, %v946_v13, %v947_v35  ;;  %v965_v45 = vrot.slane %v3104_v16, 5  ;;  %v2756_v60 = vrot.slane %v3173_v26, 9  ;;  %v972_v13 = vrot.slane %v3160_v11, 5  ;;  %v4904_v35 = vld [vmem:[#allocation33_spill] sm:$0xff] }
  0x65   : > { %795 = vrot.lane.b32.xlu0 %v3400_v62, %s2946_s26  ;;  %793 = vrot.lane.b32.xlu2 %v3406_v28, %s2946_s26  ;;  %346 = vst.msk [vmem:[#allocation2 + $0x60] sm:$0xf] %vm321_vm5, %v3284_v58  ;;  %v3575_v24 = vsel %vm3432_vm6, %v953_v55, %v954_v14  ;;  %v979_v14 = vrot.slane %v3188_v43, 5 }
  0x66   : > { %347 = vst.msk [vmem:[#allocation2 + $0x64] sm:$0xf] %vm321_vm5, %v3267_v21  ;;  %v3593_v55 = vsel %vm3432_vm6, %v2756_v60, %v972_v13  ;;  %v4909_v60 = vld [vmem:[#allocation18_spill] sm:$0xff] }
  0x67   : > { %348 = vst.msk [vmem:[#allocation2 + $0x68] sm:$0xf] %vm321_vm5, %v3329_v36 }
  0x68   : > { %349 = vst.msk [vmem:[#allocation2 + $0x6c] sm:$0xf] %vm321_vm5, %v3317_v8 }
  0x69   : > { %350 = vst.msk [vmem:[#allocation2 + $0x70] sm:$0xf] %vm321_vm5, %v3311_v38 }
  0x6a   : > { %351 = vst.msk [vmem:[#allocation2 + $0x74] sm:$0xf] %vm321_vm5, %v3345_v23 }
  0x6b   : > { %4903 = vst [vmem:[#allocation43_spill] sm:$0xff] %v3575_v24 }
  0x6c   : > { %803 = vrot.lane.b32.xlu1 %v3415_v20, %s2946_s26  ;;  %352 = vst.msk [vmem:[#allocation2 + $0x78] sm:$0xf] %vm321_vm5, %v3365_v15 }
  0x6d   : > { %801 = vrot.lane.b32.xlu0 %v3419_v50, %s2946_s26  ;;  %799 = vrot.lane.b32.xlu2 %v3426_v48, %s2946_s26  ;;  %353 = vst.msk [vmem:[#allocation2 + $0x7c] sm:$0xf] %vm321_vm5, %v4904_v35 }
  0x74   : > { %1037 = vrot.lane.b32.xlu1 %v3448_v59, %s2947_s27 }
  0x75   : > { %1035 = vrot.lane.b32.xlu0 %v927_v18, %s2947_s27  ;;  %1033 = vrot.lane.b32.xlu2 %v924_v2, %s2947_s27  ;;  %v3537_v18 = vsel %vm3432_vm6, %v2752_v52, %v944_v25  ;;  %v960_v2 = vrot.slane %v958_v46, 4  ;;  %v3562_v25 = vsel %vm3432_vm6, %v2754_v49, %v958_v46  ;;  %v967_v46 = vrot.slane %v965_v45, 4 }
  0x76   : > { %4902 = vst [vmem:[#allocation42_spill] sm:$0xff] %v3562_v25  ;;  %v2755_v49 = vrot.slane %v3125_v33, 9 }
  0x77   : > { %v3556_v30 = vsel %vm3432_vm6, %v960_v2, %v961_v6 }
  0x78   : > { %4901 = vst [vmem:[#allocation41_spill] sm:$0xff] %v3556_v30 }
  0x7c   : > { %1043 = vrot.lane.b32.xlu1 %v3480_v4, %s2947_s27 }
  0x7d   : > { %1041 = vrot.lane.b32.xlu0 %v3486_v12, %s2947_s27  ;;  %1039 = vrot.lane.b32.xlu2 %v3497_v10, %s2947_s27 }
  0x7f   : > { %v750_v44 = vpop.permute.xlu2 %749 }
  0x80   : > { %842 = vst.msk [vmem:[#allocation2 + $0x10] sm:$0xf] %vm837_vm7, %v750_v44  ;;  %v4905_v44 = vld [vmem:[#allocation9_spill] sm:$0xff] }
  0x81   : > { %v968_v2 = vrot.slane %v4905_v44, 5  ;;  %4906 = vst [vmem:[#allocation9_spill] sm:$0xff] %v3593_v55  ;;  %v3606_v44 = vsel %vm3432_vm6, %v2755_v49, %v965_v45  ;;  %v4910_v45 = vld [vmem:[#allocation13_spill] sm:$0xff] }
  0x82   : > { %4908 = vst [vmem:[#allocation45_spill] sm:$0xff] %v3606_v44 }
  0x84   : > { %1049 = vrot.lane.b32.xlu1 %v3519_v51, %s2947_s27 }
  0x85   : > { %1047 = vrot.lane.b32.xlu0 %v3526_v17, %s2947_s27  ;;  %1045 = vrot.lane.b32.xlu2 %v3537_v18, %s2947_s27 }
  0x87   : > { %v752_v9 = vpop.permute.xlu2 %751 }
  0x88   : > { %843 = vst.msk [vmem:[#allocation2 + $0x14] sm:$0xf] %vm837_vm7, %v752_v9  ;;  %v981_v9 = vrot.slane %v979_v14, 4 }
  0x8c   : > { %1055 = vrot.lane.b32.xlu1 %v3556_v30, %s2947_s27 }
  0x8d   : > { %1053 = vrot.lane.b32.xlu0 %v3562_v25, %s2947_s27  ;;  %1051 = vrot.lane.b32.xlu2 %v3575_v24, %s2947_s27  ;;  %v2757_v24 = vrot.slane %v3154_v7, 9 }
  0x8e   : > { %v746_v52 = vpop.permute.xlu1 %745 }
  0x8f   : > { %840 = vst.msk [vmem:[#allocation2 + $0x8] sm:$0xf] %vm837_vm7, %v746_v52  ;;  %v742_v6 = vpop.permute.xlu0 %741  ;;  %v758_v30 = vpop.permute.xlu2 %757  ;;  %v3599_v52 = vsel %vm3432_vm6, %v967_v46, %v968_v2  ;;  %v975_v2 = vrot.slane %v4910_v45, 5 }
  0x90   : > { %838 = vst.msk [vmem:[#allocation2] sm:$0xf] %vm837_vm7, %v742_v6  ;;  %v982_v6 = vrot.slane %v4909_v60, 5  ;;  %v3623_v60 = vsel %vm3432_vm6, %v2757_v24, %v979_v14 }
  0x91   : > { %4907 = vst [vmem:[#allocation44_spill] sm:$0xff] %v3599_v52 }
  0x92   : > { %846 = vst.msk [vmem:[#allocation2 + $0x20] sm:$0xf] %vm837_vm7, %v758_v30  ;;  %v974_v30 = vrot.slane %v972_v13, 4  ;;  %v3619_v49 = vsel %vm3432_vm6, %v981_v9, %v982_v6  ;;  %v2759_v9 = vrot.slane %v3251_v32, 9  ;;  %v993_v6 = vrot.slane %v3238_v5, 5 }
  0x93   : > { %4911 = vst [vmem:[#allocation18_spill] sm:$0xff] %v3619_v49 }
  0x94   : > { %1061 = vrot.lane.b32.xlu1 %v3593_v55, %s2947_s27  ;;  %4912 = vst [vmem:[#allocation13_spill] sm:$0xff] %v3623_v60  ;;  %v3631_v13 = vsel %vm3432_vm6, %v974_v30, %v975_v2  ;;  %v2758_v30 = vrot.slane %v3209_v63, 9  ;;  %v3645_v2 = vsel %vm3432_vm6, %v2759_v9, %v993_v6 }
  0x95   : > { %1059 = vrot.lane.b32.xlu0 %v3599_v52, %s2947_s27  ;;  %1057 = vrot.lane.b32.xlu2 %v3606_v44, %s2947_s27  ;;  %4913 = vst [vmem:[#allocation46_spill] sm:$0xff] %v3631_v13  ;;  %v2760_v52 = vrot.slane %v3233_v3, 9 }
  0x96   : > { %v748_v51 = vpop.permute.xlu1 %747 }
  0x97   : > { %841 = vst.msk [vmem:[#allocation2 + $0xc] sm:$0xf] %vm837_vm7, %v748_v51  ;;  %v744_v46 = vpop.permute.xlu0 %743  ;;  %v764_v55 = vpop.permute.xlu2 %763  ;;  %v986_v51 = vrot.slane %v3199_v61, 5 }
  0x98   : > { %839 = vst.msk [vmem:[#allocation2 + $0x4] sm:$0xf] %vm837_vm7, %v744_v46  ;;  %v4914_v46 = vld [vmem:[#allocation17_spill] sm:$0xff] }
  0x99   : > { %849 = vst.msk [vmem:[#allocation2 + $0x2c] sm:$0xf] %vm837_vm7, %v764_v55  ;;  %v988_v14 = vrot.slane %v986_v51, 4  ;;  %v989_v45 = vrot.slane %v4914_v46, 5 }
  0x9a   : > { %4915 = vst [vmem:[#allocation17_spill] sm:$0xff] %v3645_v2 }
  0x9b   : > { %v3650_v46 = vsel %vm3432_vm6, %v988_v14, %v989_v45 }
  0x9c   : > { %1067 = vrot.lane.b32.xlu1 %v3619_v49, %s2947_s27  ;;  %v1000_v49 = vrot.slane %v3274_v34, 5  ;;  %4916 = vst [vmem:[#allocation47_spill] sm:$0xff] %v3650_v46 }
  0x9d   : > { %1065 = vrot.lane.b32.xlu0 %v3623_v60, %s2947_s27  ;;  %1063 = vrot.lane.b32.xlu2 %v3631_v13, %s2947_s27 }
  0x9e   : > { %v756_v24 = vpop.permute.xlu1 %755  ;;  %v1002_v9 = vrot.slane %v1000_v49, 4 }
  0x9f   : > { %845 = vst.msk [vmem:[#allocation2 + $0x1c] sm:$0xf] %vm837_vm7, %v756_v24  ;;  %v754_v55 = vpop.permute.xlu0 %753  ;;  %v770_v60 = vpop.permute.xlu2 %769  ;;  %v3657_v24 = vsel %vm3432_vm6, %v2758_v30, %v986_v51  ;;  %v4919_v51 = vld [vmem:[#allocation22_spill] sm:$0xff] }
  0xa0   : > { %844 = vst.msk [vmem:[#allocation2 + $0x18] sm:$0xf] %vm837_vm7, %v754_v55  ;;  %v4918_v55 = vld [vmem:[#allocation27_spill] sm:$0xff]  ;;  %v996_v45 = vrot.slane %v4919_v51, 5 }
  0xa1   : > { %852 = vst.msk [vmem:[#allocation2 + $0x38] sm:$0xf] %vm837_vm7, %v770_v60  ;;  %v1003_v13 = vrot.slane %v4918_v55, 5  ;;  %v995_v60 = vrot.slane %v993_v6, 4  ;;  %v3674_v55 = vsel %vm3432_vm6, %v2760_v52, %v1000_v49 }
  0xa2   : > { %4917 = vst [vmem:[#allocation48_spill] sm:$0xff] %v3657_v24 }
  0xa3   : > { %v3670_v30 = vsel %vm3432_vm6, %v1002_v9, %v1003_v13  ;;  %4921 = vst [vmem:[#allocation22_spill] sm:$0xff] %v3674_v55  ;;  %v3682_v6 = vsel %vm3432_vm6, %v995_v60, %v996_v45  ;;  %v2762_v13 = vrot.slane %v3329_v36, 9  ;;  %v1014_v9 = vrot.slane %v3317_v8, 5  ;;  %v4998_v27 = vld [vmem:[#allocation47_spill] sm:$0xff] }
  0xa4   : > { %1073 = vrot.lane.b32.xlu1 %v3645_v2, %s2947_s27  ;;  %4920 = vst [vmem:[#allocation27_spill] sm:$0xff] %v3670_v30  ;;  %v2761_v60 = vrot.slane %v3284_v58, 9 }
  0xa5   : > { %1071 = vrot.lane.b32.xlu0 %v3650_v46, %s2947_s27  ;;  %1069 = vrot.lane.b32.xlu2 %v3657_v24, %s2947_s27  ;;  %4922 = vst [vmem:[#allocation49_spill] sm:$0xff] %v3682_v6  ;;  %v3696_v45 = vsel %vm3432_vm6, %v2762_v13, %v1014_v9  ;;  %v2763_v24 = vrot.slane %v3311_v38, 9 }
  0xa6   : > { %v762_v44 = vpop.permute.xlu1 %761 }
  0xa7   : > { %848 = vst.msk [vmem:[#allocation2 + $0x28] sm:$0xf] %vm837_vm7, %v762_v44  ;;  %v760_v14 = vpop.permute.xlu0 %759  ;;  %v776_v2 = vpop.permute.xlu2 %775  ;;  %v1007_v44 = vrot.slane %v3267_v21, 5 }
  0xa8   : > { %847 = vst.msk [vmem:[#allocation2 + $0x24] sm:$0xf] %vm837_vm7, %v760_v14  ;;  %v4923_v14 = vld [vmem:[#allocation26_spill] sm:$0xff] }
  0xa9   : > { %855 = vst.msk [vmem:[#allocation2 + $0x44] sm:$0xf] %vm837_vm7, %v776_v2  ;;  %v1009_v49 = vrot.slane %v1007_v44, 4  ;;  %v1010_v51 = vrot.slane %v4923_v14, 5 }
  0xaa   : > { %4924 = vst [vmem:[#allocation26_spill] sm:$0xff] %v3696_v45 }
  0xab   : > { %v3701_v14 = vsel %vm3432_vm6, %v1009_v49, %v1010_v51 }
  0xac   : > { %1079 = vrot.lane.b32.xlu1 %v3670_v30, %s2947_s27  ;;  %v1021_v30 = vrot.slane %v3345_v23, 5 }
  0xad   : > { %1077 = vrot.lane.b32.xlu0 %v3674_v55, %s2947_s27  ;;  %1075 = vrot.lane.b32.xlu2 %v3682_v6, %s2947_s27 }
  0xae   : > { %v768_v52 = vpop.permute.xlu1 %767  ;;  %v1023_v13 = vrot.slane %v1021_v30, 4 }
  0xaf   : > { %851 = vst.msk [vmem:[#allocation2 + $0x34] sm:$0xf] %vm837_vm7, %v768_v52  ;;  %v766_v2 = vpop.permute.xlu0 %765  ;;  %v782_v55 = vpop.permute.xlu2 %781  ;;  %v3708_v52 = vsel %vm3432_vm6, %v2761_v60, %v1007_v44  ;;  %v4925_v44 = vld [vmem:[#allocation32_spill] sm:$0xff] }
  0xb0   : > { %850 = vst.msk [vmem:[#allocation2 + $0x30] sm:$0xf] %vm837_vm7, %v766_v2  ;;  %v1024_v2 = vrot.slane %v3396_v54, 5  ;;  %v1017_v51 = vrot.slane %v4925_v44, 5  ;;  %v3725_v54 = vsel %vm3432_vm6, %v2763_v24, %v1021_v30  ;;  %v2764_v30 = vrot.slane %v3365_v15, 9 }
  0xb1   : > { %858 = vst.msk [vmem:[#allocation2 + $0x50] sm:$0xf] %vm837_vm7, %v782_v55  ;;  %v1016_v55 = vrot.slane %v1014_v9, 4 }
  0xb2   : > { %v3721_v60 = vsel %vm3432_vm6, %v1023_v13, %v1024_v2 }
  0xb3   : > { %v3733_v9 = vsel %vm3432_vm6, %v1016_v55, %v1017_v51 }
  0xb4   : > { %1085 = vrot.lane.b32.xlu1 %v3696_v45, %s2947_s27 }
  0xb5   : > { %1083 = vrot.lane.b32.xlu0 %v3701_v14, %s2947_s27  ;;  %1081 = vrot.lane.b32.xlu2 %v3708_v52, %s2947_s27 }
  0xb6   : > { %v774_v6 = vpop.permute.xlu1 %773 }
  0xb7   : > { %854 = vst.msk [vmem:[#allocation2 + $0x40] sm:$0xf] %vm837_vm7, %v774_v6  ;;  %v772_v49 = vpop.permute.xlu0 %771  ;;  %v788_v45 = vpop.permute.xlu2 %787  ;;  %v1028_v6 = vrot.slane %v4904_v35, 5 }
  0xb8   : > { %853 = vst.msk [vmem:[#allocation2 + $0x3c] sm:$0xf] %vm837_vm7, %v772_v49  ;;  %v1031_v49 = vrot.slane %v3386_v39, 5 }
  0xb9   : > { %861 = vst.msk [vmem:[#allocation2 + $0x5c] sm:$0xf] %vm837_vm7, %v788_v45  ;;  %v1030_v2 = vrot.slane %v1028_v6, 4  ;;  %v3752_v39 = vsel %vm3432_vm6, %v2764_v30, %v1028_v6 }
  0xbb   : > { %v3745_v55 = vsel %vm3432_vm6, %v1030_v2, %v1031_v49 }
  0xbc   : > { %1091 = vrot.lane.b32.xlu1 %v3721_v60, %s2947_s27 }
  0xbd   : > { %1089 = vrot.lane.b32.xlu0 %v3725_v54, %s2947_s27  ;;  %1087 = vrot.lane.b32.xlu2 %v3733_v9, %s2947_s27 }
  0xbe   : > { %v780_v13 = vpop.permute.xlu1 %779 }
  0xbf   : > { %857 = vst.msk [vmem:[#allocation2 + $0x4c] sm:$0xf] %vm837_vm7, %v780_v13  ;;  %v778_v24 = vpop.permute.xlu0 %777  ;;  %v794_v45 = vpop.permute.xlu2 %793 }
  0xc0   : > { %856 = vst.msk [vmem:[#allocation2 + $0x48] sm:$0xf] %vm837_vm7, %v778_v24 }
  0xc1   : > { %864 = vst.msk [vmem:[#allocation2 + $0x68] sm:$0xf] %vm837_vm7, %v794_v45 }
  0xc4   : > { %1164 = vrot.lane.b32.xlu1 %v3012_v0, %s2948_s28 }
  0xc5   : > { %1095 = vrot.lane.b32.xlu0 %v3745_v55, %s2947_s27  ;;  %1093 = vrot.lane.b32.xlu2 %v3752_v39, %s2947_s27 }
  0xc6   : > { %v786_v44 = vpop.permute.xlu1 %785 }
  0xc7   : > { %860 = vst.msk [vmem:[#allocation2 + $0x58] sm:$0xf] %vm837_vm7, %v786_v44  ;;  %v784_v51 = vpop.permute.xlu0 %783  ;;  %v800_v13 = vpop.permute.xlu2 %799 }
  0xc8   : > { %859 = vst.msk [vmem:[#allocation2 + $0x54] sm:$0xf] %vm837_vm7, %v784_v51 }
  0xc9   : > { %867 = vst.msk [vmem:[#allocation2 + $0x74] sm:$0xf] %vm837_vm7, %v800_v13 }
  0xcc   : > { %1170 = vrot.lane.b32.xlu1 %v3065_v42, %s2948_s28 }
  0xcd   : > { %1168 = vrot.lane.b32.xlu0 %v3054_v37, %s2948_s28  ;;  %1166 = vrot.lane.b32.xlu2 %v3015_v1, %s2948_s28 }
  0xce   : > { %v792_v0 = vpop.permute.xlu1 %791 }
  0xcf   : > { %863 = vst.msk [vmem:[#allocation2 + $0x64] sm:$0xf] %vm837_vm7, %v792_v0  ;;  %v790_v6 = vpop.permute.xlu0 %789  ;;  %v1034_v2 = vpop.permute.xlu2 %1033 }
  0xd0   : > { %862 = vst.msk [vmem:[#allocation2 + $0x60] sm:$0xf] %vm837_vm7, %v790_v6 }
  0xd1   : > { %1130 = vst.msk [vmem:[#allocation2] sm:$0xf] %vm1129_vm8, %v1034_v2 }
  0xd4   : > { %1176 = vrot.lane.b32.xlu1 %v3118_v29, %s2948_s28 }
  0xd5   : > { %1174 = vrot.lane.b32.xlu0 %v3039_v22, %s2948_s28  ;;  %1172 = vrot.lane.b32.xlu2 %v3051_v31, %s2948_s28 }
  0xd6   : > { %v798_v49 = vpop.permute.xlu1 %797 }
  0xd7   : > { %866 = vst.msk [vmem:[#allocation2 + $0x70] sm:$0xf] %vm837_vm7, %v798_v49  ;;  %v796_v24 = vpop.permute.xlu0 %795  ;;  %v1040_v1 = vpop.permute.xlu2 %1039 }
  0xd8   : > { %865 = vst.msk [vmem:[#allocation2 + $0x6c] sm:$0xf] %vm837_vm7, %v796_v24 }
  0xd9   : > { %1133 = vst.msk [vmem:[#allocation2 + $0xc] sm:$0xf] %vm1129_vm8, %v1040_v1 }
  0xdc   : > { %1182 = vrot.lane.b32.xlu1 %v3108_v19, %s2948_s28 }
  0xdd   : > { %1180 = vrot.lane.b32.xlu0 %v3079_v53, %s2948_s28  ;;  %1178 = vrot.lane.b32.xlu2 %v3083_v56, %s2948_s28 }
  0xde   : > { %v804_v30 = vpop.permute.xlu1 %803 }
  0xdf   : > { %869 = vst.msk [vmem:[#allocation2 + $0x7c] sm:$0xf] %vm837_vm7, %v804_v30  ;;  %v802_v45 = vpop.permute.xlu0 %801  ;;  %v1046_v44 = vpop.permute.xlu2 %1045 }
  0xe0   : > { %868 = vst.msk [vmem:[#allocation2 + $0x78] sm:$0xf] %vm837_vm7, %v802_v45 }
  0xe1   : > { %1136 = vst.msk [vmem:[#allocation2 + $0x18] sm:$0xf] %vm1129_vm8, %v1046_v44 }
  0xe4   : > { %1188 = vrot.lane.b32.xlu1 %v3173_v26, %s2948_s28 }
  0xe5   : > { %1186 = vrot.lane.b32.xlu0 %v3104_v16, %s2948_s28  ;;  %1184 = vrot.lane.b32.xlu2 %v3125_v33, %s2948_s28 }
  0xe6   : > { %v1038_v51 = vpop.permute.xlu1 %1037 }
  0xe7   : > { %1132 = vst.msk [vmem:[#allocation2 + $0x8] sm:$0xf] %vm1129_vm8, %v1038_v51  ;;  %v1036_v13 = vpop.permute.xlu0 %1035  ;;  %v1052_v0 = vpop.permute.xlu2 %1051 }
  0xe8   : > { %1131 = vst.msk [vmem:[#allocation2 + $0x4] sm:$0xf] %vm1129_vm8, %v1036_v13 }
  0xe9   : > { %1139 = vst.msk [vmem:[#allocation2 + $0x24] sm:$0xf] %vm1129_vm8, %v1052_v0 }
  0xec   : > { %1194 = vrot.lane.b32.xlu1 %v3188_v43, %s2948_s28 }
  0xed   : > { %1192 = vrot.lane.b32.xlu0 %v3154_v7, %s2948_s28  ;;  %1190 = vrot.lane.b32.xlu2 %v3160_v11, %s2948_s28 }
  0xee   : > { %v1044_v6 = vpop.permute.xlu1 %1043 }
  0xef   : > { %1135 = vst.msk [vmem:[#allocation2 + $0x14] sm:$0xf] %vm1129_vm8, %v1044_v6  ;;  %v1042_v2 = vpop.permute.xlu0 %1041  ;;  %v1058_v49 = vpop.permute.xlu2 %1057 }
  0xf0   : > { %1134 = vst.msk [vmem:[#allocation2 + $0x10] sm:$0xf] %vm1129_vm8, %v1042_v2 }
  0xf1   : > { %1142 = vst.msk [vmem:[#allocation2 + $0x30] sm:$0xf] %vm1129_vm8, %v1058_v49 }
  0xf4   : > { %1200 = vrot.lane.b32.xlu1 %v3251_v32, %s2948_s28 }
  0xf5   : > { %1198 = vrot.lane.b32.xlu0 %v3199_v61, %s2948_s28  ;;  %1196 = vrot.lane.b32.xlu2 %v3209_v63, %s2948_s28 }
  0xf6   : > { %v1050_v24 = vpop.permute.xlu1 %1049 }
  0xf7   : > { %1138 = vst.msk [vmem:[#allocation2 + $0x20] sm:$0xf] %vm1129_vm8, %v1050_v24  ;;  %v1048_v1 = vpop.permute.xlu0 %1047  ;;  %v1064_v30 = vpop.permute.xlu2 %1063  ;;  %v3842_v24 = vld [vmem:[%s3009_s25 + $0xc0] sm:$0xf] }
  0xf8   : > { %1137 = vst.msk [vmem:[#allocation2 + $0x1c] sm:$0xf] %vm1129_vm8, %v1048_v1 }
  0xf9   : > { %1145 = vst.msk [vmem:[#allocation2 + $0x3c] sm:$0xf] %vm1129_vm8, %v1064_v30 }
  0xfc   : > { %1206 = vrot.lane.b32.xlu1 %v3274_v34, %s2948_s28 }
  0xfd   : > { %1204 = vrot.lane.b32.xlu0 %v3233_v3, %s2948_s28  ;;  %1202 = vrot.lane.b32.xlu2 %v3238_v5, %s2948_s28 }
  0xfe   : > { %v1056_v45 = vpop.permute.xlu1 %1055 }
  0xff   : > { %1141 = vst.msk [vmem:[#allocation2 + $0x2c] sm:$0xf] %vm1129_vm8, %v1056_v45  ;;  %v1054_v44 = vpop.permute.xlu0 %1053  ;;  %v1070_v51 = vpop.permute.xlu2 %1069 }
 0x100   : > { %1140 = vst.msk [vmem:[#allocation2 + $0x28] sm:$0xf] %vm1129_vm8, %v1054_v44 }
 0x101   : > { %1148 = vst.msk [vmem:[#allocation2 + $0x48] sm:$0xf] %vm1129_vm8, %v1070_v51  ;;  %v4926_v51 = vld [vmem:[#allocation4_spill] sm:$0xff] }
 0x104   : > { %1212 = vrot.lane.b32.xlu1 %v3329_v36, %s2948_s28 }
 0x105   : > { %1210 = vrot.lane.b32.xlu0 %v3267_v21, %s2948_s28  ;;  %1208 = vrot.lane.b32.xlu2 %v3284_v58, %s2948_s28 }
 0x106   : > { %v1062_v13 = vpop.permute.xlu1 %1061 }
 0x107   : > { %1144 = vst.msk [vmem:[#allocation2 + $0x38] sm:$0xf] %vm1129_vm8, %v1062_v13  ;;  %v1060_v0 = vpop.permute.xlu0 %1059  ;;  %v1076_v6 = vpop.permute.xlu2 %1075  ;;  %v3857_v13 = vld [vmem:[%s3009_s25 + $0xc4] sm:$0xf] }
 0x108   : > { %1143 = vst.msk [vmem:[#allocation2 + $0x34] sm:$0xf] %vm1129_vm8, %v1060_v0  ;;  %v4927_v0 = vld [vmem:[#allocation3_spill] sm:$0xff] }
 0x109   : > { %1151 = vst.msk [vmem:[#allocation2 + $0x54] sm:$0xf] %vm1129_vm8, %v1076_v6 }
 0x10c   : > { %1218 = vrot.lane.b32.xlu1 %v3345_v23, %s2948_s28  ;;  %v4947_v23 = vld [vmem:[#allocation34_spill] sm:$0xff] }
 0x10d   : > { %1216 = vrot.lane.b32.xlu0 %v3311_v38, %s2948_s28  ;;  %1214 = vrot.lane.b32.xlu2 %v3317_v8, %s2948_s28 }
 0x10e   : > { %v1068_v2 = vpop.permute.xlu1 %1067 }
 0x10f   : > { %1147 = vst.msk [vmem:[#allocation2 + $0x44] sm:$0xf] %vm1129_vm8, %v1068_v2  ;;  %v1066_v49 = vpop.permute.xlu0 %1065  ;;  %v1082_v1 = vpop.permute.xlu2 %1081 }
 0x110   : > { %1146 = vst.msk [vmem:[#allocation2 + $0x40] sm:$0xf] %vm1129_vm8, %v1066_v49 }
 0x111   : > { %1154 = vst.msk [vmem:[#allocation2 + $0x60] sm:$0xf] %vm1129_vm8, %v1082_v1  ;;  %v4928_v1 = vld [vmem:[#allocation7_spill] sm:$0xff] }
 0x114   : > { %1224 = vrot.lane.b32.xlu1 %v3842_v24, %s2948_s28 }
 0x115   : > { %1222 = vrot.lane.b32.xlu0 %v4904_v35, %s2948_s28  ;;  %1220 = vrot.lane.b32.xlu2 %v3365_v15, %s2948_s28 }
 0x116   : > { %v1074_v30 = vpop.permute.xlu1 %1073 }
 0x117   : > { %1150 = vst.msk [vmem:[#allocation2 + $0x50] sm:$0xf] %vm1129_vm8, %v1074_v30  ;;  %v1072_v45 = vpop.permute.xlu0 %1071  ;;  %v1088_v44 = vpop.permute.xlu2 %1087  ;;  %v4929_v30 = vld [vmem:[#allocation8_spill] sm:$0xff] }
 0x118   : > { %1149 = vst.msk [vmem:[#allocation2 + $0x4c] sm:$0xf] %vm1129_vm8, %v1072_v45 }
 0x119   : > { %1157 = vst.msk [vmem:[#allocation2 + $0x6c] sm:$0xf] %vm1129_vm8, %v1088_v44 }
 0x11c   : > { %1319 = vrot.lane.b32.xlu1 %v4926_v51, %s2949_s29  ;;  %v4930_v51 = vld [vmem:[#allocation5_spill] sm:$0xff] }
 0x11d   : > { %1317 = vrot.lane.b32.xlu0 %v4927_v0, %s2949_s29  ;;  %1226 = vrot.lane.b32.xlu2 %v3857_v13, %s2948_s28  ;;  %s2954_s28 = smov 124  }
 0x11e   : > { %v1080_v6 = vpop.permute.xlu1 %1079 }
 0x11f   : > { %1153 = vst.msk [vmem:[#allocation2 + $0x5c] sm:$0xf] %vm1129_vm8, %v1080_v6  ;;  %v1078_v2 = vpop.permute.xlu0 %1077  ;;  %v1094_v49 = vpop.permute.xlu2 %1093  ;;  %v4931_v6 = vld [vmem:[#allocation11_spill] sm:$0xff] }
 0x120   : > { %1152 = vst.msk [vmem:[#allocation2 + $0x58] sm:$0xf] %vm1129_vm8, %v1078_v2  ;;  %v4932_v2 = vld [vmem:[#allocation12_spill] sm:$0xff] }
 0x121   : > { %1160 = vst.msk [vmem:[#allocation2 + $0x78] sm:$0xf] %vm1129_vm8, %v1094_v49 }
 0x124   : > { %1325 = vrot.lane.b32.xlu1 %v4928_v1, %s2949_s29  ;;  %v4933_v1 = vld [vmem:[#allocation6_spill] sm:$0xff] }
 0x125   : > { %1323 = vrot.lane.b32.xlu0 %v4929_v30, %s2949_s29  ;;  %1321 = vrot.lane.b32.xlu2 %v4930_v51, %s2949_s29 }
 0x126   : > { %v1086_v45 = vpop.permute.xlu1 %1085 }
 0x127   : > { %1156 = vst.msk [vmem:[#allocation2 + $0x68] sm:$0xf] %vm1129_vm8, %v1086_v45  ;;  %v1084_v44 = vpop.permute.xlu0 %1083  ;;  %v1167_v0 = vpop.permute.xlu2 %1166 }
 0x128   : > { %1155 = vst.msk [vmem:[#allocation2 + $0x64] sm:$0xf] %vm1129_vm8, %v1084_v44  ;;  %v4934_v44 = vld [vmem:[#allocation15_spill] sm:$0xff] }
 0x129   : > { %1262 = vst.msk [vmem:[#allocation2 + $0x4] sm:$0xf] %vm1260_vm9, %v1167_v0  ;;  %v4935_v0 = vld [vmem:[#allocation16_spill] sm:$0xff] }
 0x12c   : > { %1331 = vrot.lane.b32.xlu1 %v4931_v6, %s2949_s29 }
 0x12d   : > { %1329 = vrot.lane.b32.xlu0 %v4932_v2, %s2949_s29  ;;  %1327 = vrot.lane.b32.xlu2 %v4933_v1, %s2949_s29 }
 0x12e   : > { %v1092_v49 = vpop.permute.xlu1 %1091 }
 0x12f   : > { %1159 = vst.msk [vmem:[#allocation2 + $0x74] sm:$0xf] %vm1129_vm8, %v1092_v49  ;;  %v1090_v45 = vpop.permute.xlu0 %1089  ;;  %v1173_v51 = vpop.permute.xlu2 %1172  ;;  %v4936_v49 = vld [vmem:[#allocation10_spill] sm:$0xff] }
 0x130   : > { %1158 = vst.msk [vmem:[#allocation2 + $0x70] sm:$0xf] %vm1129_vm8, %v1090_v45  ;;  %v4938_v45 = vld [vmem:[#allocation21_spill] sm:$0xff] }
 0x131   : > { %1265 = vst.msk [vmem:[#allocation2 + $0x10] sm:$0xf] %vm1260_vm9, %v1173_v51  ;;  %v4937_v51 = vld [vmem:[#allocation20_spill] sm:$0xff] }
 0x134   : > { %1337 = vrot.lane.b32.xlu1 %v4934_v44, %s2949_s29 }
 0x135   : > { %1335 = vrot.lane.b32.xlu0 %v4935_v0, %s2949_s29  ;;  %1333 = vrot.lane.b32.xlu2 %v4936_v49, %s2949_s29 }
 0x136   : > { %v1165_v6 = vpop.permute.xlu1 %1164 }
 0x137   : > { %1261 = vst.msk [vmem:[#allocation2] sm:$0xf] %vm1260_vm9, %v1165_v6  ;;  %v1096_v2 = vpop.permute.xlu0 %1095  ;;  %v1179_v1 = vpop.permute.xlu2 %1178  ;;  %v4939_v6 = vld [vmem:[#allocation14_spill] sm:$0xff] }
 0x138   : > { %1161 = vst.msk [vmem:[#allocation2 + $0x7c] sm:$0xf] %vm1129_vm8, %v1096_v2  ;;  %v4941_v2 = vld [vmem:[#allocation25_spill] sm:$0xff] }
 0x139   : > { %1268 = vst.msk [vmem:[#allocation2 + $0x1c] sm:$0xf] %vm1260_vm9, %v1179_v1  ;;  %v4940_v1 = vld [vmem:[#allocation24_spill] sm:$0xff] }
 0x13c   : > { %1343 = vrot.lane.b32.xlu1 %v4937_v51, %s2949_s29 }
 0x13d   : > { %1341 = vrot.lane.b32.xlu0 %v4938_v45, %s2949_s29  ;;  %1339 = vrot.lane.b32.xlu2 %v4939_v6, %s2949_s29 }
 0x13e   : > { %v1171_v44 = vpop.permute.xlu1 %1170 }
 0x13f   : > { %1264 = vst.msk [vmem:[#allocation2 + $0xc] sm:$0xf] %vm1260_vm9, %v1171_v44  ;;  %v1169_v0 = vpop.permute.xlu0 %1168  ;;  %v1185_v49 = vpop.permute.xlu2 %1184  ;;  %v4942_v44 = vld [vmem:[#allocation19_spill] sm:$0xff] }
 0x140   : > { %1263 = vst.msk [vmem:[#allocation2 + $0x8] sm:$0xf] %vm1260_vm9, %v1169_v0  ;;  %v4943_v0 = vld [vmem:[#allocation29_spill] sm:$0xff] }
 0x141   : > { %1271 = vst.msk [vmem:[#allocation2 + $0x28] sm:$0xf] %vm1260_vm9, %v1185_v49  ;;  %v4944_v49 = vld [vmem:[#allocation30_spill] sm:$0xff] }
 0x144   : > { %1349 = vrot.lane.b32.xlu1 %v4940_v1, %s2949_s29 }
 0x145   : > { %1347 = vrot.lane.b32.xlu0 %v4941_v2, %s2949_s29  ;;  %1345 = vrot.lane.b32.xlu2 %v4942_v44, %s2949_s29 }
 0x146   : > { %v1177_v51 = vpop.permute.xlu1 %1176 }
 0x147   : > { %1267 = vst.msk [vmem:[#allocation2 + $0x18] sm:$0xf] %vm1260_vm9, %v1177_v51  ;;  %v1175_v45 = vpop.permute.xlu0 %1174  ;;  %v1191_v6 = vpop.permute.xlu2 %1190  ;;  %v4945_v51 = vld [vmem:[#allocation23_spill] sm:$0xff] }
 0x148   : > { %1266 = vst.msk [vmem:[#allocation2 + $0x14] sm:$0xf] %vm1260_vm9, %v1175_v45 }
 0x149   : > { %1274 = vst.msk [vmem:[#allocation2 + $0x34] sm:$0xf] %vm1260_vm9, %v1191_v6 }
 0x14c   : > { %1355 = vrot.lane.b32.xlu1 %v4943_v0, %s2949_s29  ;;  %v1303_v0 = vshll.u32 %v3857_v13, 16 }
 0x14d   : > { %1353 = vrot.lane.b32.xlu0 %v4944_v49, %s2949_s29  ;;  %1351 = vrot.lane.b32.xlu2 %v4945_v51, %s2949_s29  ;;  %v3938_v51 = vld [vmem:[%s3009_s25 + $0xc8] sm:$0x1] }
 0x14e   : > { %v1183_v1 = vpop.permute.xlu1 %1182 }
 0x14f   : > { %1270 = vst.msk [vmem:[#allocation2 + $0x24] sm:$0xf] %vm1260_vm9, %v1183_v1  ;;  %v1181_v2 = vpop.permute.xlu0 %1180  ;;  %v1197_v44 = vpop.permute.xlu2 %1196  ;;  %v4946_v1 = vld [vmem:[#allocation28_spill] sm:$0xff] }
 0x150   : > { %1269 = vst.msk [vmem:[#allocation2 + $0x20] sm:$0xf] %vm1260_vm9, %v1181_v2 }
 0x151   : > { %1277 = vst.msk [vmem:[#allocation2 + $0x40] sm:$0xf] %vm1260_vm9, %v1197_v44  ;;  %v1307_v44 = vshrl.u32 %v3857_v13, 16 }
 0x154   : > { %1361 = vrot.lane.b32.xlu1 %v3372_v41, %s2949_s29  ;;  %v1294_v41 = vshrl.u32 %v3842_v24, 16 }
 0x155   : > { %1359 = vrot.lane.b32.xlu0 %v3380_v57, %s2949_s29  ;;  %1357 = vrot.lane.b32.xlu2 %v4946_v1, %s2949_s29  ;;  %v1297_v57 = vshll.u32 %v3842_v24, 16  ;;  %v1309_v1 = vrot.slane %v1307_v44, 4 }
 0x156   : > { %v1189_v45 = vpop.permute.xlu1 %1188  ;;  %v1296_v49 = vrot.slane %v1294_v41, 4 }
 0x157   : > { %1273 = vst.msk [vmem:[#allocation2 + $0x30] sm:$0xf] %vm1260_vm9, %v1189_v45  ;;  %v1187_v6 = vpop.permute.xlu0 %1186  ;;  %v1203_v2 = vpop.permute.xlu2 %1202  ;;  %v1305_v45 = vrot.slane %v1303_v0, 5  ;;  %v1299_v30 = vrot.slane %v1297_v57, 5 }
 0x158   : > { %1272 = vst.msk [vmem:[#allocation2 + $0x2c] sm:$0xf] %vm1260_vm9, %v1187_v6 }
 0x159   : > { %1280 = vst.msk [vmem:[#allocation2 + $0x4c] sm:$0xf] %vm1260_vm9, %v1203_v2  ;;  %v1310_v15 = vor.u32 %v1309_v1, %v1305_v45 }
 0x15b   : > { %v1311_v41 = vrot.slane %v1310_v15, 4 }
 0x15c   : > { %1367 = vrot.lane.b32.xlu1 %v3400_v62, %s2949_s29  ;;  %v1313_v62 = vshll.u32 %v3938_v51, 16 }
 0x15d   : > { %1365 = vrot.lane.b32.xlu0 %v3406_v28, %s2949_s29  ;;  %1363 = vrot.lane.b32.xlu2 %v4947_v23, %s2949_s29  ;;  %v1300_v28 = vor.u32 %v1299_v30, %v1296_v49 }
 0x15e   : > { %v1195_v6 = vpop.permute.xlu1 %1194  ;;  %v1315_v57 = vrot.slane %v1313_v62, 5 }
 0x15f   : > { %1276 = vst.msk [vmem:[#allocation2 + $0x3c] sm:$0xf] %vm1260_vm9, %v1195_v6  ;;  %v1193_v2 = vpop.permute.xlu0 %1192  ;;  %v1209_v35 = vpop.permute.xlu2 %1208  ;;  %v1301_v44 = vrot.slane %v1300_v28, 4 }
 0x160   : > { %1275 = vst.msk [vmem:[#allocation2 + $0x38] sm:$0xf] %vm1260_vm9, %v1193_v2 }
 0x161   : > { %1283 = vst.msk [vmem:[#allocation2 + $0x58] sm:$0xf] %vm1260_vm9, %v1209_v35  ;;  %v3956_v35 = vsel %vm3045_vm2, %v1311_v41, %v1315_v57  ;;  %v3960_v49 = vsel %vm3045_vm2, %v1301_v44, %v1305_v45  ;;  %v4950_v57 = vld [vmem:[#allocation43_spill] sm:$0xff] }
 0x162   : > { %4948 = vst [vmem:[#allocation32_spill] sm:$0xff] %v3956_v35 }
 0x163   : > { %4949 = vst [vmem:[#allocation4_spill] sm:$0xff] %v3960_v49 }
 0x164   : > { %1373 = vrot.lane.b32.xlu1 %v3419_v50, %s2949_s29 }
 0x165   : > { %1371 = vrot.lane.b32.xlu0 %v3426_v48, %s2949_s29  ;;  %1369 = vrot.lane.b32.xlu2 %v3392_v40, %s2949_s29 }
 0x166   : > { %v1201_v0 = vpop.permute.xlu1 %1200 }
 0x167   : > { %1279 = vst.msk [vmem:[#allocation2 + $0x48] sm:$0xf] %vm1260_vm9, %v1201_v0  ;;  %v1199_v6 = vpop.permute.xlu0 %1198  ;;  %v1215_v30 = vpop.permute.xlu2 %1214 }
 0x168   : > { %1278 = vst.msk [vmem:[#allocation2 + $0x44] sm:$0xf] %vm1260_vm9, %v1199_v6  ;;  %v4951_v6 = vld [vmem:[#allocation40_spill] sm:$0xff] }
 0x169   : > { %1286 = vst.msk [vmem:[#allocation2 + $0x64] sm:$0xf] %vm1260_vm9, %v1215_v30 }
 0x16c   : > { %1379 = vrot.lane.b32.xlu1 %v3956_v35, %s2949_s29 }
 0x16d   : > { %1377 = vrot.lane.b32.xlu0 %v3960_v49, %s2949_s29  ;;  %1375 = vrot.lane.b32.xlu2 %v3415_v20, %s2949_s29  ;;  %s2857_s29 = sshll.u32 %s5005_s18, 3 }
 0x16e   : > { %v1207_v15 = vpop.permute.xlu1 %1206 }
 0x16f   : > { %1282 = vst.msk [vmem:[#allocation2 + $0x54] sm:$0xf] %vm1260_vm9, %v1207_v15  ;;  %v1205_v62 = vpop.permute.xlu0 %1204  ;;  %v1221_v28 = vpop.permute.xlu2 %1220  ;;  %v4952_v15 = vld [vmem:[#allocation44_spill] sm:$0xff] }
 0x170   : > { %1281 = vst.msk [vmem:[#allocation2 + $0x50] sm:$0xf] %vm1260_vm9, %v1205_v62  ;;  %v4953_v62 = vld [vmem:[#allocation45_spill] sm:$0xff] }
 0x171   : > { %1289 = vst.msk [vmem:[#allocation2 + $0x70] sm:$0xf] %vm1260_vm9, %v1221_v28 }
 0x174   : > { %1458 = vrot.lane.b32.xlu1 %v3486_v12, %s2950_s30 }
 0x175   : > { %1456 = vrot.lane.b32.xlu0 %v3497_v10, %s2950_s30  ;;  %1454 = vrot.lane.b32.xlu2 %v3448_v59, %s2950_s30 }
 0x176   : > { %v1213_v1 = vpop.permute.xlu1 %1212 }
 0x177   : > { %1285 = vst.msk [vmem:[#allocation2 + $0x60] sm:$0xf] %vm1260_vm9, %v1213_v1  ;;  %v1211_v45 = vpop.permute.xlu0 %1210  ;;  %v1227_v2 = vpop.permute.xlu2 %1226 }
 0x178   : > { %1284 = vst.msk [vmem:[#allocation2 + $0x5c] sm:$0xf] %vm1260_vm9, %v1211_v45  ;;  %v4954_v45 = vld [vmem:[#allocation41_spill] sm:$0xff] }
 0x179   : > { %1292 = vst.msk [vmem:[#allocation2 + $0x7c] sm:$0xf] %vm1260_vm9, %v1227_v2 }
 0x17c   : > { %1464 = vrot.lane.b32.xlu1 %v3526_v17, %s2950_s30 }
 0x17d   : > { %1462 = vrot.lane.b32.xlu0 %v3537_v18, %s2950_s30  ;;  %1460 = vrot.lane.b32.xlu2 %v3480_v4, %s2950_s30 }
 0x17e   : > { %v1219_v41 = vpop.permute.xlu1 %1218 }
 0x17f   : > { %1288 = vst.msk [vmem:[#allocation2 + $0x6c] sm:$0xf] %vm1260_vm9, %v1219_v41  ;;  %v1217_v10 = vpop.permute.xlu0 %1216  ;;  %v1322_v59 = vpop.permute.xlu2 %1321  ;;  %v4955_v41 = vld [vmem:[#allocation13_spill] sm:$0xff] }
 0x180   : > { %1287 = vst.msk [vmem:[#allocation2 + $0x68] sm:$0xf] %vm1260_vm9, %v1217_v10  ;;  %v4956_v10 = vld [vmem:[#allocation46_spill] sm:$0xff] }
 0x181   : > { %1416 = vst.msk [vmem:[#allocation2 + $0x8] sm:$0xf] %vm1413_vm10, %v1322_v59 }
 0x184   : > { %1470 = vrot.lane.b32.xlu1 %v3562_v25, %s2950_s30 }
 0x185   : > { %1468 = vrot.lane.b32.xlu0 %v4950_v57, %s2950_s30  ;;  %1466 = vrot.lane.b32.xlu2 %v4951_v6, %s2950_s30 }
 0x186   : > { %v1225_v0 = vpop.permute.xlu1 %1224 }
 0x187   : > { %1291 = vst.msk [vmem:[#allocation2 + $0x78] sm:$0xf] %vm1260_vm9, %v1225_v0  ;;  %v1223_v44 = vpop.permute.xlu0 %1222  ;;  %v1328_v30 = vpop.permute.xlu2 %1327 }
 0x188   : > { %1290 = vst.msk [vmem:[#allocation2 + $0x74] sm:$0xf] %vm1260_vm9, %v1223_v44  ;;  %v4957_v44 = vld [vmem:[#allocation9_spill] sm:$0xff] }
 0x189   : > { %1419 = vst.msk [vmem:[#allocation2 + $0x14] sm:$0xf] %vm1413_vm10, %v1328_v30 }
 0x18c   : > { %1476 = vrot.lane.b32.xlu1 %v4952_v15, %s2950_s30 }
 0x18d   : > { %1474 = vrot.lane.b32.xlu0 %v4953_v62, %s2950_s30  ;;  %1472 = vrot.lane.b32.xlu2 %v4954_v45, %s2950_s30 }
 0x18e   : > { %v1320_v28 = vpop.permute.xlu1 %1319 }
 0x18f   : > { %1415 = vst.msk [vmem:[#allocation2 + $0x4] sm:$0xf] %vm1413_vm10, %v1320_v28  ;;  %v1318_v1 = vpop.permute.xlu0 %1317  ;;  %v1334_v2 = vpop.permute.xlu2 %1333  ;;  %v4958_v28 = vld [vmem:[#allocation48_spill] sm:$0xff] }
 0x190   : > { %1414 = vst.msk [vmem:[#allocation2] sm:$0xf] %vm1413_vm10, %v1318_v1 }
 0x191   : > { %1422 = vst.msk [vmem:[#allocation2 + $0x20] sm:$0xf] %vm1413_vm10, %v1334_v2 }
 0x194   : > { %1482 = vrot.lane.b32.xlu1 %v4955_v41, %s2950_s30 }
 0x195   : > { %1480 = vrot.lane.b32.xlu0 %v4956_v10, %s2950_s30  ;;  %1478 = vrot.lane.b32.xlu2 %v4957_v44, %s2950_s30 }
 0x196   : > { %v1326_v59 = vpop.permute.xlu1 %1325 }
 0x197   : > { %1418 = vst.msk [vmem:[#allocation2 + $0x10] sm:$0xf] %vm1413_vm10, %v1326_v59  ;;  %v1324_v0 = vpop.permute.xlu0 %1323  ;;  %v1340_v30 = vpop.permute.xlu2 %1339  ;;  %v4959_v59 = vld [vmem:[#allocation18_spill] sm:$0xff] }
 0x198   : > { %1417 = vst.msk [vmem:[#allocation2 + $0xc] sm:$0xf] %vm1413_vm10, %v1324_v0  ;;  %v4960_v0 = vld [vmem:[#allocation22_spill] sm:$0xff] }
 0x199   : > { %1425 = vst.msk [vmem:[#allocation2 + $0x2c] sm:$0xf] %vm1413_vm10, %v1340_v30  ;;  %v4961_v30 = vld [vmem:[#allocation49_spill] sm:$0xff] }
 0x19c   : > { %1488 = vrot.lane.b32.xlu1 %v3650_v46, %s2950_s30 }
 0x19d   : > { %1486 = vrot.lane.b32.xlu0 %v4958_v28, %s2950_s30  ;;  %1484 = vrot.lane.b32.xlu2 %v4959_v59, %s2950_s30 }
 0x19e   : > { %v1332_v1 = vpop.permute.xlu1 %1331 }
 0x19f   : > { %1421 = vst.msk [vmem:[#allocation2 + $0x1c] sm:$0xf] %vm1413_vm10, %v1332_v1  ;;  %v1330_v2 = vpop.permute.xlu0 %1329  ;;  %v1346_v41 = vpop.permute.xlu2 %1345  ;;  %v4962_v1 = vld [vmem:[#allocation17_spill] sm:$0xff] }
 0x1a0   : > { %1420 = vst.msk [vmem:[#allocation2 + $0x18] sm:$0xf] %vm1413_vm10, %v1330_v2 }
 0x1a1   : > { %1428 = vst.msk [vmem:[#allocation2 + $0x38] sm:$0xf] %vm1413_vm10, %v1346_v41 }
 0x1a4   : > { %1494 = vrot.lane.b32.xlu1 %v4960_v0, %s2950_s30 }
 0x1a5   : > { %1492 = vrot.lane.b32.xlu0 %v4961_v30, %s2950_s30  ;;  %1490 = vrot.lane.b32.xlu2 %v4962_v1, %s2950_s30 }
 0x1a6   : > { %v1338_v46 = vpop.permute.xlu1 %1337 }
 0x1a7   : > { %1424 = vst.msk [vmem:[#allocation2 + $0x28] sm:$0xf] %vm1413_vm10, %v1338_v46  ;;  %v1336_v28 = vpop.permute.xlu0 %1335  ;;  %v1352_v59 = vpop.permute.xlu2 %1351  ;;  %v4963_v46 = vld [vmem:[#allocation27_spill] sm:$0xff] }
 0x1a8   : > { %1423 = vst.msk [vmem:[#allocation2 + $0x24] sm:$0xf] %vm1413_vm10, %v1336_v28 }
 0x1a9   : > { %1431 = vst.msk [vmem:[#allocation2 + $0x44] sm:$0xf] %vm1413_vm10, %v1352_v59 }
 0x1ac   : > { %1500 = vrot.lane.b32.xlu1 %v3701_v14, %s2950_s30 }
 0x1ad   : > { %1498 = vrot.lane.b32.xlu0 %v3708_v52, %s2950_s30  ;;  %1496 = vrot.lane.b32.xlu2 %v4963_v46, %s2950_s30 }
 0x1ae   : > { %v1344_v41 = vpop.permute.xlu1 %1343 }
 0x1af   : > { %1427 = vst.msk [vmem:[#allocation2 + $0x34] sm:$0xf] %vm1413_vm10, %v1344_v41  ;;  %v1342_v2 = vpop.permute.xlu0 %1341  ;;  %v1358_v45 = vpop.permute.xlu2 %1357  ;;  %v4964_v41 = vld [vmem:[#allocation26_spill] sm:$0xff] }
 0x1b0   : > { %1426 = vst.msk [vmem:[#allocation2 + $0x30] sm:$0xf] %vm1413_vm10, %v1342_v2  ;;  %v1449_v2 = vrot.slane %v3857_v13, 5 }
 0x1b1   : > { %1434 = vst.msk [vmem:[#allocation2 + $0x50] sm:$0xf] %vm1413_vm10, %v1358_v45 }
 0x1b2   : > { %v1451_v35 = vrot.slane %v1449_v2, 4 }
 0x1b4   : > { %1506 = vrot.lane.b32.xlu1 %v3725_v54, %s2950_s30 }
 0x1b5   : > { %1504 = vrot.lane.b32.xlu0 %v3733_v9, %s2950_s30  ;;  %1502 = vrot.lane.b32.xlu2 %v4964_v41, %s2950_s30 }
 0x1b6   : > { %v1350_v28 = vpop.permute.xlu1 %1349 }
 0x1b7   : > { %1430 = vst.msk [vmem:[#allocation2 + $0x40] sm:$0xf] %vm1413_vm10, %v1350_v28  ;;  %v1348_v59 = vpop.permute.xlu0 %1347  ;;  %v1364_v49 = vpop.permute.xlu2 %1363  ;;  %v1452_v28 = vrot.slane %v3938_v51, 5 }
 0x1b8   : > { %1429 = vst.msk [vmem:[#allocation2 + $0x3c] sm:$0xf] %vm1413_vm10, %v1348_v59 }
 0x1b9   : > { %1437 = vst.msk [vmem:[#allocation2 + $0x5c] sm:$0xf] %vm1413_vm10, %v1364_v49  ;;  %v2765_v49 = vrot.slane %v3842_v24, 9  ;;  %v4066_v10 = vsel %vm3432_vm6, %v1451_v35, %v1452_v28 }
 0x1bb   : > { %v4073_v51 = vsel %vm3432_vm6, %v2765_v49, %v1449_v2  ;;  %v4965_v49 = vld [vmem:[#allocation33_spill] sm:$0xff] }
 0x1bc   : > { %1512 = vrot.lane.b32.xlu1 %v3745_v55, %s2950_s30 }
 0x1bd   : > { %1510 = vrot.lane.b32.xlu0 %v3752_v39, %s2950_s30  ;;  %1508 = vrot.lane.b32.xlu2 %v3721_v60, %s2950_s30 }
 0x1be   : > { %v1356_v45 = vpop.permute.xlu1 %1355 }
 0x1bf   : > { %1433 = vst.msk [vmem:[#allocation2 + $0x4c] sm:$0xf] %vm1413_vm10, %v1356_v45  ;;  %v1354_v25 = vpop.permute.xlu0 %1353  ;;  %v1370_v59 = vpop.permute.xlu2 %1369 }
 0x1c0   : > { %1432 = vst.msk [vmem:[#allocation2 + $0x48] sm:$0xf] %vm1413_vm10, %v1354_v25 }
 0x1c1   : > { %1440 = vst.msk [vmem:[#allocation2 + $0x68] sm:$0xf] %vm1413_vm10, %v1370_v59 }
 0x1c4   : > { %1585 = vrot.lane.b32.xlu1 %v3054_v37, %s2951_s6 }
 0x1c5   : > { %1516 = vrot.lane.b32.xlu0 %v4066_v10, %s2950_s30  ;;  %1514 = vrot.lane.b32.xlu2 %v4073_v51, %s2950_s30 }
 0x1c6   : > { %v1362_v25 = vpop.permute.xlu1 %1361 }
 0x1c7   : > { %1436 = vst.msk [vmem:[#allocation2 + $0x58] sm:$0xf] %vm1413_vm10, %v1362_v25  ;;  %v1360_v45 = vpop.permute.xlu0 %1359  ;;  %v1376_v35 = vpop.permute.xlu2 %1375  ;;  %v4967_v25 = vld [vmem:[#allocation31_spill] sm:$0xff] }
 0x1c8   : > { %1435 = vst.msk [vmem:[#allocation2 + $0x54] sm:$0xf] %vm1413_vm10, %v1360_v45 }
 0x1c9   : > { %1443 = vst.msk [vmem:[#allocation2 + $0x74] sm:$0xf] %vm1413_vm10, %v1376_v35 }
 0x1cc   : > { %1591 = vrot.lane.b32.xlu1 %v3039_v22, %s2951_s6 }
 0x1cd   : > { %1589 = vrot.lane.b32.xlu0 %v3051_v31, %s2951_s6  ;;  %1587 = vrot.lane.b32.xlu2 %v3065_v42, %s2951_s6 }
 0x1ce   : > { %v1368_v37 = vpop.permute.xlu1 %1367 }
 0x1cf   : > { %1439 = vst.msk [vmem:[#allocation2 + $0x64] sm:$0xf] %vm1413_vm10, %v1368_v37  ;;  %v1366_v2 = vpop.permute.xlu0 %1365  ;;  %v1455_v28 = vpop.permute.xlu2 %1454 }
 0x1d0   : > { %1438 = vst.msk [vmem:[#allocation2 + $0x60] sm:$0xf] %vm1413_vm10, %v1366_v2 }
 0x1d1   : > { %1551 = vst.msk [vmem:[#allocation2] sm:$0xf] %vm1550_vm11, %v1455_v28  ;;  %v4968_v28 = vld [vmem:[#allocation8_spill] sm:$0xff] }
 0x1d4   : > { %1597 = vrot.lane.b32.xlu1 %v3079_v53, %s2951_s6 }
 0x1d5   : > { %1595 = vrot.lane.b32.xlu0 %v3083_v56, %s2951_s6  ;;  %1593 = vrot.lane.b32.xlu2 %v3118_v29, %s2951_s6 }
 0x1d6   : > { %v1374_v22 = vpop.permute.xlu1 %1373 }
 0x1d7   : > { %1442 = vst.msk [vmem:[#allocation2 + $0x70] sm:$0xf] %vm1413_vm10, %v1374_v22  ;;  %v1372_v31 = vpop.permute.xlu0 %1371  ;;  %v1461_v42 = vpop.permute.xlu2 %1460  ;;  %v4178_v22 = vld [vmem:[%s3009_s25 + $0xd0] sm:$0xf] }
 0x1d8   : > { %1441 = vst.msk [vmem:[#allocation2 + $0x6c] sm:$0xf] %vm1413_vm10, %v1372_v31 }
 0x1d9   : > { %1554 = vst.msk [vmem:[#allocation2 + $0xc] sm:$0xf] %vm1550_vm11, %v1461_v42 }
 0x1dc   : > { %1603 = vrot.lane.b32.xlu1 %v3104_v16, %s2951_s6 }
 0x1dd   : > { %1601 = vrot.lane.b32.xlu0 %v3125_v33, %s2951_s6  ;;  %1599 = vrot.lane.b32.xlu2 %v3108_v19, %s2951_s6 }
 0x1de   : > { %v1380_v53 = vpop.permute.xlu1 %1379 }
 0x1df   : > { %1445 = vst.msk [vmem:[#allocation2 + $0x7c] sm:$0xf] %vm1413_vm10, %v1380_v53  ;;  %v1378_v56 = vpop.permute.xlu0 %1377  ;;  %v1467_v29 = vpop.permute.xlu2 %1466  ;;  %v4970_v53 = vld [vmem:[#allocation12_spill] sm:$0xff] }
 0x1e0   : > { %1444 = vst.msk [vmem:[#allocation2 + $0x78] sm:$0xf] %vm1413_vm10, %v1378_v56  ;;  %v4971_v56 = vld [vmem:[#allocation6_spill] sm:$0xff] }
 0x1e1   : > { %1557 = vst.msk [vmem:[#allocation2 + $0x18] sm:$0xf] %vm1550_vm11, %v1467_v29 }
 0x1e4   : > { %1609 = vrot.lane.b32.xlu1 %v3154_v7, %s2951_s6 }
 0x1e5   : > { %1607 = vrot.lane.b32.xlu0 %v3160_v11, %s2951_s6  ;;  %1605 = vrot.lane.b32.xlu2 %v3173_v26, %s2951_s6 }
 0x1e6   : > { %v1459_v16 = vpop.permute.xlu1 %1458 }
 0x1e7   : > { %1553 = vst.msk [vmem:[#allocation2 + $0x8] sm:$0xf] %vm1550_vm11, %v1459_v16  ;;  %v1457_v33 = vpop.permute.xlu0 %1456  ;;  %v1473_v19 = vpop.permute.xlu2 %1472 }
 0x1e8   : > { %1552 = vst.msk [vmem:[#allocation2 + $0x4] sm:$0xf] %vm1550_vm11, %v1457_v33  ;;  %v4972_v33 = vld [vmem:[#allocation7_spill] sm:$0xff] }
 0x1e9   : > { %1560 = vst.msk [vmem:[#allocation2 + $0x24] sm:$0xf] %vm1550_vm11, %v1473_v19 }
 0x1ec   : > { %1615 = vrot.lane.b32.xlu1 %v3199_v61, %s2951_s6 }
 0x1ed   : > { %1613 = vrot.lane.b32.xlu0 %v3209_v63, %s2951_s6  ;;  %1611 = vrot.lane.b32.xlu2 %v3188_v43, %s2951_s6 }
 0x1ee   : > { %v1465_v7 = vpop.permute.xlu1 %1464 }
 0x1ef   : > { %1556 = vst.msk [vmem:[#allocation2 + $0x14] sm:$0xf] %vm1550_vm11, %v1465_v7  ;;  %v1463_v11 = vpop.permute.xlu0 %1462  ;;  %v1479_v26 = vpop.permute.xlu2 %1478  ;;  %v4973_v7 = vld [vmem:[#allocation16_spill] sm:$0xff] }
 0x1f0   : > { %1555 = vst.msk [vmem:[#allocation2 + $0x10] sm:$0xf] %vm1550_vm11, %v1463_v11  ;;  %v4974_v11 = vld [vmem:[#allocation10_spill] sm:$0xff] }
 0x1f1   : > { %1563 = vst.msk [vmem:[#allocation2 + $0x30] sm:$0xf] %vm1550_vm11, %v1479_v26 }
 0x1f4   : > { %1621 = vrot.lane.b32.xlu1 %v3233_v3, %s2951_s6 }
 0x1f5   : > { %1619 = vrot.lane.b32.xlu0 %v3238_v5, %s2951_s6  ;;  %1617 = vrot.lane.b32.xlu2 %v3251_v32, %s2951_s6 }
 0x1f6   : > { %v1471_v61 = vpop.permute.xlu1 %1470 }
 0x1f7   : > { %1559 = vst.msk [vmem:[#allocation2 + $0x20] sm:$0xf] %vm1550_vm11, %v1471_v61  ;;  %v1469_v63 = vpop.permute.xlu0 %1468  ;;  %v1485_v43 = vpop.permute.xlu2 %1484 }
 0x1f8   : > { %1558 = vst.msk [vmem:[#allocation2 + $0x1c] sm:$0xf] %vm1550_vm11, %v1469_v63  ;;  %v4975_v63 = vld [vmem:[#allocation11_spill] sm:$0xff] }
 0x1f9   : > { %1566 = vst.msk [vmem:[#allocation2 + $0x3c] sm:$0xf] %vm1550_vm11, %v1485_v43 }
 0x1fc   : > { %1627 = vrot.lane.b32.xlu1 %v3267_v21, %s2951_s6 }
 0x1fd   : > { %1625 = vrot.lane.b32.xlu0 %v3284_v58, %s2951_s6  ;;  %1623 = vrot.lane.b32.xlu2 %v3274_v34, %s2951_s6 }
 0x1fe   : > { %v1477_v3 = vpop.permute.xlu1 %1476 }
 0x1ff   : > { %1562 = vst.msk [vmem:[#allocation2 + $0x2c] sm:$0xf] %vm1550_vm11, %v1477_v3  ;;  %v1475_v5 = vpop.permute.xlu0 %1474  ;;  %v1491_v32 = vpop.permute.xlu2 %1490  ;;  %v4976_v3 = vld [vmem:[#allocation21_spill] sm:$0xff] }
 0x200   : > { %1561 = vst.msk [vmem:[#allocation2 + $0x28] sm:$0xf] %vm1550_vm11, %v1475_v5  ;;  %v4977_v5 = vld [vmem:[#allocation14_spill] sm:$0xff] }
 0x201   : > { %1569 = vst.msk [vmem:[#allocation2 + $0x48] sm:$0xf] %vm1550_vm11, %v1491_v32 }
 0x204   : > { %1633 = vrot.lane.b32.xlu1 %v3311_v38, %s2951_s6  ;;  %v4966_v38 = vld [vmem:[#allocation35_spill] sm:$0xff] }
 0x205   : > { %1631 = vrot.lane.b32.xlu0 %v3317_v8, %s2951_s6  ;;  %1629 = vrot.lane.b32.xlu2 %v3329_v36, %s2951_s6  ;;  %v4163_v36 = vld [vmem:[%s3009_s25 + $0xcc] sm:$0xf] }
 0x206   : > { %v1483_v58 = vpop.permute.xlu1 %1482 }
 0x207   : > { %1565 = vst.msk [vmem:[#allocation2 + $0x38] sm:$0xf] %vm1550_vm11, %v1483_v58  ;;  %v1481_v21 = vpop.permute.xlu0 %1480  ;;  %v1497_v34 = vpop.permute.xlu2 %1496 }
 0x208   : > { %1564 = vst.msk [vmem:[#allocation2 + $0x34] sm:$0xf] %vm1550_vm11, %v1481_v21  ;;  %v4978_v21 = vld [vmem:[#allocation15_spill] sm:$0xff] }
 0x209   : > { %1572 = vst.msk [vmem:[#allocation2 + $0x54] sm:$0xf] %vm1550_vm11, %v1497_v34 }
 0x20c   : > { %1639 = vrot.lane.b32.xlu1 %v4965_v49, %s2951_s6  ;;  %v4979_v49 = vld [vmem:[#allocation25_spill] sm:$0xff] }
 0x20d   : > { %1637 = vrot.lane.b32.xlu0 %v4966_v38, %s2951_s6  ;;  %1635 = vrot.lane.b32.xlu2 %v4967_v25, %s2951_s6  ;;  %v4980_v38 = vld [vmem:[#allocation19_spill] sm:$0xff]  ;;  %v4981_v25 = vld [vmem:[#allocation20_spill] sm:$0xff] }
 0x20e   : > { %v1489_v59 = vpop.permute.xlu1 %1488 }
 0x20f   : > { %1568 = vst.msk [vmem:[#allocation2 + $0x44] sm:$0xf] %vm1550_vm11, %v1489_v59  ;;  %v1487_v8 = vpop.permute.xlu0 %1486  ;;  %v1503_v45 = vpop.permute.xlu2 %1502 }
 0x210   : > { %1567 = vst.msk [vmem:[#allocation2 + $0x40] sm:$0xf] %vm1550_vm11, %v1487_v8 }
 0x211   : > { %1575 = vst.msk [vmem:[#allocation2 + $0x60] sm:$0xf] %vm1550_vm11, %v1503_v45 }
 0x214   : > { %1645 = vrot.lane.b32.xlu1 %v4163_v36, %s2951_s6 }
 0x215   : > { %1643 = vrot.lane.b32.xlu0 %v3857_v13, %s2951_s6  ;;  %1641 = vrot.lane.b32.xlu2 %v3842_v24, %s2951_s6  ;;  %v4969_v13 = vld [vmem:[#allocation5_spill] sm:$0xff] }
 0x216   : > { %v1495_v35 = vpop.permute.xlu1 %1494 }
 0x217   : > { %1571 = vst.msk [vmem:[#allocation2 + $0x50] sm:$0xf] %vm1550_vm11, %v1495_v35  ;;  %v1493_v37 = vpop.permute.xlu0 %1492  ;;  %v1509_v2 = vpop.permute.xlu2 %1508  ;;  %v4982_v35 = vld [vmem:[#allocation30_spill] sm:$0xff] }
 0x218   : > { %1570 = vst.msk [vmem:[#allocation2 + $0x4c] sm:$0xf] %vm1550_vm11, %v1493_v37  ;;  %v4983_v37 = vld [vmem:[#allocation23_spill] sm:$0xff] }
 0x219   : > { %1578 = vst.msk [vmem:[#allocation2 + $0x6c] sm:$0xf] %vm1550_vm11, %v1509_v2 }
 0x21c   : > { %1740 = vrot.lane.b32.xlu1 %v4968_v28, %s2952_s7 }
 0x21d   : > { %1738 = vrot.lane.b32.xlu0 %v4969_v13, %s2952_s7  ;;  %1647 = vrot.lane.b32.xlu2 %v4178_v22, %s2951_s6  ;;  %v4984_v13 = vld [vmem:[#allocation24_spill] sm:$0xff] }
 0x21e   : > { %v1501_v31 = vpop.permute.xlu1 %1500 }
 0x21f   : > { %1574 = vst.msk [vmem:[#allocation2 + $0x5c] sm:$0xf] %vm1550_vm11, %v1501_v31  ;;  %v1499_v42 = vpop.permute.xlu0 %1498  ;;  %v1515_v24 = vpop.permute.xlu2 %1514 }
 0x220   : > { %1573 = vst.msk [vmem:[#allocation2 + $0x58] sm:$0xf] %vm1550_vm11, %v1499_v42  ;;  %v4985_v42 = vld [vmem:[#allocation37_spill] sm:$0xff] }
 0x221   : > { %1581 = vst.msk [vmem:[#allocation2 + $0x78] sm:$0xf] %vm1550_vm11, %v1515_v24  ;;  %v4986_v24 = vld [vmem:[#allocation28_spill] sm:$0xff] }
 0x224   : > { %1746 = vrot.lane.b32.xlu1 %v4970_v53, %s2952_s7 }
 0x225   : > { %1744 = vrot.lane.b32.xlu0 %v4971_v56, %s2952_s7  ;;  %1742 = vrot.lane.b32.xlu2 %v4972_v33, %s2952_s7 }
 0x226   : > { %v1507_v29 = vpop.permute.xlu1 %1506 }
 0x227   : > { %1577 = vst.msk [vmem:[#allocation2 + $0x68] sm:$0xf] %vm1550_vm11, %v1507_v29  ;;  %v1505_v16 = vpop.permute.xlu0 %1504  ;;  %v1588_v19 = vpop.permute.xlu2 %1587  ;;  %v4987_v29 = vld [vmem:[#allocation29_spill] sm:$0xff] }
 0x228   : > { %1576 = vst.msk [vmem:[#allocation2 + $0x64] sm:$0xf] %vm1550_vm11, %v1505_v16 }
 0x229   : > { %1683 = vst.msk [vmem:[#allocation2 + $0x4] sm:$0xf] %vm1681_vm12, %v1588_v19 }
 0x22c   : > { %1752 = vrot.lane.b32.xlu1 %v4973_v7, %s2952_s7  ;;  %v4988_v7 = vld [vmem:[#allocation36_spill] sm:$0xff] }
 0x22d   : > { %1750 = vrot.lane.b32.xlu0 %v4974_v11, %s2952_s7  ;;  %1748 = vrot.lane.b32.xlu2 %v4975_v63, %s2952_s7 }
 0x22e   : > { %v1513_v26 = vpop.permute.xlu1 %1512 }
 0x22f   : > { %1580 = vst.msk [vmem:[#allocation2 + $0x74] sm:$0xf] %vm1550_vm11, %v1513_v26  ;;  %v1511_v61 = vpop.permute.xlu0 %1510  ;;  %v1594_v43 = vpop.permute.xlu2 %1593 }
 0x230   : > { %1579 = vst.msk [vmem:[#allocation2 + $0x70] sm:$0xf] %vm1550_vm11, %v1511_v61  ;;  %v4989_v61 = vld [vmem:[#allocation39_spill] sm:$0xff] }
 0x231   : > { %1686 = vst.msk [vmem:[#allocation2 + $0x10] sm:$0xf] %vm1681_vm12, %v1594_v43  ;;  %v1718_v43 = vshll.u32 %v4163_v36, 16 }
 0x234   : > { %1758 = vrot.lane.b32.xlu1 %v4976_v3, %s2952_s7 }
 0x235   : > { %1756 = vrot.lane.b32.xlu0 %v4977_v5, %s2952_s7  ;;  %1754 = vrot.lane.b32.xlu2 %v4978_v21, %s2952_s7  ;;  %v1720_v5 = vrot.slane %v1718_v43, 5 }
 0x236   : > { %v1586_v32 = vpop.permute.xlu1 %1585 }
 0x237   : > { %1682 = vst.msk [vmem:[#allocation2] sm:$0xf] %vm1681_vm12, %v1586_v32  ;;  %v1517_v58 = vpop.permute.xlu0 %1516  ;;  %v1600_v34 = vpop.permute.xlu2 %1599 }
 0x238   : > { %1582 = vst.msk [vmem:[#allocation2 + $0x7c] sm:$0xf] %vm1550_vm11, %v1517_v58 }
 0x239   : > { %1689 = vst.msk [vmem:[#allocation2 + $0x1c] sm:$0xf] %vm1681_vm12, %v1600_v34 }
 0x23c   : > { %1764 = vrot.lane.b32.xlu1 %v4979_v49, %s2952_s7 }
 0x23d   : > { %1762 = vrot.lane.b32.xlu0 %v4980_v38, %s2952_s7  ;;  %1760 = vrot.lane.b32.xlu2 %v4981_v25, %s2952_s7 }
 0x23e   : > { %v1592_v59 = vpop.permute.xlu1 %1591 }
 0x23f   : > { %1685 = vst.msk [vmem:[#allocation2 + $0xc] sm:$0xf] %vm1681_vm12, %v1592_v59  ;;  %v1590_v8 = vpop.permute.xlu0 %1589  ;;  %v1606_v45 = vpop.permute.xlu2 %1605  ;;  %v2766_v59 = vrot.slane %v4163_v36, 9 }
 0x240   : > { %1684 = vst.msk [vmem:[#allocation2 + $0x8] sm:$0xf] %vm1681_vm12, %v1590_v8  ;;  %v1870_v8 = vrot.slane %v4178_v22, 5 }
 0x241   : > { %1692 = vst.msk [vmem:[#allocation2 + $0x28] sm:$0xf] %vm1681_vm12, %v1606_v45  ;;  %v4991_v45 = vld [vmem:[#allocation46_spill] sm:$0xff] }
 0x242   : > { %v4339_v25 = vsel %vm3432_vm6, %v2766_v59, %v1870_v8 }
 0x244   : > { %1770 = vrot.lane.b32.xlu1 %v4982_v35, %s2952_s7 }
 0x245   : > { %1768 = vrot.lane.b32.xlu0 %v4983_v37, %s2952_s7  ;;  %1766 = vrot.lane.b32.xlu2 %v4984_v13, %s2952_s7 }
 0x246   : > { %v1598_v2 = vpop.permute.xlu1 %1597 }
 0x247   : > { %1688 = vst.msk [vmem:[#allocation2 + $0x18] sm:$0xf] %vm1681_vm12, %v1598_v2  ;;  %v1596_v28 = vpop.permute.xlu0 %1595  ;;  %v1612_v31 = vpop.permute.xlu2 %1611 }
 0x248   : > { %1687 = vst.msk [vmem:[#allocation2 + $0x14] sm:$0xf] %vm1681_vm12, %v1596_v28  ;;  %v4993_v28 = vld [vmem:[#allocation32_spill] sm:$0xff] }
 0x249   : > { %1695 = vst.msk [vmem:[#allocation2 + $0x34] sm:$0xf] %vm1681_vm12, %v1612_v31 }
 0x24c   : > { %1776 = vrot.lane.b32.xlu1 %v4985_v42, %s2952_s7 }
 0x24d   : > { %1774 = vrot.lane.b32.xlu0 %v4986_v24, %s2952_s7  ;;  %1772 = vrot.lane.b32.xlu2 %v4987_v29, %s2952_s7  ;;  %v4994_v24 = vld [vmem:[#allocation4_spill] sm:$0xff]  ;;  %v2874_v29 = vld [vmem:[%s4761_s1] sm:$0xff] }
 0x24e   : > { %v1604_v53 = vpop.permute.xlu1 %1603 }
 0x24f   : > { %1691 = vst.msk [vmem:[#allocation2 + $0x24] sm:$0xf] %vm1681_vm12, %v1604_v53  ;;  %v1602_v56 = vpop.permute.xlu0 %1601  ;;  %v1618_v16 = vpop.permute.xlu2 %1617  ;;  %v2875_v53 = vld [vmem:[%s4761_s1 + $0x8] sm:$0xff] }
 0x250   : > { %1690 = vst.msk [vmem:[#allocation2 + $0x20] sm:$0xf] %vm1681_vm12, %v1602_v56 }
 0x251   : > { %1698 = vst.msk [vmem:[#allocation2 + $0x40] sm:$0xf] %vm1681_vm12, %v1618_v16  ;;  %v1728_v16 = vshrl.u32 %v4178_v22, 16 }
 0x254   : > { %1907 = vrot.lane.b32.xlu1 %v4962_v1, %s2953_s8 }
 0x255   : > { %1780 = vrot.lane.b32.xlu0 %v4947_v23, %s2952_s7  ;;  %1778 = vrot.lane.b32.xlu2 %v4988_v7, %s2952_s7  ;;  %v4995_v7 = vld [vmem:[#allocation41_spill] sm:$0xff] }
 0x256   : > { %v1610_v33 = vpop.permute.xlu1 %1609 }
 0x257   : > { %1694 = vst.msk [vmem:[#allocation2 + $0x30] sm:$0xf] %vm1681_vm12, %v1610_v33  ;;  %v1608_v19 = vpop.permute.xlu0 %1607  ;;  %v1624_v11 = vpop.permute.xlu2 %1623 }
 0x258   : > { %1693 = vst.msk [vmem:[#allocation2 + $0x2c] sm:$0xf] %vm1681_vm12, %v1608_v19 }
 0x259   : > { %1701 = vst.msk [vmem:[#allocation2 + $0x4c] sm:$0xf] %vm1681_vm12, %v1624_v11  ;;  %v1730_v11 = vrot.slane %v1728_v16, 4 }
 0x25c   : > { %1877 = vrot.lane.b32.xlu1 %v3480_v4, %s2953_s8 }
 0x25d   : > { %1875 = vrot.lane.b32.xlu0 %v3486_v12, %s2953_s8  ;;  %1909 = vrot.lane.b32.xlu2 %v4961_v30, %s2953_s8 }
 0x25e   : > { %v1616_v1 = vpop.permute.xlu1 %1615 }
 0x25f   : > { %1697 = vst.msk [vmem:[#allocation2 + $0x3c] sm:$0xf] %vm1681_vm12, %v1616_v1  ;;  %v1614_v23 = vpop.permute.xlu0 %1613  ;;  %v1630_v26 = vpop.permute.xlu2 %1629 }
 0x260   : > { %1696 = vst.msk [vmem:[#allocation2 + $0x38] sm:$0xf] %vm1681_vm12, %v1614_v23  ;;  %v4996_v23 = vld [vmem:[#allocation18_spill] sm:$0xff] }
 0x261   : > { %1704 = vst.msk [vmem:[#allocation2 + $0x58] sm:$0xf] %vm1681_vm12, %v1630_v26  ;;  %v1872_v26 = vrot.slane %v1870_v8, 4 }
 0x264   : > { %1913 = vrot.lane.b32.xlu1 %v4963_v46, %s2953_s8 }
 0x265   : > { %1911 = vrot.lane.b32.xlu0 %v4960_v0, %s2953_s8  ;;  %1782 = vrot.lane.b32.xlu2 %v4989_v61, %s2952_s7 }
 0x266   : > { %v1622_v4 = vpop.permute.xlu1 %1621 }
 0x267   : > { %1700 = vst.msk [vmem:[#allocation2 + $0x48] sm:$0xf] %vm1681_vm12, %v1622_v4  ;;  %v1620_v12 = vpop.permute.xlu0 %1619  ;;  %v1636_v30 = vpop.permute.xlu2 %1635 }
 0x268   : > { %1699 = vst.msk [vmem:[#allocation2 + $0x44] sm:$0xf] %vm1681_vm12, %v1620_v12 }
 0x269   : > { %1707 = vst.msk [vmem:[#allocation2 + $0x64] sm:$0xf] %vm1681_vm12, %v1636_v30  ;;  %v4997_v30 = vld [vmem:[#allocation13_spill] sm:$0xff] }
 0x26c   : > { %1879 = vrot.lane.b32.xlu1 %v3537_v18, %s2953_s8 }
 0x26d   : > { %1788 = vrot.lane.b32.xlu0 %v3426_v48, %s2952_s7  ;;  %1786 = vrot.lane.b32.xlu2 %v3392_v40, %s2952_s7 }
 0x26e   : > { %v1628_v46 = vpop.permute.xlu1 %1627 }
 0x26f   : > { %1703 = vst.msk [vmem:[#allocation2 + $0x54] sm:$0xf] %vm1681_vm12, %v1628_v46  ;;  %v1626_v0 = vpop.permute.xlu0 %1625  ;;  %v1642_v63 = vpop.permute.xlu2 %1641 }
 0x270   : > { %1702 = vst.msk [vmem:[#allocation2 + $0x50] sm:$0xf] %vm1681_vm12, %v1626_v0 }
 0x271   : > { %1710 = vst.msk [vmem:[#allocation2 + $0x70] sm:$0xf] %vm1681_vm12, %v1642_v63 }
 0x274   : > { %1925 = vrot.lane.b32.xlu1 %v3721_v60, %s2953_s8 }
 0x275   : > { %1923 = vrot.lane.b32.xlu0 %v3725_v54, %s2953_s8  ;;  %1881 = vrot.lane.b32.xlu2 %v3526_v17, %s2953_s8 }
 0x276   : > { %v1634_v18 = vpop.permute.xlu1 %1633 }
 0x277   : > { %1706 = vst.msk [vmem:[#allocation2 + $0x60] sm:$0xf] %vm1681_vm12, %v1634_v18  ;;  %v1632_v48 = vpop.permute.xlu0 %1631  ;;  %v1648_v40 = vpop.permute.xlu2 %1647 }
 0x278   : > { %1705 = vst.msk [vmem:[#allocation2 + $0x5c] sm:$0xf] %vm1681_vm12, %v1632_v48 }
 0x279   : > { %1713 = vst.msk [vmem:[#allocation2 + $0x7c] sm:$0xf] %vm1681_vm12, %v1648_v40 }
 0x27c   : > { %1915 = vrot.lane.b32.xlu1 %v3708_v52, %s2953_s8 }
 0x27d   : > { %1893 = vrot.lane.b32.xlu0 %v4952_v15, %s2953_s8  ;;  %1891 = vrot.lane.b32.xlu2 %v4953_v62, %s2953_s8  ;;  %v1715_v62 = vshrl.u32 %v4163_v36, 16 }
 0x27e   : > { %v1640_v60 = vpop.permute.xlu1 %1639 }
 0x27f   : > { %1709 = vst.msk [vmem:[#allocation2 + $0x6c] sm:$0xf] %vm1681_vm12, %v1640_v60  ;;  %v1638_v54 = vpop.permute.xlu0 %1637  ;;  %v1743_v17 = vpop.permute.xlu2 %1742 }
 0x280   : > { %1708 = vst.msk [vmem:[#allocation2 + $0x68] sm:$0xf] %vm1681_vm12, %v1638_v54 }
 0x281   : > { %1837 = vst.msk [vmem:[#allocation2 + $0x8] sm:$0xf] %vm1834_vm13, %v1743_v17 }
 0x284   : > { %1792 = vrot.lane.b32.xlu1 %v3415_v20, %s2952_s7  ;;  %v1717_v20 = vrot.slane %v1715_v62, 4 }
 0x285   : > { %1790 = vrot.lane.b32.xlu0 %v3419_v50, %s2952_s7  ;;  %1917 = vrot.lane.b32.xlu2 %v3701_v14, %s2953_s8  ;;  %v1724_v50 = vshll.u32 %v4178_v22, 16 }
 0x286   : > { %v1646_v52 = vpop.permute.xlu1 %1645  ;;  %v1721_v58 = vor.u32 %v1720_v5, %v1717_v20 }
 0x287   : > { %1712 = vst.msk [vmem:[#allocation2 + $0x78] sm:$0xf] %vm1681_vm12, %v1646_v52  ;;  %v1644_v15 = vpop.permute.xlu0 %1643  ;;  %v1749_v3 = vpop.permute.xlu2 %1748  ;;  %v4315_v21 = vrot.slane %v1724_v50, 5  ;;  %v4999_v52 = vld [vmem:[#allocation48_spill] sm:$0xff] }
 0x288   : > { %1711 = vst.msk [vmem:[#allocation2 + $0x74] sm:$0xf] %vm1681_vm12, %v1644_v15  ;;  %v4318_v49 = vrot.slane %v1721_v58, 4 }
 0x289   : > { %1840 = vst.msk [vmem:[#allocation2 + $0x14] sm:$0xf] %vm1834_vm13, %v1749_v3 }
 0x28c   : > { %1927 = vrot.lane.b32.xlu1 %v3752_v39, %s2953_s8  ;;  %v1727_v39 = vsel %vm3045_vm2, %v4318_v49, %v4315_v21 }
 0x28d   : > { %1885 = vrot.lane.b32.xlu0 %v4950_v57, %s2953_s8  ;;  %1883 = vrot.lane.b32.xlu2 %v4951_v6, %s2953_s8  ;;  %v4990_v57 = vld [vmem:[#allocation38_spill] sm:$0xff] }
 0x28e   : > { %v1741_v14 = vpop.permute.xlu1 %1740 }
 0x28f   : > { %1836 = vst.msk [vmem:[#allocation2 + $0x4] sm:$0xf] %vm1834_vm13, %v1741_v14  ;;  %v1739_v32 = vpop.permute.xlu0 %1738  ;;  %v1755_v34 = vpop.permute.xlu2 %1754 }
 0x290   : > { %1835 = vst.msk [vmem:[#allocation2] sm:$0xf] %vm1834_vm13, %v1739_v32 }
 0x291   : > { %1843 = vst.msk [vmem:[#allocation2 + $0x20] sm:$0xf] %vm1834_vm13, %v1755_v34 }
 0x294   : > { %1895 = vrot.lane.b32.xlu1 %v4957_v44, %s2953_s8 }
 0x295   : > { %1784 = vrot.lane.b32.xlu0 %v4990_v57, %s2952_s7  ;;  %1929 = vrot.lane.b32.xlu2 %v3745_v55, %s2953_s8 }
 0x296   : > { %v1747_v6 = vpop.permute.xlu1 %1746 }
 0x297   : > { %1839 = vst.msk [vmem:[#allocation2 + $0x10] sm:$0xf] %vm1834_vm13, %v1747_v6  ;;  %v1745_v38 = vpop.permute.xlu0 %1744  ;;  %v1761_v44 = vpop.permute.xlu2 %1760 }
 0x298   : > { %1838 = vst.msk [vmem:[#allocation2 + $0xc] sm:$0xf] %vm1834_vm13, %v1745_v38 }
 0x299   : > { %1846 = vst.msk [vmem:[#allocation2 + $0x2c] sm:$0xf] %vm1834_vm13, %v1761_v44 }
 0x29c   : > { %1921 = vrot.lane.b32.xlu1 %v3733_v9, %s2953_s8  ;;  %v2040_v9 = vld [vmem:[%s4761_s1 + $0x10] sm:$0x3] }
 0x29d   : > { %1919 = vrot.lane.b32.xlu0 %v4964_v41, %s2953_s8  ;;  %1897 = vrot.lane.b32.xlu2 %v4991_v45, %s2953_s8  ;;  %v2130_v37 = vunpack.c.l.b16 %v2040_v9  ;;  %v4992_v41 = vld [vmem:[#allocation42_spill] sm:$0xff] }
 0x29e   : > { %v1753_v55 = vpop.permute.xlu1 %1752 }
 0x29f   : > { %1842 = vst.msk [vmem:[#allocation2 + $0x1c] sm:$0xf] %vm1834_vm13, %v1753_v55  ;;  %v1751_v36 = vpop.permute.xlu0 %1750  ;;  %v1767_v35 = vpop.permute.xlu2 %1766  ;;  %v2133_v2 = vpack.c.b16 %v2130_v37, %v2130_v37 }
 0x2a0   : > { %1841 = vst.msk [vmem:[#allocation2 + $0x18] sm:$0xf] %vm1834_vm13, %v1751_v36 }
 0x2a1   : > { %1849 = vst.msk [vmem:[#allocation2 + $0x38] sm:$0xf] %vm1834_vm13, %v1767_v35  ;;  %v2187_v13 = vsel %vm2185_vm14, %v2133_v2, 0 }
 0x2a2   : > { %2877 = vmatpush.bf16.msra.mxu2 %v2187_v13  ;;  %2194 = vmatpush.bf16.msra.mxu0 %v2187_v13 }
 0x2a3   : > { %2878 = vmatpush.bf16.msra.mxu3 %v2187_v13  ;;  %2876 = vmatpush.bf16.msra.mxu1 %v2187_v13 }
 0x2a4   : > { %1887 = vrot.lane.b32.xlu1 %v4992_v41, %s2953_s8 }
 0x2a5   : > { %1796 = vrot.lane.b32.xlu0 %v4993_v28, %s2952_s7  ;;  %1794 = vrot.lane.b32.xlu2 %v4994_v24, %s2952_s7 }
 0x2a6   : > { %v1759_v31 = vpop.permute.xlu1 %1758  ;;  %2880 = vmatpush.bf16.msra.mxu2 %v2875_v53  ;;  %2195 = vmatpush.bf16.msra.mxu0 %v2875_v53 }
 0x2a7   : > { %1845 = vst.msk [vmem:[#allocation2 + $0x28] sm:$0xf] %vm1834_vm13, %v1759_v31  ;;  %v1757_v42 = vpop.permute.xlu0 %1756  ;;  %v1773_v56 = vpop.permute.xlu2 %1772  ;;  %2881 = vmatpush.bf16.msra.mxu3 %v2875_v53  ;;  %2879 = vmatpush.bf16.msra.mxu1 %v2875_v53 }
 0x2a8   : > { %1844 = vst.msk [vmem:[#allocation2 + $0x24] sm:$0xf] %vm1834_vm13, %v1757_v42 }
 0x2a9   : > { %1852 = vst.msk [vmem:[#allocation2 + $0x44] sm:$0xf] %vm1834_vm13, %v1773_v56 }
 0x2aa   : > { %2883 = vmatpush.bf16.msra.mxu2 %v2874_v29  ;;  %2196 = vmatpush.bf16.msra.mxu0 %v2874_v29 }
 0x2ab   : > { %2884 = vmatpush.bf16.msra.mxu3 %v2874_v29  ;;  %2882 = vmatpush.bf16.msra.mxu1 %v2874_v29 }
 0x2ac   : > { %1933 = vrot.lane.b32.xlu1 %v4066_v10, %s2953_s8  ;;  %v320_v10 = vld [vmem:[%s3009_s25 + $0xd4] sm:$0x1] }
 0x2ad   : > { %1931 = vrot.lane.b32.xlu0 %v4073_v51, %s2953_s8  ;;  %1889 = vrot.lane.b32.xlu2 %v4995_v7, %s2953_s8  ;;  %v1731_v51 = vor.u32 %v1730_v11, %v4315_v21  ;;  %v1734_v1 = vshll.u32 %v320_v10, 16  ;;  %v1873_v4 = vrot.slane %v320_v10, 5 }
 0x2ae   : > { %v1765_v33 = vpop.permute.xlu1 %1764 }
 0x2af   : > { %1848 = vst.msk [vmem:[#allocation2 + $0x34] sm:$0xf] %vm1834_vm13, %v1765_v33  ;;  %v1763_v19 = vpop.permute.xlu0 %1762  ;;  %v1779_v22 = vpop.permute.xlu2 %1778  ;;  %v1732_v46 = vrot.slane %v1731_v51, 4  ;;  %v1736_v0 = vrot.slane %v1734_v1, 5  ;;  %v1874_v63 = vsel %vm3432_vm6, %v1872_v26, %v1873_v4 }
 0x2b0   : > { %1847 = vst.msk [vmem:[#allocation2 + $0x30] sm:$0xf] %vm1834_vm13, %v1763_v19 }
 0x2b1   : > { %1855 = vst.msk [vmem:[#allocation2 + $0x50] sm:$0xf] %vm1834_vm13, %v1779_v22  ;;  %v1737_v48 = vsel %vm3045_vm2, %v1732_v46, %v1736_v0 }
 0x2b4   : > { %1798 = vrot.lane.b32.xlu1 %v1727_v39, %s2952_s7 }
 0x2b5   : > { %1901 = vrot.lane.b32.xlu0 %v4996_v23, %s2953_s8  ;;  %1899 = vrot.lane.b32.xlu2 %v4997_v30, %s2953_s8 }
 0x2b6   : > { %v1771_v12 = vpop.permute.xlu1 %1770 }
 0x2b7   : > { %1851 = vst.msk [vmem:[#allocation2 + $0x40] sm:$0xf] %vm1834_vm13, %v1771_v12  ;;  %v1769_v61 = vpop.permute.xlu0 %1768  ;;  %v1910_v18 = vpop.permute.xlu2 %1909 }
 0x2b8   : > { %1850 = vst.msk [vmem:[#allocation2 + $0x3c] sm:$0xf] %vm1834_vm13, %v1769_v61 }
 0x2b9   : > { %1989 = vst.msk [vmem:[#allocation2 + $0x44] sm:$0xf] %vm1971_vm15, %v1910_v18  ;;  %v4465_v18 = vld [vmem:[%s4762_s2] ss:$0 sm:$0xff] }
 0x2bc   : > { %1937 = vrot.lane.b32.xlu1 %v1874_v63, %s2953_s8 }
 0x2bd   : > { %1935 = vrot.lane.b32.xlu0 %v4339_v25, %s2953_s8  ;;  %1800 = vrot.lane.b32.xlu2 %v1737_v48, %s2952_s7  ;;  %v4470_v48 = vld [vmem:[%s4763_s3] ss:$0 sm:$0xff]  ;;  %s260_s7 = scalar_lea.vmem %s4765_s5, %s2857_s29 }
 0x2be   : > { %v1777_v40 = vpop.permute.xlu1 %1776 }
 0x2bf   : > { %1854 = vst.msk [vmem:[#allocation2 + $0x4c] sm:$0xf] %vm1834_vm13, %v1777_v40  ;;  %v1775_v60 = vpop.permute.xlu0 %1774  ;;  %v1783_v47 = vpop.permute.xlu2 %1782 }
 0x2c0   : > { %1853 = vst.msk [vmem:[#allocation2 + $0x48] sm:$0xf] %vm1834_vm13, %v1775_v60 }
 0x2c1   : > { %1857 = vst.msk [vmem:[#allocation2 + $0x58] sm:$0xf] %vm1834_vm13, %v1783_v47  ;;  %v4478_v47 = vld [vmem:[%s251_s17] ss:$0 sm:$0xff] }
 0x2c5   : > { %1905 = vrot.lane.b32.xlu0 %v4998_v27, %s2953_s8  ;;  %1903 = vrot.lane.b32.xlu2 %v4999_v52, %s2953_s8 }
 0x2c6   : > { %v1908_v54 = vpop.permute.xlu1 %1907 }
 0x2c7   : > { %1988 = vst.msk [vmem:[#allocation2 + $0x40] sm:$0xf] %vm1971_vm15, %v1908_v54  ;;  %v1781_v17 = vpop.permute.xlu0 %1780  ;;  %v1787_v15 = vpop.permute.xlu2 %1786 }
 0x2c8   : > { %1856 = vst.msk [vmem:[#allocation2 + $0x54] sm:$0xf] %vm1834_vm13, %v1781_v17 }
 0x2c9   : > { %1859 = vst.msk [vmem:[#allocation2 + $0x60] sm:$0xf] %vm1834_vm13, %v1787_v15 }
 0x2ce   : > { %v1878_v62 = vpop.permute.xlu1 %1877  ;;  %v2866_v43 = vld [vmem:[#allocation2 + $0x40] sm:$0xff] }
 0x2cf   : > { %1973 = vst.msk [vmem:[#allocation2 + $0x4] sm:$0xf] %vm1971_vm15, %v1878_v62  ;;  %v1876_v3 = vpop.permute.xlu0 %1875  ;;  %2847 = vmatmul.msk.bf16.vlgmr.msra.gmra.mxu2 %vm2136_vm0, %v2866_v43  ;;  %v1882_v20 = vpop.permute.xlu2 %1881 }
 0x2d0   : > { %1972 = vst.msk [vmem:[#allocation2] sm:$0xf] %vm1971_vm15, %v1876_v3 }
 0x2d1   : > { %1975 = vst.msk [vmem:[#allocation2 + $0xc] sm:$0xf] %vm1971_vm15, %v1882_v20 }
 0x2d6   : > { %v1914_v5 = vpop.permute.xlu1 %1913 }
 0x2d7   : > { %1991 = vst.msk [vmem:[#allocation2 + $0x4c] sm:$0xf] %vm1971_vm15, %v1914_v5  ;;  %v1912_v50 = vpop.permute.xlu0 %1911  ;;  %v2858_v14 = vld [vmem:[#allocation2] sm:$0xff]  ;;  %v1892_v32 = vpop.permute.xlu2 %1891 }
 0x2d8   : > { %1990 = vst.msk [vmem:[#allocation2 + $0x48] sm:$0xf] %vm1971_vm15, %v1912_v50  ;;  %2839 = vmatmul.msk.bf16.vlgmr.msra.gmra.mxu0 %vm2136_vm0, %v2858_v14 }
 0x2d9   : > { %1980 = vst.msk [vmem:[#allocation2 + $0x20] sm:$0xf] %vm1971_vm15, %v1892_v32 }
 0x2de   : > { %v1880_v58 = vpop.permute.xlu1 %1879 }
 0x2df   : > { %1974 = vst.msk [vmem:[#allocation2 + $0x8] sm:$0xf] %vm1971_vm15, %v1880_v58  ;;  %v1789_v21 = vpop.permute.xlu0 %1788  ;;  %v2867_v34 = vld [vmem:[#allocation2 + $0x48] sm:$0xff]  ;;  %v1918_v49 = vpop.permute.xlu2 %1917 }
 0x2e0   : > { %1860 = vst.msk [vmem:[#allocation2 + $0x64] sm:$0xf] %vm1834_vm13, %v1789_v21  ;;  %2848 = vmatmul.msk.bf16.gmra.mxu2 %vm2136_vm0, %v2867_v34 }
 0x2e1   : > { %1993 = vst.msk [vmem:[#allocation2 + $0x54] sm:$0xf] %vm1971_vm15, %v1918_v49 }
 0x2e6   : > { %v1926_v39 = vpop.permute.xlu1 %1925  ;;  %v2859_v57 = vld [vmem:[#allocation2 + $0x8] sm:$0xff] }
 0x2e7   : > { %1997 = vst.msk [vmem:[#allocation2 + $0x64] sm:$0xf] %vm1971_vm15, %v1926_v39  ;;  %v1924_v6 = vpop.permute.xlu0 %1923  ;;  %v1884_v38 = vpop.permute.xlu2 %1883 }
 0x2e8   : > { %1996 = vst.msk [vmem:[#allocation2 + $0x60] sm:$0xf] %vm1971_vm15, %v1924_v6  ;;  %2840 = vmatmul.msk.bf16.gmra.mxu0 %vm2136_vm0, %v2859_v57 }
 0x2e9   : > { %1976 = vst.msk [vmem:[#allocation2 + $0x10] sm:$0xf] %vm1971_vm15, %v1884_v38 }
 0x2ee   : > { %v1916_v59 = vpop.permute.xlu1 %1915 }
 0x2ef   : > { %1992 = vst.msk [vmem:[#allocation2 + $0x50] sm:$0xf] %vm1971_vm15, %v1916_v59  ;;  %v1894_v44 = vpop.permute.xlu0 %1893  ;;  %v2870_v8 = vld [vmem:[#allocation2 + $0x60] sm:$0xff]  ;;  %v1930_v25 = vpop.permute.xlu2 %1929 }
 0x2f0   : > { %1981 = vst.msk [vmem:[#allocation2 + $0x24] sm:$0xf] %vm1971_vm15, %v1894_v44  ;;  %2851 = vmatmul.msk.bf16.vlgmr.msra.gmra.mxu3 %vm2136_vm0, %v2870_v8 }
 0x2f6   : > { %v1793_v55 = vpop.permute.xlu1 %1792  ;;  %v2868_v36 = vld [vmem:[#allocation2 + $0x50] sm:$0xff] }
 0x2f7   : > { %1862 = vst.msk [vmem:[#allocation2 + $0x6c] sm:$0xf] %vm1834_vm13, %v1793_v55  ;;  %v1791_v45 = vpop.permute.xlu0 %1790  ;;  %v2862_v9 = vld [vmem:[#allocation2 + $0x20] sm:$0xff]  ;;  %2849 = vmatmul.msk.bf16.gmra.mxu2 %vm2136_vm0, %v2868_v36  ;;  %v1898_v35 = vpop.permute.xlu2 %1897 }
 0x2f8   : > { %1861 = vst.msk [vmem:[#allocation2 + $0x68] sm:$0xf] %vm1834_vm13, %v1791_v45  ;;  %2843 = vmatmul.msk.bf16.vlgmr.msra.gmra.mxu1 %vm2136_vm0, %v2862_v9 }
 0x2f9   : > { %1999 = vst.msk [vmem:[#allocation2 + $0x6c] sm:$0xf] %vm1971_vm15, %v1930_v25 }
 0x2fa   : > { %1983 = vst.msk [vmem:[#allocation2 + $0x2c] sm:$0xf] %vm1971_vm15, %v1898_v35 }
 0x2fe   : > { %v1928_v37 = vpop.permute.xlu1 %1927 }
 0x2ff   : > { %1998 = vst.msk [vmem:[#allocation2 + $0x68] sm:$0xf] %vm1971_vm15, %v1928_v37  ;;  %v1886_v2 = vpop.permute.xlu0 %1885  ;;  %v1795_v41 = vpop.permute.xlu2 %1794 }
 0x300   : > { %1977 = vst.msk [vmem:[#allocation2 + $0x14] sm:$0xf] %vm1971_vm15, %v1886_v2 }
 0x301   : > { %1863 = vst.msk [vmem:[#allocation2 + $0x70] sm:$0xf] %vm1834_vm13, %v1795_v41 }
 0x306   : > { %v1896_v28 = vpop.permute.xlu1 %1895  ;;  %v2871_v13 = vld [vmem:[#allocation2 + $0x68] sm:$0xff] }
 0x307   : > { %1982 = vst.msk [vmem:[#allocation2 + $0x28] sm:$0xf] %vm1971_vm15, %v1896_v28  ;;  %v1785_v31 = vpop.permute.xlu0 %1784  ;;  %v2860_v42 = vld [vmem:[#allocation2 + $0x10] sm:$0xff]  ;;  %2852 = vmatmul.msk.bf16.gmra.mxu3 %vm2136_vm0, %v2871_v13  ;;  %v1890_v24 = vpop.permute.xlu2 %1889 }
 0x308   : > { %1858 = vst.msk [vmem:[#allocation2 + $0x5c] sm:$0xf] %vm1834_vm13, %v1785_v31  ;;  %2841 = vmatmul.msk.bf16.gmra.mxu0 %vm2136_vm0, %v2860_v42 }
 0x309   : > { %1979 = vst.msk [vmem:[#allocation2 + $0x1c] sm:$0xf] %vm1971_vm15, %v1890_v24 }
 0x30e   : > { %v1922_v53 = vpop.permute.xlu1 %1921  ;;  %v2863_v56 = vld [vmem:[#allocation2 + $0x28] sm:$0xff] }
 0x30f   : > { %1995 = vst.msk [vmem:[#allocation2 + $0x5c] sm:$0xf] %vm1971_vm15, %v1922_v53  ;;  %v1920_v29 = vpop.permute.xlu0 %1919  ;;  %2844 = vmatmul.msk.bf16.gmra.mxu1 %vm2136_vm0, %v2863_v56  ;;  %v1900_v16 = vpop.permute.xlu2 %1899 }
 0x310   : > { %1994 = vst.msk [vmem:[#allocation2 + $0x58] sm:$0xf] %vm1971_vm15, %v1920_v29 }
 0x311   : > { %1984 = vst.msk [vmem:[#allocation2 + $0x30] sm:$0xf] %vm1971_vm15, %v1900_v16 }
 0x316   : > { %v1888_v33 = vpop.permute.xlu1 %1887 }
 0x317   : > { %1978 = vst.msk [vmem:[#allocation2 + $0x18] sm:$0xf] %vm1971_vm15, %v1888_v33  ;;  %v1797_v19 = vpop.permute.xlu0 %1796  ;;  %v2869_v7 = vld [vmem:[#allocation2 + $0x58] sm:$0xff]  ;;  %v1801_v11 = vpop.permute.xlu2 %1800 }
 0x318   : > { %1864 = vst.msk [vmem:[#allocation2 + $0x74] sm:$0xf] %vm1834_vm13, %v1797_v19  ;;  %2850 = vmatmul.msk.bf16.gmra.mxu2 %vm2136_vm0, %v2869_v7 }
 0x319   : > { %1866 = vst.msk [vmem:[#allocation2 + $0x7c] sm:$0xf] %vm1834_vm13, %v1801_v11 }
 0x31e   : > { %v1934_v22 = vpop.permute.xlu1 %1933  ;;  %v2861_v10 = vld [vmem:[#allocation2 + $0x18] sm:$0xff] }
 0x31f   : > { %2001 = vst.msk [vmem:[#allocation2 + $0x74] sm:$0xf] %vm1971_vm15, %v1934_v22  ;;  %v1932_v51 = vpop.permute.xlu0 %1931  ;;  %2842 = vmatmul.msk.bf16.gmra.mxu0 %vm2136_vm0, %v2861_v10  ;;  %v1904_v1 = vpop.permute.xlu2 %1903 }
 0x320   : > { %2000 = vst.msk [vmem:[#allocation2 + $0x70] sm:$0xf] %vm1971_vm15, %v1932_v51 }
 0x321   : > { %1986 = vst.msk [vmem:[#allocation2 + $0x38] sm:$0xf] %vm1971_vm15, %v1904_v1 }
 0x326   : > { %v1799_v23 = vpop.permute.xlu1 %1798 }
 0x327   : > { %1865 = vst.msk [vmem:[#allocation2 + $0x78] sm:$0xf] %vm1834_vm13, %v1799_v23  ;;  %v1902_v26 = vpop.permute.xlu0 %1901  ;;  %v2872_v4 = vld [vmem:[#allocation2 + $0x70] sm:$0xff] }
 0x328   : > { %1985 = vst.msk [vmem:[#allocation2 + $0x34] sm:$0xf] %vm1971_vm15, %v1902_v26  ;;  %2853 = vmatmul.msk.bf16.gmra.mxu3 %vm2136_vm0, %v2872_v4 }
 0x32e   : > { %v1938_v12 = vpop.permute.xlu1 %1937 }
 0x32f   : > { %2003 = vst.msk [vmem:[#allocation2 + $0x7c] sm:$0xf] %vm1971_vm15, %v1938_v12  ;;  %v1936_v61 = vpop.permute.xlu0 %1935  ;;  %v2864_v30 = vld [vmem:[#allocation2 + $0x30] sm:$0xff] }
 0x330   : > { %2002 = vst.msk [vmem:[#allocation2 + $0x78] sm:$0xf] %vm1971_vm15, %v1936_v61  ;;  %2845 = vmatmul.msk.bf16.gmra.mxu1 %vm2136_vm0, %v2864_v30 }
 0x337   : > { %v1906_v46 = vpop.permute.xlu0 %1905  ;;  %v2873_v0 = vld [vmem:[#allocation2 + $0x78] sm:$0xff] }
 0x338   : > { %1987 = vst.msk [vmem:[#allocation2 + $0x3c] sm:$0xf] %vm1971_vm15, %v1906_v46  ;;  %2854 = vmatmul.msk.bf16.gmra.mxu3 %vm2136_vm0, %v2873_v0 }
 0x33f   : > { %v2865_v63 = vld [vmem:[#allocation2 + $0x38] sm:$0xff] }
 0x340   : > { %2846 = vmatmul.msk.bf16.gmra.mxu1 %vm2136_vm0, %v2865_v63 }
 0x352   : > { %v2238_v25 = vpop.f32.mrf.mxu2 }
 0x355   : > { %v2198_v40 = vpop.f32.mrf.mxu0 }
 0x356   : > { %v2282_v60 = vmul.f32 %v4465_v18, %v2198_v40 }
 0x358   : > { %v2318_v27 = vadd.f32 %v4470_v48, %v2282_v60 }
 0x35a   : > { %v2350_v54 = vmax.f32 %v2318_v27, 0.0  ;;  %v2240_v13 = vpop.f32.mrf.mxu2 }
 0x35c   : > { %v4482_v17 = vmul.f32 %v4478_v47, %v2350_v54 }
 0x35d   : > { %v2200_v52 = vpop.f32.mrf.mxu0 }
 0x35e   : > { %v2283_v15 = vmul.f32 %v4465_v18, %v2200_v52  ;;  %2450 = vrot.lane.b32.xlu1 %v4482_v17, %s2954_s28 }
 0x360   : > { %v2319_v62 = vadd.f32 %v4470_v48, %v2283_v15 }
 0x362   : > { %v2351_v43 = vmax.f32 %v2319_v62, 0.0 }
 0x363   : > { %v2243_v19 = vpop.f32.mrf.mxu2 }
 0x364   : > { %v4489_v3 = vmul.f32 %v4478_v47, %v2351_v43 }
 0x365   : > { %v2203_v20 = vpop.f32.mrf.mxu0 }
 0x366   : > { %v2284_v5 = vmul.f32 %v4465_v18, %v2203_v20  ;;  %2452 = vrot.lane.b32.xlu2 %v4489_v3, %s2954_s28 }
 0x368   : > { %v2320_v50 = vadd.f32 %v4470_v48, %v2284_v5 }
 0x36a   : > { %v2352_v14 = vmax.f32 %v2320_v50, 0.0 }
 0x36b   : > { %v2245_v0 = vpop.f32.mrf.mxu2 }
 0x36c   : > { %v4496_v32 = vmul.f32 %v4478_v47, %v2352_v14 }
 0x36d   : > { %v2205_v58 = vpop.f32.mrf.mxu0 }
 0x36e   : > { %v2285_v21 = vmul.f32 %v4465_v18, %v2205_v58  ;;  %2454 = vrot.lane.b32.xlu0 %v4496_v32, %s2954_s28 }
 0x370   : > { %v2321_v34 = vadd.f32 %v4470_v48, %v2285_v21 }
 0x372   : > { %v2353_v49 = vmax.f32 %v2321_v34, 0.0  ;;  %v2298_v34 = vmul.f32 %v4465_v18, %v2238_v25  ;;  %v2299_v25 = vmul.f32 %v4465_v18, %v2240_v13 }
 0x373   : > { %v4524_v53 = vpop.f32.mrf.mxu3 }
 0x374   : > { %v4503_v39 = vmul.f32 %v4478_v47, %v2353_v49 }
 0x375   : > { %v2218_v57 = vpop.f32.mrf.mxu1 }
 0x376   : > { %2456 = vrot.lane.b32.xlu1 %v4503_v39, %s2954_s28  ;;  %v2290_v35 = vmul.f32 %v4465_v18, %v2218_v57 }
 0x378   : > { %v2326_v41 = vadd.f32 %v4470_v48, %v2290_v35 }
 0x37a   : > { %v2358_v42 = vmax.f32 %v2326_v41, 0.0  ;;  %v2248_v20 = vpop.f32.mrf.mxu2 }
 0x37b   : > { %v4545_v12 = vpop.f32.mrf.mxu3 }
 0x37c   : > { %v4527_v56 = vmul.f32 %v4478_v47, %v2358_v42  ;;  %v2335_v42 = vadd.f32 %v4470_v48, %v2299_v25 }
 0x37d   : > { %v2220_v6 = vpop.f32.mrf.mxu1 }
 0x37e   : > { %v2291_v7 = vmul.f32 %v4465_v18, %v2220_v6 }
 0x380   : > { %v2327_v51 = vadd.f32 %v4470_v48, %v2291_v7  ;;  %v2300_v7 = vmul.f32 %v4465_v18, %v2243_v19 }
 0x382   : > { %v2359_v61 = vmax.f32 %v2327_v51, 0.0 }
 0x384   : > { %v4552_v40 = vmul.f32 %v4478_v47, %v2359_v61 }
 0x385   : > { %v2208_v38 = vpop.f32.mrf.mxu0 }
 0x386   : > { %v2286_v59 = vmul.f32 %v4465_v18, %v2208_v38  ;;  %v2250_v38 = vpop.f32.mrf.mxu2 }
 0x388   : > { %v2322_v44 = vadd.f32 %v4470_v48, %v2286_v59  ;;  %v2334_v59 = vadd.f32 %v4470_v48, %v2298_v34 }
 0x38a   : > { %v2354_v8 = vmax.f32 %v2322_v44, 0.0  ;;  %v4562_v52 = vpop.f32.mrf.mxu3 }
 0x38c   : > { %v4510_v55 = vmul.f32 %v4478_v47, %v2354_v8  ;;  %v2223_v36 = vpop.f32.mrf.mxu1 }
 0x38d   : > { %v2210_v45 = vpop.f32.mrf.mxu0  ;;  %v2292_v30 = vmul.f32 %v4465_v18, %v2223_v36 }
 0x38e   : > { %v2287_v9 = vmul.f32 %v4465_v18, %v2210_v45  ;;  %2458 = vrot.lane.b32.xlu2 %v4510_v55, %s2954_s28  ;;  %v2366_v45 = vmax.f32 %v2334_v59, 0.0 }
 0x38f   : > { %v2328_v60 = vadd.f32 %v4470_v48, %v2292_v30  ;;  %v2336_v30 = vadd.f32 %v4470_v48, %v2300_v7 }
 0x390   : > { %v2323_v37 = vadd.f32 %v4470_v48, %v2287_v9 }
 0x391   : > { %v2360_v62 = vmax.f32 %v2328_v60, 0.0 }
 0x392   : > { %v2355_v2 = vmax.f32 %v2323_v37, 0.0  ;;  %v4578_v49 = vpop.f32.mrf.mxu3  ;;  %v2301_v37 = vmul.f32 %v4465_v18, %v2245_v0 }
 0x393   : > { %v4567_v50 = vmul.f32 %v4478_v47, %v2360_v62  ;;  %v2303_v62 = vmul.f32 %v4465_v18, %v2250_v38 }
 0x394   : > { %v4519_v28 = vmul.f32 %v4478_v47, %v2355_v2  ;;  %v2225_v31 = vpop.f32.mrf.mxu1 }
 0x395   : > { %v2293_v24 = vmul.f32 %v4465_v18, %v2225_v31  ;;  %v4592_v31 = vmul.f32 %v4478_v47, %v2366_v45  ;;  %v2339_v34 = vadd.f32 %v4470_v48, %v2303_v62 }
 0x396   : > { %2460 = vrot.lane.b32.xlu0 %v4519_v28, %s2954_s28 }
 0x397   : > { %v2329_v29 = vadd.f32 %v4470_v48, %v2293_v24 }
 0x399   : > { %v2361_v22 = vmax.f32 %v2329_v29, 0.0  ;;  %v2337_v29 = vadd.f32 %v4470_v48, %v2301_v37 }
 0x39b   : > { %v4540_v23 = vmul.f32 %v4478_v47, %v2361_v22  ;;  %v2253_v41 = vpop.f32.mrf.mxu2 }
 0x39c   : > { %v2213_v16 = vpop.f32.mrf.mxu0  ;;  %v2304_v51 = vmul.f32 %v4465_v18, %v2253_v41 }
 0x39d   : > { %v2288_v33 = vmul.f32 %v4465_v18, %v2213_v16 }
 0x39e   : > { %2466 = vrot.lane.b32.xlu0 %v4527_v56, %s2954_s28 }
 0x39f   : > { %v2324_v11 = vadd.f32 %v4470_v48, %v2288_v33  ;;  %v2367_v33 = vmax.f32 %v2335_v42, 0.0 }
 0x3a1   : > { %v2356_v10 = vmax.f32 %v2324_v11, 0.0  ;;  %v2302_v11 = vmul.f32 %v4465_v18, %v2248_v20  ;;  %v4609_v61 = vmul.f32 %v4478_v47, %v2367_v33  ;;  %v2307_v20 = vmul.f32 %v4465_v18, %v4545_v12 }
 0x3a2   : > { %v2306_v12 = vmul.f32 %v4465_v18, %v4524_v53 }
 0x3a3   : > { %v4537_v1 = vmul.f32 %v4478_v47, %v2356_v10  ;;  %v2369_v10 = vmax.f32 %v2337_v29, 0.0  ;;  %v2255_v60 = vpop.f32.mrf.mxu2  ;;  %v2343_v59 = vadd.f32 %v4470_v48, %v2307_v20 }
 0x3a4   : > { %v2215_v26 = vpop.f32.mrf.mxu0  ;;  %v2342_v37 = vadd.f32 %v4470_v48, %v2306_v12 }
 0x3a5   : > { %v2289_v4 = vmul.f32 %v4465_v18, %v2215_v26  ;;  %2462 = vrot.lane.b32.xlu1 %v4537_v1, %s2954_s28  ;;  %v4617_v19 = vmul.f32 %v4478_v47, %v2369_v10  ;;  %v2375_v25 = vmax.f32 %v2343_v59, 0.0 }
 0x3a6   : > { %2472 = vrot.lane.b32.xlu0 %v4540_v23, %s2954_s28 }
 0x3a7   : > { %v2325_v46 = vadd.f32 %v4470_v48, %v2289_v4  ;;  %v4662_v53 = vmul.f32 %v4478_v47, %v2375_v25 }
 0x3a9   : > { %v2357_v63 = vmax.f32 %v2325_v46, 0.0  ;;  %v2338_v46 = vadd.f32 %v4470_v48, %v2302_v11 }
 0x3ab   : > { %v4556_v27 = vmul.f32 %v4478_v47, %v2357_v63  ;;  %v2268_v9 = vpop.f32.mrf.mxu3  ;;  %v2340_v63 = vadd.f32 %v4470_v48, %v2304_v51 }
 0x3ad   : > { %v2228_v54 = vpop.f32.mrf.mxu1  ;;  %2468 = vrot.lane.b32.xlu1 %v4552_v40, %s2954_s28  ;;  %2464 = vrot.lane.b32.xlu2 %v4556_v27, %s2954_s28 }
 0x3ae   : > { %v2294_v15 = vmul.f32 %v4465_v18, %v2228_v54  ;;  %v2368_v54 = vmax.f32 %v2336_v30, 0.0 }
 0x3b0   : > { %v2330_v43 = vadd.f32 %v4470_v48, %v2294_v15  ;;  %v2370_v15 = vmax.f32 %v2338_v46, 0.0 }
 0x3b2   : > { %v2362_v5 = vmax.f32 %v2330_v43, 0.0  ;;  %v2305_v43 = vmul.f32 %v4465_v18, %v2255_v60 }
 0x3b3   : > { %v2270_v26 = vpop.f32.mrf.mxu3 }
 0x3b4   : > { %v4570_v14 = vmul.f32 %v4478_v47, %v2362_v5  ;;  %v2372_v5 = vmax.f32 %v2340_v63, 0.0  ;;  %v2311_v33 = vmul.f32 %v4465_v18, %v2270_v26 }
 0x3b5   : > { %v2230_v58 = vpop.f32.mrf.mxu1  ;;  %2470 = vrot.lane.b32.xlu2 %v4567_v50, %s2954_s28 }
 0x3b6   : > { %v2295_v21 = vmul.f32 %v4465_v18, %v2230_v58  ;;  %2474 = vrot.lane.b32.xlu1 %v4570_v14, %s2954_s28  ;;  %v4631_v58 = vmul.f32 %v4478_v47, %v2368_v54  ;;  %v4640_v38 = vmul.f32 %v4478_v47, %v2372_v5 }
 0x3b8   : > { %v2331_v57 = vadd.f32 %v4470_v48, %v2295_v21  ;;  %v4634_v21 = vmul.f32 %v4478_v47, %v2370_v15 }
 0x3ba   : > { %v2363_v6 = vmax.f32 %v2331_v57, 0.0  ;;  %v2341_v57 = vadd.f32 %v4470_v48, %v2305_v43 }
 0x3bc   : > { %v4583_v44 = vmul.f32 %v4478_v47, %v2363_v6  ;;  %v2273_v6 = vpop.f32.mrf.mxu3  ;;  %v2373_v45 = vmax.f32 %v2341_v57, 0.0 }
 0x3bd   : > { %v2233_v8 = vpop.f32.mrf.mxu1  ;;  %v2312_v63 = vmul.f32 %v4465_v18, %v2273_v6 }
 0x3be   : > { %v2296_v36 = vmul.f32 %v4465_v18, %v2233_v8  ;;  %2476 = vrot.lane.b32.xlu2 %v4583_v44, %s2954_s28  ;;  %v2371_v8 = vmax.f32 %v2339_v34, 0.0  ;;  %v4659_v42 = vmul.f32 %v4478_v47, %v2373_v45 }
 0x3bf   : > { %v2348_v62 = vadd.f32 %v4470_v48, %v2312_v63 }
 0x3c0   : > { %v2332_v35 = vadd.f32 %v4470_v48, %v2296_v36  ;;  %v2308_v36 = vmul.f32 %v4465_v18, %v4562_v52 }
 0x3c2   : > { %v2364_v2 = vmax.f32 %v2332_v35, 0.0  ;;  %v2310_v35 = vmul.f32 %v4465_v18, %v2268_v9  ;;  %v2344_v41 = vadd.f32 %v4470_v48, %v2308_v36  ;;  %v2374_v9 = vmax.f32 %v2342_v37, 0.0 }
 0x3c4   : > { %v4596_v24 = vmul.f32 %v4478_v47, %v2364_v2  ;;  %v4655_v2 = vmul.f32 %v4478_v47, %v2371_v8  ;;  %v2346_v29 = vadd.f32 %v4470_v48, %v2310_v35  ;;  %v2275_v52 = vpop.f32.mrf.mxu3 }
 0x3c5   : > { %v2235_v16 = vpop.f32.mrf.mxu1  ;;  %v2313_v11 = vmul.f32 %v4465_v18, %v2275_v52 }
 0x3c6   : > { %v2297_v13 = vmul.f32 %v4465_v18, %v2235_v16  ;;  %2478 = vrot.lane.b32.xlu0 %v4596_v24, %s2954_s28  ;;  %2482 = vrot.lane.b32.xlu2 %v4592_v31, %s2954_s28  ;;  %v2376_v16 = vmax.f32 %v2344_v41, 0.0  ;;  %v2378_v7 = vmax.f32 %v2346_v29, 0.0 }
 0x3c8   : > { %v2333_v22 = vadd.f32 %v4470_v48, %v2297_v13  ;;  %v2309_v13 = vmul.f32 %v4465_v18, %v4578_v49  ;;  %v4679_v10 = vmul.f32 %v4478_v47, %v2376_v16  ;;  %v4684_v30 = vmul.f32 %v4478_v47, %v2378_v7 }
 0x3c9   : > { %v2349_v49 = vadd.f32 %v4470_v48, %v2313_v11  ;;  %v2380_v18 = vmax.f32 %v2348_v62, 0.0 }
 0x3ca   : > { %v2365_v4 = vmax.f32 %v2333_v22, 0.0  ;;  %v4676_v22 = vmul.f32 %v4478_v47, %v2374_v9  ;;  %v2345_v51 = vadd.f32 %v4470_v48, %v2309_v13 }
 0x3cb   : > { %v2381_v60 = vmax.f32 %v2349_v49, 0.0  ;;  %v4711_v20 = vmul.f32 %v4478_v47, %v2380_v18 }
 0x3cc   : > { %v4614_v0 = vmul.f32 %v4478_v47, %v2365_v4  ;;  %v2347_v4 = vadd.f32 %v4470_v48, %v2311_v33  ;;  %v2377_v26 = vmax.f32 %v2345_v51, 0.0  ;;  %v2453_v48 = vpop.permute.xlu2 %2452 }
 0x3cd   : > { %v4702_v43 = vmul.f32 %v4478_v47, %v2381_v60  ;;  %v2547_v8 = vadd.f32 %v2453_v48, %v4489_v3 }
 0x3ce   : > { %2484 = vrot.lane.b32.xlu0 %v4609_v61, %s2954_s28  ;;  %2480 = vrot.lane.b32.xlu1 %v4614_v0, %s2954_s28  ;;  %v2379_v46 = vmax.f32 %v2347_v4, 0.0  ;;  %v4695_v54 = vmul.f32 %v4478_v47, %v2377_v26 }
 0x3cf   : > { %2488 = vrot.lane.b32.xlu2 %v4617_v19, %s2954_s28 }
 0x3d0   : > { %v4698_v15 = vmul.f32 %v4478_v47, %v2379_v46  ;;  %v2451_v57 = vpop.permute.xlu1 %2450 }
 0x3d1   : > { %v2546_v6 = vadd.f32 %v2451_v57, %v4482_v17 }
 0x3d6   : > { %2490 = vrot.lane.b32.xlu0 %v4634_v21, %s2954_s28  ;;  %2486 = vrot.lane.b32.xlu1 %v4631_v58, %s2954_s28 }
 0x3d7   : > { %2494 = vrot.lane.b32.xlu2 %v4640_v38, %s2954_s28 }
 0x3de   : > { %2496 = vrot.lane.b32.xlu0 %v4659_v42, %s2954_s28  ;;  %2492 = vrot.lane.b32.xlu1 %v4655_v2, %s2954_s28 }
 0x3df   : > { %2500 = vrot.lane.b32.xlu2 %v4662_v53, %s2954_s28 }
 0x3e0   : > { %v2455_v12 = vpop.permute.xlu0 %2454 }
 0x3e1   : > { %v2548_v47 = vadd.f32 %v2455_v12, %v4496_v32 }
 0x3e6   : > { %2502 = vrot.lane.b32.xlu0 %v4679_v10, %s2954_s28  ;;  %2498 = vrot.lane.b32.xlu1 %v4676_v22, %s2954_s28 }
 0x3e7   : > { %2506 = vrot.lane.b32.xlu2 %v4684_v30, %s2954_s28 }
 0x3e8   : > { %v2459_v5 = vpop.permute.xlu2 %2458  ;;  %v2457_v36 = vpop.permute.xlu1 %2456 }
 0x3e9   : > { %v2549_v37 = vadd.f32 %v2457_v36, %v4503_v39  ;;  %v2550_v52 = vadd.f32 %v2459_v5, %v4510_v55 }
 0x3ee   : > { %2508 = vrot.lane.b32.xlu0 %v4698_v15, %s2954_s28  ;;  %2504 = vrot.lane.b32.xlu1 %v4695_v54, %s2954_s28 }
 0x3ef   : > { %2512 = vrot.lane.b32.xlu2 %v4702_v43, %s2954_s28 }
 0x3f6   : > { %2510 = vrot.lane.b32.xlu1 %v4711_v20, %s2954_s28 }
 0x407   : > { %v2465_v34 = vpop.permute.xlu2 %2464 }
 0x408   : > { %v2461_v45 = vpop.permute.xlu0 %2460 }
 0x409   : > { %v2551_v16 = vadd.f32 %v2461_v45, %v4519_v28 }
 0x40f   : > { %v2471_v59 = vpop.permute.xlu2 %2470 }
 0x410   : > { %2578 = vxpose.xlu0.b32.start [1/16] (narrow) %v2546_v6, 8  ;;  %v2467_v41 = vpop.permute.xlu0 %2466 }
 0x411   : > { %v2554_v28 = vadd.f32 %v2467_v41, %v4527_v56 }
 0x417   : > { %v2463_v35 = vpop.permute.xlu1 %2462 }
 0x418   : > { %2579 = vxpose.xlu0.b32.cont [2/16] (narrow) %v2547_v8, 8  ;;  %v2477_v25 = vpop.permute.xlu2 %2476  ;;  %v2473_v3 = vpop.permute.xlu0 %2472  ;;  %v2552_v33 = vadd.f32 %v2463_v35, %v4537_v1 }
 0x419   : > { %v2557_v56 = vadd.f32 %v2473_v3, %v4540_v23 }
 0x41f   : > { %v2469_v9 = vpop.permute.xlu1 %2468 }
 0x420   : > { %2580 = vxpose.xlu0.b32.cont [3/16] (narrow) %v2548_v47, 8  ;;  %v2483_v29 = vpop.permute.xlu2 %2482  ;;  %v2555_v1 = vadd.f32 %v2469_v9, %v4552_v40 }
 0x421   : > { %v2562_v17 = vadd.f32 %v2483_v29, %v4592_v31  ;;  %v2553_v31 = vadd.f32 %v2465_v34, %v4556_v27  ;;  %v2556_v27 = vadd.f32 %v2471_v59, %v4567_v50  ;;  %v2559_v50 = vadd.f32 %v2477_v25, %v4583_v44 }
 0x428   : > { %2581 = vxpose.xlu0.b32.cont [4/16] (narrow) %v2549_v37, 8  ;;  %v2475_v13 = vpop.permute.xlu1 %2474 }
 0x429   : > { %v2489_v4 = vpop.permute.xlu2 %2488  ;;  %v2558_v40 = vadd.f32 %v2475_v13, %v4570_v14 }
 0x42a   : > { %v2565_v49 = vadd.f32 %v2489_v4, %v4617_v19 }
 0x42b   : > { %2610 = vxpose.xlu1.b32.start [1/16] (narrow) %v2562_v17, 8 }
 0x430   : > { %2582 = vxpose.xlu0.b32.cont [5/16] (narrow) %v2550_v52, 8 }
 0x431   : > { %v2495_v63 = vpop.permute.xlu2 %2494 }
 0x432   : > { %v2568_v19 = vadd.f32 %v2495_v63, %v4640_v38 }
 0x438   : > { %2583 = vxpose.xlu0.b32.cont [6/16] (narrow) %v2551_v16, 8  ;;  %v2479_v32 = vpop.permute.xlu0 %2478 }
 0x439   : > { %v2560_v23 = vadd.f32 %v2479_v32, %v4596_v24  ;;  %v2501_v18 = vpop.permute.xlu2 %2500 }
 0x43a   : > { %v2571_v38 = vadd.f32 %v2501_v18, %v4662_v53 }
 0x440   : > { %v2485_v7 = vpop.permute.xlu0 %2484  ;;  %2584 = vxpose.xlu0.b32.cont [7/16] (narrow) %v2552_v33, 8  ;;  %v2481_v39 = vpop.permute.xlu1 %2480 }
 0x441   : > { %v2563_v11 = vadd.f32 %v2485_v7, %v4609_v61  ;;  %v2561_v14 = vadd.f32 %v2481_v39, %v4614_v0 }
 0x443   : > { %2611 = vxpose.xlu1.b32.cont [2/16] (narrow) %v2563_v11, 8 }
 0x448   : > { %v2487_v51 = vpop.permute.xlu1 %2486  ;;  %2585 = vxpose.xlu0.b32.cont [8/16] (narrow) %v2553_v31, 8  ;;  %v2491_v26 = vpop.permute.xlu0 %2490 }
 0x449   : > { %v2564_v55 = vadd.f32 %v2487_v51, %v4631_v58  ;;  %v2566_v61 = vadd.f32 %v2491_v26, %v4634_v21 }
 0x44b   : > { %2612 = vxpose.xlu1.b32.cont [3/16] (narrow) %v2564_v55, 8 }
 0x450   : > { %2586 = vxpose.xlu0.b32.cont [9/16] (narrow) %v2554_v28, 8  ;;  %v2493_v46 = vpop.permute.xlu1 %2492  ;;  %v2497_v60 = vpop.permute.xlu0 %2496 }
 0x451   : > { %v2567_v58 = vadd.f32 %v2493_v46, %v4655_v2  ;;  %v2569_v21 = vadd.f32 %v2497_v60, %v4659_v42 }
 0x453   : > { %2613 = vxpose.xlu1.b32.cont [4/16] (narrow) %v2565_v49, 8 }
 0x458   : > { %2587 = vxpose.xlu0.b32.cont [10/16] (narrow) %v2555_v1, 8  ;;  %v2499_v62 = vpop.permute.xlu1 %2498  ;;  %v2503_v48 = vpop.permute.xlu0 %2502 }
 0x459   : > { %v2570_v2 = vadd.f32 %v2499_v62, %v4676_v22  ;;  %v2572_v42 = vadd.f32 %v2503_v48, %v4679_v10  ;;  %v2507_v22 = vpop.permute.xlu2 %2506 }
 0x45a   : > { %v2574_v24 = vadd.f32 %v2507_v22, %v4684_v30 }
 0x45b   : > { %2614 = vxpose.xlu1.b32.cont [5/16] (narrow) %v2566_v61, 8 }
 0x460   : > { %2588 = vxpose.xlu0.b32.cont [11/16] (narrow) %v2556_v27, 8  ;;  %v2505_v44 = vpop.permute.xlu1 %2504  ;;  %v2509_v34 = vpop.permute.xlu0 %2508 }
 0x461   : > { %v2573_v5 = vadd.f32 %v2505_v44, %v4695_v54  ;;  %v2575_v53 = vadd.f32 %v2509_v34, %v4698_v15  ;;  %v2513_v6 = vpop.permute.xlu2 %2512 }
 0x462   : > { %v2577_v10 = vadd.f32 %v2513_v6, %v4702_v43 }
 0x463   : > { %2615 = vxpose.xlu1.b32.cont [6/16] (narrow) %v2567_v58, 8 }
 0x468   : > { %2589 = vxpose.xlu0.b32.cont [12/16] (narrow) %v2557_v56, 8  ;;  %v2511_v57 = vpop.permute.xlu1 %2510 }
 0x469   : > { %v2576_v0 = vadd.f32 %v2511_v57, %v4711_v20 }
 0x46b   : > { %2616 = vxpose.xlu1.b32.cont [7/16] (narrow) %v2568_v19, 8 }
 0x470   : > { %2590 = vxpose.xlu0.b32.cont [13/16] (narrow) %v2558_v40, 8 }
 0x473   : > { %2617 = vxpose.xlu1.b32.cont [8/16] (narrow) %v2569_v21, 8 }
 0x478   : > { %2591 = vxpose.xlu0.b32.cont [14/16] (narrow) %v2559_v50, 8 }
 0x47b   : > { %2618 = vxpose.xlu1.b32.cont [9/16] (narrow) %v2570_v2, 8 }
 0x480   : > { %2592 = vxpose.xlu0.b32.cont [15/16] (narrow) %v2560_v23, 8 }
 0x483   : > { %2619 = vxpose.xlu1.b32.cont [10/16] (narrow) %v2571_v38, 8 }
 0x488   : > { %2593 = vxpose.xlu0.b32.end [16/16] (narrow) %v2561_v14, 8 }
 0x48b   : > { %2620 = vxpose.xlu1.b32.cont [11/16] (narrow) %v2572_v42, 8 }
 0x493   : > { %2621 = vxpose.xlu1.b32.cont [12/16] (narrow) %v2573_v5, 8 }
 0x49b   : > { %2622 = vxpose.xlu1.b32.cont [13/16] (narrow) %v2574_v24, 8 }
 0x4a3   : > { %2623 = vxpose.xlu1.b32.cont [14/16] (narrow) %v2575_v53, 8 }
 0x4ab   : > { %2624 = vxpose.xlu1.b32.cont [15/16] (narrow) %v2576_v0, 8 }
 0x4b3   : > { %2625 = vxpose.xlu1.b32.end [16/16] (narrow) %v2577_v10, 8 }
 0x4b4   : > { %v2594_v54 = vpop.trf.xlu0 }
 0x4df   : > { %v2626_v59 = vpop.trf.xlu1 }
 0x4e0   : > { %v2644_v12 = vrot.slane %v2626_v59, 4 }
 0x4e2   : > { %v2646_v30 = vsel %vm2645_vm1, %v2594_v54, %v2644_v12 }
 0x4e3   : > { %2648 = vst [vmem:[%s260_s7] sm:$0xff] %v2646_v30 }
 0x4e4 PF: > { %s15_s20 = sadd.s32 1, %s2944_s20   ;;  %s5000_s18 = smov %s2940_s19 }
 0x4e5   : > { %p12_p5 = scmp.ge.s32.totalorder %s15_s20, 4   ;;  %s5001_s19 = smov %s5003_s21 }
 0x4e7   :  { %14 = sbr.rel (!%p12_p5) target bundleno = 2 (0x2), region = 74 }

</bundles_post_ra>
